<compile_context>
chip_gen: v5e
topology: v5e:2x2
jax: 0.10.0
libtpu: 0.0.40
codegen_flags: <defaults>
</compile_context>

<pallas_src>
import functools

import jax
import jax.numpy as jnp
from jax.experimental import pallas as pl
from jax.experimental.pallas import tpu as pltpu


# ----------------------------- static geometry helpers -----------------------------

def _round_up(x, m):
    return ((x + m - 1) // m) * m


def _conv_out(n, k, s):
    return (n - k) // s + 1


def _layer_geoms(H, W, cin, couts, K, S):
    geoms, h, w, c = [], H, W, cin
    for cout in couts:
        oh, ow = _conv_out(h, K, S), _conv_out(w, K, S)
        geoms.append(dict(Hin=h, Win=w, Cin=c, OH=oh, OW=ow, Cout=cout))
        h, w, c = oh, ow, cout
    return geoms


def _storage_positions(geoms, i, K, S):
    """Spatial (h, w) coordinate of layer-i's output held in each activation row.

    Last layer: plain row-major (oh, ow) (this is the kernel output order).
    Earlier layers: rows ordered (kh_next, kw_next, oh_next, ow_next) with coordinate
    (oh_next*S + kh_next, ow_next*S + kw_next).  Spatial positions are (cheaply)
    duplicated so that every im2col tap of the NEXT layer is one contiguous row slice
    of the scratch buffer (source row = (kh*K+kw)*OHn*OWn + oh*OWn + ow).
    """
    if i == len(geoms) - 1:
        return [(oh, ow) for oh in range(geoms[i]["OH"]) for ow in range(geoms[i]["OW"])]
    ohn, own = geoms[i + 1]["OH"], geoms[i + 1]["OW"]
    return [(oh * S + kh, ow * S + kw)
            for kh in range(K) for kw in range(K)
            for oh in range(ohn) for ow in range(own)]


# --------------------------------- Pallas kernel -----------------------------------

def _gather_rows(a_ref, rows):
    """Read the given (static) rows of a 2-D VMEM ref, split into contiguous runs.
    For the configurations used here every tap is a single contiguous slice."""
    runs, start, length = [], rows[0], 1
    for r in rows[1:]:
        if r == start + length:
            length += 1
        else:
            runs.append((start, length))
            start, length = r, 1
    runs.append((start, length))
    parts = [a_ref[s:s + l, :] for s, l in runs]
    return parts[0] if len(parts) == 1 else jnp.concatenate(parts, axis=0)


def _next_layer_im2col(a_ref, next_pos, own, K, dtype):
    """Assemble the [M_next, K*K*Cpad] im2col for the next conv from the duplicated-order
    activation scratch of the current layer (contiguous, 128-lane-aligned pieces)."""
    m_blk = a_ref.shape[0] // (K * K)           # rows per tap block in the scratch
    taps = []
    for kh in range(K):
        for kw in range(K):
            base = (kh * K + kw) * m_blk
            rows = [base + oh * own + ow for (oh, ow) in next_pos]
            taps.append(_gather_rows(a_ref, rows).astype(dtype))
    return jnp.concatenate(taps, axis=1)


def _fused_kernel(geoms, pos, K, compute_dtype, x_ref, *refs):
    L = len(geoms)
    w_refs = [refs[3 * i + 0] for i in range(L)]
    s_refs = [refs[3 * i + 1] for i in range(L)]     # folded BN scale   [1, Cpad] f32
    b_refs = [refs[3 * i + 2] for i in range(L)]     # folded BN shift   [1, Cpad] f32
    o_ref = refs[3 * L]
    act_refs = list(refs[3 * L + 1:])                # L-1 VMEM scratch activations (f32)

    x = x_ref[...]                                   # [M0, K*K*Cin] in compute dtype
    for i in range(L):
        # Conv = ONE MXU matmul over the fused (tap x channel) contraction dim,
        # f32 accumulation; folded eval-mode BatchNorm + conv bias + ReLU in f32.
        y = jnp.dot(x, w_refs[i][...], preferred_element_type=jnp.float32)
        y = jnp.maximum(y * s_refs[i][...] + b_refs[i][...], 0.0)
        # TODO(synk): Dropout(p) is identity in eval mode; training-mode dropout masking
        # and batch-statistics BatchNorm are not implemented.
        if i == L - 1:
            o_ref[...] = y.astype(o_ref.dtype)
        else:
            act_refs[i][...] = y                     # lane-dense, unmasked full store
            x = _next_layer_im2col(act_refs[i], pos[i + 1],
                                   geoms[i + 1]["OW"], K, compute_dtype)


# ----------------------------------- wrapper ----------------------------------------

def feature_extractor(x_nchw, params, *, stride=3, eps=1e-5,
                      compute_dtype=jnp.bfloat16):
    """Eval-mode FeatureExtractor forward pass: NCHW in, NCHW out."""
    N, Cin, H, W = x_nchw.shape
    K = params[0]["w"].shape[0]
    S = stride
    L = len(params)
    couts = [p["w"].shape[-1] for p in params]
    geoms = _layer_geoms(H, W, Cin, couts, K, S)
    pos = [_storage_positions(geoms, i, K, S) for i in range(L)]

    # Lane-dense padded channel counts for intermediate activations (last layer unpadded).
    cpad = [(_round_up(g["Cout"], 128) if i < L - 1 else g["Cout"])
            for i, g in enumerate(geoms)]
    cin_pad = [Cin] + cpad[:-1]

    # ---- host glue: lane-dense im2col of the raw input for layer 0 (strided slices only,
    #      no gather), assembled directly in the duplicated storage order pos[0] ----
    x_nhwc = jnp.transpose(x_nchw, (0, 2, 3, 1))
    OH0, OW0 = geoms[0]["OH"], geoms[0]["OW"]
    taps = []
    for kh in range(K):
        for kw in range(K):
            taps.append(jax.lax.slice(
                x_nhwc,
                (0, kh, kw, 0),
                (N, kh + (OH0 - 1) * S + 1, kw + (OW0 - 1) * S + 1, Cin),
                (1, S, S, 1)))
    patches4 = jnp.concatenate(taps, axis=-1)               # [N, OH0, OW0, K*K*Cin]
    KKC = K * K * Cin
    if L == 1:
        x0 = patches4.reshape(N, OH0 * OW0, KKC)             # row-major == pos[0]
    else:
        OH1, OW1 = geoms[1]["OH"], geoms[1]["OW"]
        blocks = []
        for kh in range(K):
            for kw in range(K):
                blk = patches4[:, kh:kh + (OH1 - 1) * S + 1:S,
                               kw:kw + (OW1 - 1) * S + 1:S, :]
                blocks.append(blk.reshape(N, OH1 * OW1, KKC))
        x0 = jnp.concatenate(blocks, axis=1)                  # (kh,kw,oh1,ow1) == pos[0]
    x0 = x0.astype(compute_dtype)                             # [N, M0, K*K*Cin]

    # ---- fold conv bias + eval-mode BatchNorm; pad weights/scale/shift (host, free) ----
    inputs = [x0]
    in_specs = [pl.BlockSpec((None,) + x0.shape[1:], lambda n: (n, 0, 0))]
    flops = 0
    for i, p in enumerate(params):
        g = geoms[i]
        w = jnp.pad(p["w"], ((0, 0), (0, 0),
                             (0, cin_pad[i] - g["Cin"]),
                             (0, cpad[i] - g["Cout"])))
        w2d = w.reshape(K * K * cin_pad[i], cpad[i]).astype(compute_dtype)
        inv = jax.lax.rsqrt(p["var"] + eps)
        scale = p["gamma"] * inv
        shift = p["beta"] + scale * (p["b"] - p["mean"])
        scale = jnp.pad(scale, (0, cpad[i] - g["Cout"])).reshape(1, cpad[i])
        shift = jnp.pad(shift, (0, cpad[i] - g["Cout"])).reshape(1, cpad[i])
        inputs += [w2d, scale.astype(jnp.float32), shift.astype(jnp.float32)]
        in_specs += [pl.BlockSpec(w2d.shape, lambda n: (0, 0)),
                     pl.BlockSpec((1, cpad[i]), lambda n: (0, 0)),
                     pl.BlockSpec((1, cpad[i]), lambda n: (0, 0))]
        flops += 2 * N * len(pos[i]) * (K * K * cin_pad[i]) * cpad[i]

    M_last, C_last = len(pos[-1]), geoms[-1]["Cout"]
    out_shape = jax.ShapeDtypeStruct((N, M_last, C_last), jnp.float32)
    bytes_accessed = int(sum(a.nbytes for a in inputs)
                         + N * M_last * C_last * 4)

    out = pl.pallas_call(
        functools.partial(_fused_kernel, geoms, pos, K, compute_dtype),
        out_shape=out_shape,
        grid=(N,),
        in_specs=in_specs,
        out_specs=pl.BlockSpec((None, M_last, C_last), lambda n: (n, 0, 0)),
        scratch_shapes=[pltpu.VMEM((len(pos[i]), cpad[i]), jnp.float32)
                        for i in range(L - 1)],
        compiler_params=pltpu.CompilerParams(dimension_semantics=("parallel",)),
        cost_estimate=pl.CostEstimate(flops=int(flops), transcendentals=0,
                                      bytes_accessed=bytes_accessed),
    )(*inputs)

    out = out.reshape(N, geoms[-1]["OH"], geoms[-1]["OW"], C_last)
    return jnp.transpose(out, (0, 3, 1, 2))          # NHWC -> NCHW (match PyTorch)


# --------------------------------- init / reference ---------------------------------

def init_params(key, input_channels=3, num_layers=3, kernel_size=5):
    """Deterministic parameter init mirroring FeatureExtractor.__init__ shapes (HWIO conv
    weights, nn.BatchNorm2d default gamma/beta/running stats)."""
    channels = [16, 64, 256, 512, 1024]
    params, cin = [], input_channels
    for i in range(num_layers):
        cout = channels[i]
        key, kw_, kb_ = jax.random.split(key, 3)
        bound = 1.0 / ((cin * kernel_size * kernel_size) ** 0.5)
        w = jax.random.uniform(kw_, (kernel_size, kernel_size, cin, cout),
                               jnp.float32, -bound, bound)
        b = jax.random.uniform(kb_, (cout,), jnp.float32, -bound, bound)
        params.append(dict(
            w=w, b=b,
            gamma=jnp.ones((cout,), jnp.float32),
            beta=jnp.zeros((cout,), jnp.float32),
            mean=jnp.zeros((cout,), jnp.float32),
            var=jnp.ones((cout,), jnp.float32),
        ))
        cin = cout
    return params


def feature_extractor_ref(x_nchw, params, *, stride=3, eps=1e-5,
                          compute_dtype=jnp.float32):
    """Pure-JAX reference.  With compute_dtype=bfloat16 it applies exactly the same
    operand quantization as the kernel (f32 accumulation, f32 BN/ReLU epilogue)."""
    x = x_nchw
    for p in params:
        y = jax.lax.conv_general_dilated(
            x.astype(compute_dtype), p["w"].astype(compute_dtype),
            (stride, stride), "VALID",
            dimension_numbers=("NCHW", "HWIO", "NCHW"),
            preferred_element_type=jnp.float32)
        y = y + p["b"][None, :, None, None]
        inv = jax.lax.rsqrt(p["var"] + eps)
        y = (y - p["mean"][None, :, None, None]) * (p["gamma"] * inv)[None, :, None, None] \
            + p["beta"][None, :, None, None]
        x = jnp.maximum(y, 0.0)
    return x


# ------------------------------------- test ----------------------------------------

if __name__ == "__main__":
    key = jax.random.PRNGKey(0)
    kx, kp = jax.random.split(key)

    # num_layers=3 (a constructor arg of the module) keeps spatial shapes small:
    # kernel=5, stride=3:  53 -> 17 -> 5 -> 1.   Channels: 3 -> 16 -> 64 -> 256.
    x = jax.random.normal(kx, (2, 3, 53, 53), jnp.float32)
    params = init_params(kp, input_channels=3, num_layers=3, kernel_size=5)

    fwd = jax.jit(functools.partial(feature_extractor, stride=3))
    out = jax.block_until_ready(fwd(x, params))
    assert out.shape == (2, 256, 1, 1), out.shape

    # Tight check vs a reference using the same bf16-operand / f32-accumulation recipe.
    ref_bf16 = feature_extractor_ref(x, params, stride=3, compute_dtype=jnp.bfloat16)
    assert jnp.allclose(out, ref_bf16, rtol=5e-3, atol=5e-3), "mismatch vs bf16 reference"

    # Loose sanity check vs the full-f32 reference (only bf16 operand rounding differs).
    ref_f32 = feature_extractor_ref(x, params, stride=3, compute_dtype=jnp.float32)
    assert jnp.allclose(out, ref_f32, rtol=1e-1, atol=1e-1), "mismatch vs f32 reference"

    print("KERNEL_OK")
</pallas_src>

<mosaic_0001>
module attributes {stable_mosaic.version = 11 : i64} {
  func.func @_fused_kernel(%arg0: i32, %arg1: memref<1x625x75xbf16, #tpu.memory_space<vmem>>, %arg2: memref<75x128xbf16, #tpu.memory_space<vmem>>, %arg3: memref<1x128xf32, #tpu.memory_space<vmem>>, %arg4: memref<1x128xf32, #tpu.memory_space<vmem>>, %arg5: memref<3200x128xbf16, #tpu.memory_space<vmem>>, %arg6: memref<1x128xf32, #tpu.memory_space<vmem>>, %arg7: memref<1x128xf32, #tpu.memory_space<vmem>>, %arg8: memref<3200x256xbf16, #tpu.memory_space<vmem>>, %arg9: memref<1x256xf32, #tpu.memory_space<vmem>>, %arg10: memref<1x256xf32, #tpu.memory_space<vmem>>, %arg11: memref<1x1x256xf32, #tpu.memory_space<vmem>>, %arg12: memref<625x128xf32, #tpu.memory_space<vmem>>, %arg13: memref<25x128xf32, #tpu.memory_space<vmem>>) attributes {dimension_semantics = [#tpu.dimension_semantics<parallel>], iteration_bounds = array<i64: 2>, scalar_prefetch = 0 : i64, scratch_operands = 2 : i64, tpu.core_type = #tpu.core_type<tc>, window_params = [{transform_indices = @transform_0, window_bounds = array<i64: 1, 625, 75>}, {pipeline_mode = #tpu.pipeline_mode<synchronous>, transform_indices = @transform_1, window_bounds = array<i64: 75, 128>}, {pipeline_mode = #tpu.pipeline_mode<synchronous>, transform_indices = @transform_2, window_bounds = array<i64: 1, 128>}, {pipeline_mode = #tpu.pipeline_mode<synchronous>, transform_indices = @transform_3, window_bounds = array<i64: 1, 128>}, {pipeline_mode = #tpu.pipeline_mode<synchronous>, transform_indices = @transform_4, window_bounds = array<i64: 3200, 128>}, {pipeline_mode = #tpu.pipeline_mode<synchronous>, transform_indices = @transform_5, window_bounds = array<i64: 1, 128>}, {pipeline_mode = #tpu.pipeline_mode<synchronous>, transform_indices = @transform_6, window_bounds = array<i64: 1, 128>}, {pipeline_mode = #tpu.pipeline_mode<synchronous>, transform_indices = @transform_7, window_bounds = array<i64: 3200, 256>}, {pipeline_mode = #tpu.pipeline_mode<synchronous>, transform_indices = @transform_8, window_bounds = array<i64: 1, 256>}, {pipeline_mode = #tpu.pipeline_mode<synchronous>, transform_indices = @transform_9, window_bounds = array<i64: 1, 256>}, {transform_indices = @transform_10, window_bounds = array<i64: 1, 1, 256>}]} {
    %c0 = arith.constant 0 : index
    %c0_0 = arith.constant 0 : index
    %c0_1 = arith.constant 0 : index
    %0 = vector.load %arg1[%c0, %c0_0, %c0_1] : memref<1x625x75xbf16, #tpu.memory_space<vmem>>, vector<1x625x75xbf16>
    %1 = vector.shape_cast %0 : vector<1x625x75xbf16> to vector<625x75xbf16>
    %c0_2 = arith.constant 0 : index
    %c0_3 = arith.constant 0 : index
    %2 = vector.load %arg2[%c0_2, %c0_3] : memref<75x128xbf16, #tpu.memory_space<vmem>>, vector<75x128xbf16>
    %cst = arith.constant dense<0.000000e+00> : vector<625x128xf32>
    %3 = tpu.matmul %1, %2, %cst {dimension_numbers = #tpu.dot_dimension_numbers<[1], [0], [0], [1], [0, 0, 1, 1], [], []>} : vector<625x75xbf16>, vector<75x128xbf16>, vector<625x128xf32> -> vector<625x128xf32>
    %c0_4 = arith.constant 0 : index
    %c0_5 = arith.constant 0 : index
    %4 = vector.load %arg3[%c0_4, %c0_5] : memref<1x128xf32, #tpu.memory_space<vmem>>, vector<1x128xf32>
    %5 = vector.broadcast %4 : vector<1x128xf32> to vector<625x128xf32>
    %6 = arith.mulf %3, %5 : vector<625x128xf32>
    %c0_6 = arith.constant 0 : index
    %c0_7 = arith.constant 0 : index
    %7 = vector.load %arg4[%c0_6, %c0_7] : memref<1x128xf32, #tpu.memory_space<vmem>>, vector<1x128xf32>
    %8 = vector.broadcast %7 : vector<1x128xf32> to vector<625x128xf32>
    %9 = arith.addf %6, %8 : vector<625x128xf32>
    %cst_8 = arith.constant 0.000000e+00 : f32
    %10 = vector.broadcast %cst_8 : f32 to vector<625x128xf32>
    %11 = arith.maximumf %9, %10 : vector<625x128xf32>
    %c0_9 = arith.constant 0 : index
    %c0_10 = arith.constant 0 : index
    %12 = vector.load %arg12[%c0_9, %c0_10] : memref<625x128xf32, #tpu.memory_space<vmem>>, vector<625x128xf32>
    tpu.vector_store %arg12[%c0_9, %c0_10], %11 {strides = array<i32>} : memref<625x128xf32, #tpu.memory_space<vmem>>, vector<625x128xf32>,
    %c0_11 = arith.constant 0 : index
    %c0_12 = arith.constant 0 : index
    %13 = vector.load %arg12[%c0_11, %c0_12] : memref<625x128xf32, #tpu.memory_space<vmem>>, vector<25x128xf32>
    %14 = arith.truncf %13 : vector<25x128xf32> to vector<25x128xbf16>
    %c25 = arith.constant 25 : index
    %c0_13 = arith.constant 0 : index
    %15 = vector.load %arg12[%c25, %c0_13] : memref<625x128xf32, #tpu.memory_space<vmem>>, vector<25x128xf32>
    %16 = arith.truncf %15 : vector<25x128xf32> to vector<25x128xbf16>
    %c50 = arith.constant 50 : index
    %c0_14 = arith.constant 0 : index
    %17 = vector.load %arg12[%c50, %c0_14] : memref<625x128xf32, #tpu.memory_space<vmem>>, vector<25x128xf32>
    %18 = arith.truncf %17 : vector<25x128xf32> to vector<25x128xbf16>
    %c75 = arith.constant 75 : index
    %c0_15 = arith.constant 0 : index
    %19 = vector.load %arg12[%c75, %c0_15] : memref<625x128xf32, #tpu.memory_space<vmem>>, vector<25x128xf32>
    %20 = arith.truncf %19 : vector<25x128xf32> to vector<25x128xbf16>
    %c100 = arith.constant 100 : index
    %c0_16 = arith.constant 0 : index
    %21 = vector.load %arg12[%c100, %c0_16] : memref<625x128xf32, #tpu.memory_space<vmem>>, vector<25x128xf32>
    %22 = arith.truncf %21 : vector<25x128xf32> to vector<25x128xbf16>
    %c125 = arith.constant 125 : index
    %c0_17 = arith.constant 0 : index
    %23 = vector.load %arg12[%c125, %c0_17] : memref<625x128xf32, #tpu.memory_space<vmem>>, vector<25x128xf32>
    %24 = arith.truncf %23 : vector<25x128xf32> to vector<25x128xbf16>
    %c150 = arith.constant 150 : index
    %c0_18 = arith.constant 0 : index
    %25 = vector.load %arg12[%c150, %c0_18] : memref<625x128xf32, #tpu.memory_space<vmem>>, vector<25x128xf32>
    %26 = arith.truncf %25 : vector<25x128xf32> to vector<25x128xbf16>
    %c175 = arith.constant 175 : index
    %c0_19 = arith.constant 0 : index
    %27 = vector.load %arg12[%c175, %c0_19] : memref<625x128xf32, #tpu.memory_space<vmem>>, vector<25x128xf32>
    %28 = arith.truncf %27 : vector<25x128xf32> to vector<25x128xbf16>
    %c200 = arith.constant 200 : index
    %c0_20 = arith.constant 0 : index
    %29 = vector.load %arg12[%c200, %c0_20] : memref<625x128xf32, #tpu.memory_space<vmem>>, vector<25x128xf32>
    %30 = arith.truncf %29 : vector<25x128xf32> to vector<25x128xbf16>
    %c225 = arith.constant 225 : index
    %c0_21 = arith.constant 0 : index
    %31 = vector.load %arg12[%c225, %c0_21] : memref<625x128xf32, #tpu.memory_space<vmem>>, vector<25x128xf32>
    %32 = arith.truncf %31 : vector<25x128xf32> to vector<25x128xbf16>
    %c250 = arith.constant 250 : index
    %c0_22 = arith.constant 0 : index
    %33 = vector.load %arg12[%c250, %c0_22] : memref<625x128xf32, #tpu.memory_space<vmem>>, vector<25x128xf32>
    %34 = arith.truncf %33 : vector<25x128xf32> to vector<25x128xbf16>
    %c275 = arith.constant 275 : index
    %c0_23 = arith.constant 0 : index
    %35 = vector.load %arg12[%c275, %c0_23] : memref<625x128xf32, #tpu.memory_space<vmem>>, vector<25x128xf32>
    %36 = arith.truncf %35 : vector<25x128xf32> to vector<25x128xbf16>
    %c300 = arith.constant 300 : index
    %c0_24 = arith.constant 0 : index
    %37 = vector.load %arg12[%c300, %c0_24] : memref<625x128xf32, #tpu.memory_space<vmem>>, vector<25x128xf32>
    %38 = arith.truncf %37 : vector<25x128xf32> to vector<25x128xbf16>
    %c325 = arith.constant 325 : index
    %c0_25 = arith.constant 0 : index
    %39 = vector.load %arg12[%c325, %c0_25] : memref<625x128xf32, #tpu.memory_space<vmem>>, vector<25x128xf32>
    %40 = arith.truncf %39 : vector<25x128xf32> to vector<25x128xbf16>
    %c350 = arith.constant 350 : index
    %c0_26 = arith.constant 0 : index
    %41 = vector.load %arg12[%c350, %c0_26] : memref<625x128xf32, #tpu.memory_space<vmem>>, vector<25x128xf32>
    %42 = arith.truncf %41 : vector<25x128xf32> to vector<25x128xbf16>
    %c375 = arith.constant 375 : index
    %c0_27 = arith.constant 0 : index
    %43 = vector.load %arg12[%c375, %c0_27] : memref<625x128xf32, #tpu.memory_space<vmem>>, vector<25x128xf32>
    %44 = arith.truncf %43 : vector<25x128xf32> to vector<25x128xbf16>
    %c400 = arith.constant 400 : index
    %c0_28 = arith.constant 0 : index
    %45 = vector.load %arg12[%c400, %c0_28] : memref<625x128xf32, #tpu.memory_space<vmem>>, vector<25x128xf32>
    %46 = arith.truncf %45 : vector<25x128xf32> to vector<25x128xbf16>
    %c425 = arith.constant 425 : index
    %c0_29 = arith.constant 0 : index
    %47 = vector.load %arg12[%c425, %c0_29] : memref<625x128xf32, #tpu.memory_space<vmem>>, vector<25x128xf32>
    %48 = arith.truncf %47 : vector<25x128xf32> to vector<25x128xbf16>
    %c450 = arith.constant 450 : index
    %c0_30 = arith.constant 0 : index
    %49 = vector.load %arg12[%c450, %c0_30] : memref<625x128xf32, #tpu.memory_space<vmem>>, vector<25x128xf32>
    %50 = arith.truncf %49 : vector<25x128xf32> to vector<25x128xbf16>
    %c475 = arith.constant 475 : index
    %c0_31 = arith.constant 0 : index
    %51 = vector.load %arg12[%c475, %c0_31] : memref<625x128xf32, #tpu.memory_space<vmem>>, vector<25x128xf32>
    %52 = arith.truncf %51 : vector<25x128xf32> to vector<25x128xbf16>
    %c500 = arith.constant 500 : index
    %c0_32 = arith.constant 0 : index
    %53 = vector.load %arg12[%c500, %c0_32] : memref<625x128xf32, #tpu.memory_space<vmem>>, vector<25x128xf32>
    %54 = arith.truncf %53 : vector<25x128xf32> to vector<25x128xbf16>
    %c525 = arith.constant 525 : index
    %c0_33 = arith.constant 0 : index
    %55 = vector.load %arg12[%c525, %c0_33] : memref<625x128xf32, #tpu.memory_space<vmem>>, vector<25x128xf32>
    %56 = arith.truncf %55 : vector<25x128xf32> to vector<25x128xbf16>
    %c550 = arith.constant 550 : index
    %c0_34 = arith.constant 0 : index
    %57 = vector.load %arg12[%c550, %c0_34] : memref<625x128xf32, #tpu.memory_space<vmem>>, vector<25x128xf32>
    %58 = arith.truncf %57 : vector<25x128xf32> to vector<25x128xbf16>
    %c575 = arith.constant 575 : index
    %c0_35 = arith.constant 0 : index
    %59 = vector.load %arg12[%c575, %c0_35] : memref<625x128xf32, #tpu.memory_space<vmem>>, vector<25x128xf32>
    %60 = arith.truncf %59 : vector<25x128xf32> to vector<25x128xbf16>
    %c600 = arith.constant 600 : index
    %c0_36 = arith.constant 0 : index
    %61 = vector.load %arg12[%c600, %c0_36] : memref<625x128xf32, #tpu.memory_space<vmem>>, vector<25x128xf32>
    %62 = arith.truncf %61 : vector<25x128xf32> to vector<25x128xbf16>
    %63 = tpu.concatenate %14, %16, %18, %20, %22, %24, %26, %28, %30, %32, %34, %36, %38, %40, %42, %44 in 1 : vector<25x128xbf16>, vector<25x128xbf16>, vector<25x128xbf16>, vector<25x128xbf16>, vector<25x128xbf16>, vector<25x128xbf16>, vector<25x128xbf16>, vector<25x128xbf16>, vector<25x128xbf16>, vector<25x128xbf16>, vector<25x128xbf16>, vector<25x128xbf16>, vector<25x128xbf16>, vector<25x128xbf16>, vector<25x128xbf16>, vector<25x128xbf16> -> vector<25x2048xbf16>
    %64 = tpu.concatenate %46, %48, %50, %52, %54, %56, %58, %60, %62 in 1 : vector<25x128xbf16>, vector<25x128xbf16>, vector<25x128xbf16>, vector<25x128xbf16>, vector<25x128xbf16>, vector<25x128xbf16>, vector<25x128xbf16>, vector<25x128xbf16>, vector<25x128xbf16> -> vector<25x1152xbf16>
    %65 = tpu.concatenate %63, %64 in 1 : vector<25x2048xbf16>, vector<25x1152xbf16> -> vector<25x3200xbf16>
    %c0_37 = arith.constant 0 : index
    %c0_38 = arith.constant 0 : index
    %66 = vector.load %arg5[%c0_37, %c0_38] : memref<3200x128xbf16, #tpu.memory_space<vmem>>, vector<3200x128xbf16>
    %cst_39 = arith.constant dense<0.000000e+00> : vector<25x128xf32>
    %67 = tpu.matmul %65, %66, %cst_39 {dimension_numbers = #tpu.dot_dimension_numbers<[1], [0], [0], [1], [0, 0, 1, 1], [], []>} : vector<25x3200xbf16>, vector<3200x128xbf16>, vector<25x128xf32> -> vector<25x128xf32>
    %c0_40 = arith.constant 0 : index
    %c0_41 = arith.constant 0 : index
    %68 = vector.load %arg6[%c0_40, %c0_41] : memref<1x128xf32, #tpu.memory_space<vmem>>, vector<1x128xf32>
    %69 = vector.broadcast %68 : vector<1x128xf32> to vector<25x128xf32>
    %70 = arith.mulf %67, %69 : vector<25x128xf32>
    %c0_42 = arith.constant 0 : index
    %c0_43 = arith.constant 0 : index
    %71 = vector.load %arg7[%c0_42, %c0_43] : memref<1x128xf32, #tpu.memory_space<vmem>>, vector<1x128xf32>
    %72 = vector.broadcast %71 : vector<1x128xf32> to vector<25x128xf32>
    %73 = arith.addf %70, %72 : vector<25x128xf32>
    %cst_44 = arith.constant 0.000000e+00 : f32
    %74 = vector.broadcast %cst_44 : f32 to vector<25x128xf32>
    %75 = arith.maximumf %73, %74 : vector<25x128xf32>
    %c0_45 = arith.constant 0 : index
    %c0_46 = arith.constant 0 : index
    %76 = vector.load %arg13[%c0_45, %c0_46] : memref<25x128xf32, #tpu.memory_space<vmem>>, vector<25x128xf32>
    tpu.vector_store %arg13[%c0_45, %c0_46], %75 {strides = array<i32>} : memref<25x128xf32, #tpu.memory_space<vmem>>, vector<25x128xf32>,
    %c0_47 = arith.constant 0 : index
    %c0_48 = arith.constant 0 : index
    %77 = vector.load %arg13[%c0_47, %c0_48] : memref<25x128xf32, #tpu.memory_space<vmem>>, vector<1x128xf32>
    %78 = arith.truncf %77 : vector<1x128xf32> to vector<1x128xbf16>
    %c1 = arith.constant 1 : index
    %c0_49 = arith.constant 0 : index
    %79 = vector.load %arg13[%c1, %c0_49] : memref<25x128xf32, #tpu.memory_space<vmem>>, vector<1x128xf32>
    %80 = arith.truncf %79 : vector<1x128xf32> to vector<1x128xbf16>
    %c2 = arith.constant 2 : index
    %c0_50 = arith.constant 0 : index
    %81 = vector.load %arg13[%c2, %c0_50] : memref<25x128xf32, #tpu.memory_space<vmem>>, vector<1x128xf32>
    %82 = arith.truncf %81 : vector<1x128xf32> to vector<1x128xbf16>
    %c3 = arith.constant 3 : index
    %c0_51 = arith.constant 0 : index
    %83 = vector.load %arg13[%c3, %c0_51] : memref<25x128xf32, #tpu.memory_space<vmem>>, vector<1x128xf32>
    %84 = arith.truncf %83 : vector<1x128xf32> to vector<1x128xbf16>
    %c4 = arith.constant 4 : index
    %c0_52 = arith.constant 0 : index
    %85 = vector.load %arg13[%c4, %c0_52] : memref<25x128xf32, #tpu.memory_space<vmem>>, vector<1x128xf32>
    %86 = arith.truncf %85 : vector<1x128xf32> to vector<1x128xbf16>
    %c5 = arith.constant 5 : index
    %c0_53 = arith.constant 0 : index
    %87 = vector.load %arg13[%c5, %c0_53] : memref<25x128xf32, #tpu.memory_space<vmem>>, vector<1x128xf32>
    %88 = arith.truncf %87 : vector<1x128xf32> to vector<1x128xbf16>
    %c6 = arith.constant 6 : index
    %c0_54 = arith.constant 0 : index
    %89 = vector.load %arg13[%c6, %c0_54] : memref<25x128xf32, #tpu.memory_space<vmem>>, vector<1x128xf32>
    %90 = arith.truncf %89 : vector<1x128xf32> to vector<1x128xbf16>
    %c7 = arith.constant 7 : index
    %c0_55 = arith.constant 0 : index
    %91 = vector.load %arg13[%c7, %c0_55] : memref<25x128xf32, #tpu.memory_space<vmem>>, vector<1x128xf32>
    %92 = arith.truncf %91 : vector<1x128xf32> to vector<1x128xbf16>
    %c8 = arith.constant 8 : index
    %c0_56 = arith.constant 0 : index
    %93 = vector.load %arg13[%c8, %c0_56] : memref<25x128xf32, #tpu.memory_space<vmem>>, vector<1x128xf32>
    %94 = arith.truncf %93 : vector<1x128xf32> to vector<1x128xbf16>
    %c9 = arith.constant 9 : index
    %c0_57 = arith.constant 0 : index
    %95 = vector.load %arg13[%c9, %c0_57] : memref<25x128xf32, #tpu.memory_space<vmem>>, vector<1x128xf32>
    %96 = arith.truncf %95 : vector<1x128xf32> to vector<1x128xbf16>
    %c10 = arith.constant 10 : index
    %c0_58 = arith.constant 0 : index
    %97 = vector.load %arg13[%c10, %c0_58] : memref<25x128xf32, #tpu.memory_space<vmem>>, vector<1x128xf32>
    %98 = arith.truncf %97 : vector<1x128xf32> to vector<1x128xbf16>
    %c11 = arith.constant 11 : index
    %c0_59 = arith.constant 0 : index
    %99 = vector.load %arg13[%c11, %c0_59] : memref<25x128xf32, #tpu.memory_space<vmem>>, vector<1x128xf32>
    %100 = arith.truncf %99 : vector<1x128xf32> to vector<1x128xbf16>
    %c12 = arith.constant 12 : index
    %c0_60 = arith.constant 0 : index
    %101 = vector.load %arg13[%c12, %c0_60] : memref<25x128xf32, #tpu.memory_space<vmem>>, vector<1x128xf32>
    %102 = arith.truncf %101 : vector<1x128xf32> to vector<1x128xbf16>
    %c13 = arith.constant 13 : index
    %c0_61 = arith.constant 0 : index
    %103 = vector.load %arg13[%c13, %c0_61] : memref<25x128xf32, #tpu.memory_space<vmem>>, vector<1x128xf32>
    %104 = arith.truncf %103 : vector<1x128xf32> to vector<1x128xbf16>
    %c14 = arith.constant 14 : index
    %c0_62 = arith.constant 0 : index
    %105 = vector.load %arg13[%c14, %c0_62] : memref<25x128xf32, #tpu.memory_space<vmem>>, vector<1x128xf32>
    %106 = arith.truncf %105 : vector<1x128xf32> to vector<1x128xbf16>
    %c15 = arith.constant 15 : index
    %c0_63 = arith.constant 0 : index
    %107 = vector.load %arg13[%c15, %c0_63] : memref<25x128xf32, #tpu.memory_space<vmem>>, vector<1x128xf32>
    %108 = arith.truncf %107 : vector<1x128xf32> to vector<1x128xbf16>
    %c16 = arith.constant 16 : index
    %c0_64 = arith.constant 0 : index
    %109 = vector.load %arg13[%c16, %c0_64] : memref<25x128xf32, #tpu.memory_space<vmem>>, vector<1x128xf32>
    %110 = arith.truncf %109 : vector<1x128xf32> to vector<1x128xbf16>
    %c17 = arith.constant 17 : index
    %c0_65 = arith.constant 0 : index
    %111 = vector.load %arg13[%c17, %c0_65] : memref<25x128xf32, #tpu.memory_space<vmem>>, vector<1x128xf32>
    %112 = arith.truncf %111 : vector<1x128xf32> to vector<1x128xbf16>
    %c18 = arith.constant 18 : index
    %c0_66 = arith.constant 0 : index
    %113 = vector.load %arg13[%c18, %c0_66] : memref<25x128xf32, #tpu.memory_space<vmem>>, vector<1x128xf32>
    %114 = arith.truncf %113 : vector<1x128xf32> to vector<1x128xbf16>
    %c19 = arith.constant 19 : index
    %c0_67 = arith.constant 0 : index
    %115 = vector.load %arg13[%c19, %c0_67] : memref<25x128xf32, #tpu.memory_space<vmem>>, vector<1x128xf32>
    %116 = arith.truncf %115 : vector<1x128xf32> to vector<1x128xbf16>
    %c20 = arith.constant 20 : index
    %c0_68 = arith.constant 0 : index
    %117 = vector.load %arg13[%c20, %c0_68] : memref<25x128xf32, #tpu.memory_space<vmem>>, vector<1x128xf32>
    %118 = arith.truncf %117 : vector<1x128xf32> to vector<1x128xbf16>
    %c21 = arith.constant 21 : index
    %c0_69 = arith.constant 0 : index
    %119 = vector.load %arg13[%c21, %c0_69] : memref<25x128xf32, #tpu.memory_space<vmem>>, vector<1x128xf32>
    %120 = arith.truncf %119 : vector<1x128xf32> to vector<1x128xbf16>
    %c22 = arith.constant 22 : index
    %c0_70 = arith.constant 0 : index
    %121 = vector.load %arg13[%c22, %c0_70] : memref<25x128xf32, #tpu.memory_space<vmem>>, vector<1x128xf32>
    %122 = arith.truncf %121 : vector<1x128xf32> to vector<1x128xbf16>
    %c23 = arith.constant 23 : index
    %c0_71 = arith.constant 0 : index
    %123 = vector.load %arg13[%c23, %c0_71] : memref<25x128xf32, #tpu.memory_space<vmem>>, vector<1x128xf32>
    %124 = arith.truncf %123 : vector<1x128xf32> to vector<1x128xbf16>
    %c24 = arith.constant 24 : index
    %c0_72 = arith.constant 0 : index
    %125 = vector.load %arg13[%c24, %c0_72] : memref<25x128xf32, #tpu.memory_space<vmem>>, vector<1x128xf32>
    %126 = arith.truncf %125 : vector<1x128xf32> to vector<1x128xbf16>
    %127 = tpu.concatenate %78, %80, %82, %84, %86, %88, %90, %92, %94, %96, %98, %100, %102, %104, %106, %108 in 1 : vector<1x128xbf16>, vector<1x128xbf16>, vector<1x128xbf16>, vector<1x128xbf16>, vector<1x128xbf16>, vector<1x128xbf16>, vector<1x128xbf16>, vector<1x128xbf16>, vector<1x128xbf16>, vector<1x128xbf16>, vector<1x128xbf16>, vector<1x128xbf16>, vector<1x128xbf16>, vector<1x128xbf16>, vector<1x128xbf16>, vector<1x128xbf16> -> vector<1x2048xbf16>
    %128 = tpu.concatenate %110, %112, %114, %116, %118, %120, %122, %124, %126 in 1 : vector<1x128xbf16>, vector<1x128xbf16>, vector<1x128xbf16>, vector<1x128xbf16>, vector<1x128xbf16>, vector<1x128xbf16>, vector<1x128xbf16>, vector<1x128xbf16>, vector<1x128xbf16> -> vector<1x1152xbf16>
    %129 = tpu.concatenate %127, %128 in 1 : vector<1x2048xbf16>, vector<1x1152xbf16> -> vector<1x3200xbf16>
    %c0_73 = arith.constant 0 : index
    %c0_74 = arith.constant 0 : index
    %130 = vector.load %arg8[%c0_73, %c0_74] : memref<3200x256xbf16, #tpu.memory_space<vmem>>, vector<3200x256xbf16>
    %cst_75 = arith.constant dense<0.000000e+00> : vector<1x256xf32>
    %131 = tpu.matmul %129, %130, %cst_75 {dimension_numbers = #tpu.dot_dimension_numbers<[1], [0], [0], [1], [0, 0, 1, 1], [], []>} : vector<1x3200xbf16>, vector<3200x256xbf16>, vector<1x256xf32> -> vector<1x256xf32>
    %c0_76 = arith.constant 0 : index
    %c0_77 = arith.constant 0 : index
    %132 = vector.load %arg9[%c0_76, %c0_77] : memref<1x256xf32, #tpu.memory_space<vmem>>, vector<1x256xf32>
    %133 = arith.mulf %131, %132 : vector<1x256xf32>
    %c0_78 = arith.constant 0 : index
    %c0_79 = arith.constant 0 : index
    %134 = vector.load %arg10[%c0_78, %c0_79] : memref<1x256xf32, #tpu.memory_space<vmem>>, vector<1x256xf32>
    %135 = arith.addf %133, %134 : vector<1x256xf32>
    %cst_80 = arith.constant 0.000000e+00 : f32
    %136 = vector.broadcast %cst_80 : f32 to vector<1x256xf32>
    %137 = arith.maximumf %135, %136 : vector<1x256xf32>
    %c0_81 = arith.constant 0 : index
    %c0_82 = arith.constant 0 : index
    %c0_83 = arith.constant 0 : index
    %138 = vector.load %arg11[%c0_81, %c0_82, %c0_83] : memref<1x1x256xf32, #tpu.memory_space<vmem>>, vector<1x1x256xf32>
    %139 = vector.shape_cast %138 : vector<1x1x256xf32> to vector<1x256xf32>
    %140 = vector.shape_cast %137 : vector<1x256xf32> to vector<1x1x256xf32>
    tpu.vector_store %arg11[%c0_81, %c0_82, %c0_83], %140 {strides = array<i32>} : memref<1x1x256xf32, #tpu.memory_space<vmem>>, vector<1x1x256xf32>,
    return
  }
  func.func @transform_0(%arg0: i32) -> (i32, i32, i32) {
    %c0_i32 = arith.constant 0 : i32
    %c0_i32_0 = arith.constant 0 : i32
    %c0_i32_1 = arith.constant 0 : i32
    return %arg0, %c0_i32, %c0_i32_0 : i32, i32, i32
  }
  func.func @transform_1(%arg0: i32) -> (i32, i32) {
    %c0_i32 = arith.constant 0 : i32
    %c0_i32_0 = arith.constant 0 : i32
    %c0_i32_1 = arith.constant 0 : i32
    return %c0_i32, %c0_i32_0 : i32, i32
  }
  func.func @transform_2(%arg0: i32) -> (i32, i32) {
    %c0_i32 = arith.constant 0 : i32
    %c0_i32_0 = arith.constant 0 : i32
    %c0_i32_1 = arith.constant 0 : i32
    return %c0_i32, %c0_i32_0 : i32, i32
  }
  func.func @transform_3(%arg0: i32) -> (i32, i32) {
    %c0_i32 = arith.constant 0 : i32
    %c0_i32_0 = arith.constant 0 : i32
    %c0_i32_1 = arith.constant 0 : i32
    return %c0_i32, %c0_i32_0 : i32, i32
  }
  func.func @transform_4(%arg0: i32) -> (i32, i32) {
    %c0_i32 = arith.constant 0 : i32
    %c0_i32_0 = arith.constant 0 : i32
    %c0_i32_1 = arith.constant 0 : i32
    return %c0_i32, %c0_i32_0 : i32, i32
  }
  func.func @transform_5(%arg0: i32) -> (i32, i32) {
    %c0_i32 = arith.constant 0 : i32
    %c0_i32_0 = arith.constant 0 : i32
    %c0_i32_1 = arith.constant 0 : i32
    return %c0_i32, %c0_i32_0 : i32, i32
  }
  func.func @transform_6(%arg0: i32) -> (i32, i32) {
    %c0_i32 = arith.constant 0 : i32
    %c0_i32_0 = arith.constant 0 : i32
    %c0_i32_1 = arith.constant 0 : i32
    return %c0_i32, %c0_i32_0 : i32, i32
  }
  func.func @transform_7(%arg0: i32) -> (i32, i32) {
    %c0_i32 = arith.constant 0 : i32
    %c0_i32_0 = arith.constant 0 : i32
    %c0_i32_1 = arith.constant 0 : i32
    return %c0_i32, %c0_i32_0 : i32, i32
  }
  func.func @transform_8(%arg0: i32) -> (i32, i32) {
    %c0_i32 = arith.constant 0 : i32
    %c0_i32_0 = arith.constant 0 : i32
    %c0_i32_1 = arith.constant 0 : i32
    return %c0_i32, %c0_i32_0 : i32, i32
  }
  func.func @transform_9(%arg0: i32) -> (i32, i32) {
    %c0_i32 = arith.constant 0 : i32
    %c0_i32_0 = arith.constant 0 : i32
    %c0_i32_1 = arith.constant 0 : i32
    return %c0_i32, %c0_i32_0 : i32, i32
  }
  func.func @transform_10(%arg0: i32) -> (i32, i32, i32) {
    %c0_i32 = arith.constant 0 : i32
    %c0_i32_0 = arith.constant 0 : i32
    %c0_i32_1 = arith.constant 0 : i32
    return %arg0, %c0_i32, %c0_i32_0 : i32, i32, i32
  }
}

</mosaic_0001>

<bundles_post_ra>
// kernel: feature_extractor.1
= control target key start
LH: loop header
LB: loop body
LE: loop exit
PB: predicated region body
PF: predicated region fallthrough
CT: control target
= control target key end

     0   :  { %s14305_s0 = inlined_call_operand.vmem [shape: bf16[2,625,75], index: 0, kind: input, shape index: {}]   ;;  %s14306_s1 = inlined_call_operand.vmem [shape: bf16[75,128], index: 1, kind: input, shape index: {}]   ;;  %s14307_s2 = inlined_call_operand.vmem [shape: f32[1,128], index: 2, kind: input, shape index: {}]   ;;  %s14308_s3 = inlined_call_operand.vmem [shape: f32[1,128], index: 3, kind: input, shape index: {}]   ;;  %s14309_s4 = inlined_call_operand.vmem [shape: bf16[3200,128], index: 4, kind: input, shape index: {}]   ;;  %s14310_s5 = inlined_call_operand.vmem [shape: f32[1,128], index: 5, kind: input, shape index: {}]   ;;  %s14311_s6 = inlined_call_operand.vmem [shape: f32[1,128], index: 6, kind: input, shape index: {}]   ;;  %s14312_s7 = inlined_call_operand.vmem [shape: bf16[3200,256], index: 7, kind: input, shape index: {}]   ;;  %s14313_s8 = inlined_call_operand.vmem [shape: f32[1,256], index: 8, kind: input, shape index: {}]   ;;  %s14314_s9 = inlined_call_operand.vmem [shape: f32[1,256], index: 9, kind: input, shape index: {}]   ;;  %s14315_s10 = inlined_call_operand.hbm [shape: f32[2,1,256], index: 10, kind: output, shape index: {}]  }
   0x1   :  { %14316 = sst [smem:[#allocation7_spill]] %s14305_s0 }
   0x2   :  { %15 = vsyncpa [#allocation5], 0 }
   0x3   :  { %17 = vsyncpa [#allocation5 + $0x1], 0  ;;  %s10577_s13 = smov 0   ;;  %s10579_s14 = smov 0  }
   0x4   :  { %s10581_s15 = smov 0   ;;  %s10583_s16 = smov 0  }
   0x5 LB: > { %s10598_s17 = sadd.s32 4294967295, %s10519_s16   ;;  %s7138_s18 = sadd.s32 4294967294, %s10519_s16   ;;  %s10519_s16 = sphi %s10583_s16, %s14323_s16   ;;  %s10515_s15 = sphi %s10581_s15, %s14322_s15   ;;  %s10511_s14 = sphi %s10579_s14, %s14321_s14   ;;  %s10507_s13 = sphi %s10577_s13, %s14320_s13  }
   0x6   : > { %s10602_s19 = sadd.s32 1, %s10519_s16   ;;  %s245_s20 = sadd.s32 1, %s10515_s15 }
   0x7   : > { %s242_s21 = ssub.s32 %s10519_s16, %s10602_s19  ;;  %p255_p0 = scmp.ne.s32.totalorder %s10515_s15, %s10511_s14 }
   0x8   : > { %p243_p1 = scmp.eq.s32.totalorder %s242_s21, 0  ;;  %p256_p2 = scmp.eq.s32.totalorder %s10598_s17, 1 }
   0x9   : > { %p261_p3 = scmp.ne.s32.totalorder %s10511_s14, %s10507_s13  ;;  %p262_p4 = scmp.eq.s32.totalorder %s7138_s18, 1 }
   0xa   : > { %s10613_s22 = scalar_select %p243_p1, %s10515_s15, %s245_s20  }
   0xb   : > { %p10615_p5 = por %p256_p2, %p255_p0  ;;  %p10619_p6 = por %p262_p4, %p261_p3 }
   0xc   : > { %p7141_p7 = scmp.ge.s32.totalorder %s10519_s16, 1  ;;  %p315_p8 = scmp.lt.s32.totalorder %s10519_s16, 3 }
   0xe   : > { %p316_p9 = pnand %p7141_p7, %p315_p8 }
   0xf   : > { %p353_p10 = scmp.lt.s32.totalorder (!%p316_p9), %s10598_s17, 1  ;;  %s14319_s0 = sld [smem:[#allocation7_spill]] (!%p316_p9) }
  0x10   : > { %319 = sbr.rel (%p316_p9) target bundleno = 1530 (0x5fa), region = 60  ;;  %s350_s21 = sand.u32 (!%p316_p9), 1, %s10511_s14  }
  0x11   : > { %s9761_s26 = sshll.u32 (!%p316_p9), %s10598_s17, 1 }
  0x15   : > { %v7318_v0 = vld [vmem:[%s14306_s1 + $0x20] sm:$0xf]  ;;  %v9807_v1 = vld [vmem:[%s14306_s1 + $0x20] sm:$0x30]  ;;  %vm796_vm0 = vcmask 1044480   ;;  %vm797_vm1 = vcmask 1045504  }
  0x16   : > { %v7319_v2 = vor.u32 %v9807_v1, %v7318_v0  ;;  %v10521_v3 = vmov 65535   ;;  %v9806_v7 = vld [vmem:[%s14306_s1 + $0x18] sm:$0xff]  ;;  %v9805_v8 = vld [vmem:[%s14306_s1 + $0x10] sm:$0xff]  ;;  %s354_s18 = scalar_select %p353_p10, %s10598_s17, 1  ;;  %v9804_v9 = vld [vmem:[%s14306_s1 + $0x8] sm:$0xff]  ;;  %vm675_vm2 = vcmask 613376  }
  0x17   : > { %v798_v4 = vsel %vm796_vm0, 4294967295, %v10521_v3  ;;  %v9803_v10 = vld [vmem:[%s14306_s1] sm:$0xff]  ;;  %v9815_v17 = vld [vmem:[%s14309_s4 + $0x38] sm:$0xff]  ;;  %v9814_v18 = vld [vmem:[%s14309_s4 + $0x30] sm:$0xff]  ;;  %vm7055_vm3 = vcmask 1040384   ;;  %s7064_s17 = scalar_lea.sflag [#allocation5], %s350_s21 }
  0x18   : > { %v799_v5 = vsel %vm797_vm1, %v798_v4, 0  ;;  %s10408_s25 = smul.u32 316, %s354_s18  ;;  %3435 = vmatpush.bf16.msra.mxu1 %v9815_v17  ;;  %v9813_v19 = vld [vmem:[%s14309_s4 + $0x28] sm:$0xff]  ;;  %v9812_v21 = vld [vmem:[%s14309_s4 + $0x20] sm:$0xff]  ;;  %v9811_v22 = vld [vmem:[%s14309_s4 + $0x18] sm:$0xff] }
  0x19   : > { %v801_v6 = vand.u32 %v7319_v2, %v799_v5  ;;  %v9810_v23 = vld [vmem:[%s14309_s4 + $0x10] sm:$0xff]  ;;  %v9809_v24 = vld [vmem:[%s14309_s4 + $0x8] sm:$0xff]  ;;  %v9808_v26 = vld [vmem:[%s14309_s4] sm:$0xff] }
  0x1a   : > { %s10648_s30 = scalar_lea.vmem %s14319_s0, %s10408_s25  ;;  %v9823_v27 = vld [vmem:[%s14309_s4 + $0x78] sm:$0xff]  ;;  %v10696_v28 = vld [vmem:[%s14307_s2] ss:$0 sm:$0xff]  ;;  %v9822_v32 = vld [vmem:[%s14309_s4 + $0x70] sm:$0xff]  ;;  %s7142_s25 = sshll.u32 %s350_s21, 1 }
  0x1b   : > { %806 = vmatpush.bf16.msra.mxu0 %v801_v6  ;;  %v9764_v11 = vld [vmem:[%s10648_s30] sm:$0xff]  ;;  %v9765_v12 = vld [vmem:[%s10648_s30 + $0x8] sm:$0xff]  ;;  %v9766_v13 = vld [vmem:[%s10648_s30 + $0x10] sm:$0xff]  ;;  %3454 = vmatpush.bf16.msra.mxu2 %v9823_v27  ;;  %s352_s28 = scalar_lea.vmem [#allocation4], %s7142_s25 }
  0x1c   : > { %v9767_v14 = vld [vmem:[%s10648_s30 + $0x18] sm:$0xff]  ;;  %v9768_v15 = vld [vmem:[%s10648_s30 + $0x20] sm:$0xff]  ;;  %v9769_v16 = vld [vmem:[%s10648_s30 + $0x28] sm:$0xff]  ;;  %3436 = vmatpush.bf16.msra.mxu1 %v9814_v18  ;;  %s7076_s29 = sshll.u32 %s352_s28, 4  ;;  %s7077_s29 = int_to_ptr.vmem [resolvable:$true] %s7076_s29 }
  0x1d   : > { %v9770_v20 = vld [vmem:[%s10648_s30 + $0x30] sm:$0xff]  ;;  %v9771_v25 = vld [vmem:[%s10648_s30 + $0x38] sm:$0xff]  ;;  %v10701_v29 = vld [vmem:[%s14308_s3] ss:$0 sm:$0xff] }
  0x1e   : > { %v9772_v30 = vld [vmem:[%s10648_s30 + $0x40] sm:$0xff]  ;;  %v9821_v35 = vld [vmem:[%s14309_s4 + $0x68] sm:$0xff]  ;;  %v9819_v41 = vld [vmem:[%s14309_s4 + $0x58] sm:$0xff] }
  0x1f   : > { %807 = vmatpush.bf16.msra.mxu0 %v9806_v7  ;;  %3455 = vmatpush.bf16.msra.mxu2 %v9822_v32  ;;  %v9820_v38 = vld [vmem:[%s14309_s4 + $0x60] sm:$0xff]  ;;  %v9773_v44 = vld [vmem:[%s10648_s30 + $0x48] sm:$0xff]  ;;  %v9818_v47 = vld [vmem:[%s14309_s4 + $0x50] sm:$0xff] }
  0x20   : > { %3437 = vmatpush.bf16.msra.mxu1 %v9813_v19  ;;  %v9817_v53 = vld [vmem:[%s14309_s4 + $0x48] sm:$0xff]  ;;  %v9831_v54 = vld [vmem:[%s14309_s4 + $0xb8] sm:$0xff]  ;;  %v9816_v57 = vld [vmem:[%s14309_s4 + $0x40] sm:$0xff] }
  0x21   : > { %3473 = vmatpush.bf16.msra.mxu3 %v9831_v54  ;;  %v9830_v58 = vld [vmem:[%s14309_s4 + $0xb0] sm:$0xff]  ;;  %v9829_v61 = vld [vmem:[%s14309_s4 + $0xa8] sm:$0xff]  ;;  %v9828_v1 = vld [vmem:[%s14309_s4 + $0xa0] sm:$0xff] }
  0x22   : > { %v9774_v63 = vld [vmem:[%s10648_s30 + $0x50] sm:$0xff]  ;;  %v9827_v4 = vld [vmem:[%s14309_s4 + $0x98] sm:$0xff] }
  0x23   : > { %808 = vmatpush.bf16.msra.mxu0 %v9805_v8  ;;  %3456 = vmatpush.bf16.msra.mxu2 %v9821_v35  ;;  %v9839_v17 = vld [vmem:[%s14309_s4 + $0xf8] sm:$0xff] }
  0x24   : > { %3438 = vmatpush.bf16.msra.mxu1 %v9812_v21  ;;  %v9775_v19 = vld [vmem:[%s10648_s30 + $0x58] sm:$0xff]  ;;  %v9824_v21 = vld [vmem:[%s14309_s4 + $0x80] sm:$0xff] }
  0x25   : > { %3474 = vmatpush.bf16.msra.mxu3 %v9830_v58  ;;  %v9846_v58 = vld [vmem:[%s14309_s4 + $0x130] sm:$0xff] }
  0x27   : > { %809 = vmatpush.bf16.msra.mxu0 %v9804_v9  ;;  %3457 = vmatpush.bf16.msra.mxu2 %v9820_v38 }
  0x28   : > { %3439 = vmatpush.bf16.msra.mxu1 %v9811_v22  ;;  %v9838_v22 = vld [vmem:[%s14309_s4 + $0xf0] sm:$0xff] }
  0x29   : > { %3475 = vmatpush.bf16.msra.mxu3 %v9829_v61 }
  0x2b   : > { %810 = vmatpush.bf16.msra.mxu0 %v9803_v10  ;;  %3458 = vmatpush.bf16.msra.mxu2 %v9819_v41  ;;  %v9826_v10 = vld [vmem:[%s14309_s4 + $0x90] sm:$0xff] }
  0x2c   : > { %3440 = vmatpush.bf16.msra.mxu1 %v9810_v23 }
  0x2d   : > { %3476 = vmatpush.bf16.msra.mxu3 %v9828_v1 }
  0x2e   : > { %7320 = vmatmul.msk.bf16.vlgmr.msra.gmra.mxu0 %vm675_vm2, %v9764_v11 }
  0x2f   : > { %3459 = vmatpush.bf16.msra.mxu2 %v9818_v47 }
  0x30   : > { %3441 = vmatpush.bf16.msra.mxu1 %v9809_v24 }
  0x31   : > { %3477 = vmatpush.bf16.msra.mxu3 %v9827_v4 }
  0x33   : > { %3460 = vmatpush.bf16.msra.mxu2 %v9817_v53 }
  0x34   : > { %3442 = vmatpush.bf16.msra.mxu1 %v9808_v26  ;;  %v9837_v26 = vld [vmem:[%s14309_s4 + $0xe8] sm:$0xff] }
  0x35   : > { %3478 = vmatpush.bf16.msra.mxu3 %v9826_v10 }
  0x37   : > { %3461 = vmatpush.bf16.msra.mxu2 %v9816_v57  ;;  %v9832_v57 = vld [vmem:[%s14309_s4 + $0xc0] sm:$0xff] }
  0x38   : > { %3492 = vmatpush.bf16.msrb.mxu1 %v9839_v17  ;;  %v9842_v17 = vld [vmem:[%s14309_s4 + $0x110] sm:$0xff] }
  0x3c   : > { %3493 = vmatpush.bf16.msrb.mxu1 %v9838_v22  ;;  %v9841_v22 = vld [vmem:[%s14309_s4 + $0x108] sm:$0xff] }
  0x3e   : > { %7321 = vmatmul.msk.bf16.gmra.mxu0 %vm675_vm2, %v9765_v12 }
  0x40   : > { %3494 = vmatpush.bf16.msrb.mxu1 %v9837_v26 }
  0x4e   : > { %7322 = vmatmul.msk.bf16.gmra.mxu0 %vm675_vm2, %v9766_v13 }
  0x5e   : > { %7323 = vmatmul.msk.bf16.gmra.mxu0 %vm675_vm2, %v9767_v14 }
  0x6e   : > { %7324 = vmatmul.msk.bf16.gmra.mxu0 %vm675_vm2, %v9768_v15 }
  0x7e   : > { %7325 = vmatmul.msk.bf16.gmra.mxu0 %vm675_vm2, %v9769_v16  ;;  %v9825_v16 = vld [vmem:[%s14309_s4 + $0x88] sm:$0xff] }
  0x7f   : > { %3479 = vmatpush.bf16.msra.mxu3 %v9825_v16 }
  0x83   : > { %3480 = vmatpush.bf16.msra.mxu3 %v9824_v21 }
  0x8e   : > { %7326 = vmatmul.msk.bf16.gmra.mxu0 %vm675_vm2, %v9770_v20 }
  0x9e   : > { %7327 = vmatmul.msk.bf16.gmra.mxu0 %vm675_vm2, %v9771_v25 }
  0xab   : > { %v812_v31 = vpop.f32.mrf.mxu0 }
  0xac   : > { %v1015_v33 = vmul.f32 %v10696_v28, %v812_v31 }
  0xae   : > { %v1098_v34 = vadd.f32 %v10701_v29, %v1015_v33  ;;  %7328 = vmatmul.msk.bf16.gmra.mxu0 %vm675_vm2, %v9772_v30 }
  0xb0   : > { %v1177_v36 = vmax.f32 %v1098_v34, 0.0  ;;  %v9836_v34 = vld [vmem:[%s14309_s4 + $0xe0] sm:$0xff] }
  0xb1   : > { %3495 = vmatpush.bf16.msrb.mxu1 %v9836_v34 }
  0xb2   : > { %v1339_v43 = vpack.c.bf16 %v1177_v36, %v1177_v36 }
  0xb3   : > { %v814_v37 = vpop.f32.mrf.mxu0 }
  0xb4   : > { %v1016_v39 = vmul.f32 %v10696_v28, %v814_v37  ;;  %v1539_v49 = vunpack.c.l.b16 %v1339_v43 }
  0xb6   : > { %v1099_v40 = vadd.f32 %v10701_v29, %v1016_v39 }
  0xb8   : > { %v1178_v42 = vmax.f32 %v1099_v40, 0.0  ;;  %v9835_v40 = vld [vmem:[%s14309_s4 + $0xd8] sm:$0xff] }
  0xb9   : > { %3496 = vmatpush.bf16.msrb.mxu1 %v9835_v40 }
  0xba   : > { %v1340_v45 = vpack.c.bf16 %v1178_v42, %v1178_v42  ;;  %v9776_v42 = vld [vmem:[%s10648_s30 + $0x60] sm:$0xff] }
  0xbb   : > { %v817_v46 = vpop.f32.mrf.mxu0 }
  0xbc   : > { %v1017_v48 = vmul.f32 %v10696_v28, %v817_v46  ;;  %v1540_v50 = vunpack.c.l.b16 %v1340_v45  ;;  %v9834_v46 = vld [vmem:[%s14309_s4 + $0xd0] sm:$0xff] }
  0xbd   : > { %3497 = vmatpush.bf16.msrb.mxu1 %v9834_v46 }
  0xbe   : > { %v1100_v51 = vadd.f32 %v10701_v29, %v1017_v48  ;;  %7329 = vmatmul.msk.bf16.gmra.mxu0 %vm675_vm2, %v9773_v44  ;;  %v1543_v52 = vpack.c.b16 %v1540_v50, %v1539_v49 }
  0xc0   : > { %v1179_v55 = vmax.f32 %v1100_v51, 0.0  ;;  %3443 = vmatmul.bf16.vlgmr.msra.gmra.mxu1 %v1543_v52  ;;  %v9833_v51 = vld [vmem:[%s14309_s4 + $0xc8] sm:$0xff]  ;;  %v9847_v52 = vld [vmem:[%s14309_s4 + $0x138] sm:$0xff] }
  0xc1   : > { %3498 = vmatpush.bf16.msrb.mxu1 %v9833_v51  ;;  %3511 = vmatpush.bf16.msrb.mxu2 %v9847_v52  ;;  %v9779_v51 = vld [vmem:[%s10648_s30 + $0x78] sm:$0xff] }
  0xc2   : > { %v1341_v6 = vpack.c.bf16 %v1179_v55, %v1179_v55 }
  0xc3   : > { %v819_v56 = vpop.f32.mrf.mxu0 }
  0xc4   : > { %v1018_v59 = vmul.f32 %v10696_v28, %v819_v56  ;;  %v1541_v12 = vunpack.c.l.b16 %v1341_v6  ;;  %v9844_v6 = vld [vmem:[%s14309_s4 + $0x120] sm:$0xff] }
  0xc5   : > { %3499 = vmatpush.bf16.msrb.mxu1 %v9832_v57  ;;  %3512 = vmatpush.bf16.msrb.mxu2 %v9846_v58 }
  0xc6   : > { %v1101_v60 = vadd.f32 %v10701_v29, %v1018_v59 }
  0xc8   : > { %v1180_v62 = vmax.f32 %v1101_v60, 0.0 }
  0xca   : > { %1259 = vst [vmem:[#allocation2 + $0x18] sm:$0xff] %v1180_v62 }
  0xcb   : > { %v822_v0 = vpop.f32.mrf.mxu0 }
  0xcc   : > { %v1019_v2 = vmul.f32 %v10696_v28, %v822_v0 }
  0xce   : > { %v1102_v3 = vadd.f32 %v10701_v29, %v1019_v2  ;;  %7330 = vmatmul.msk.bf16.gmra.mxu0 %vm675_vm2, %v9774_v63  ;;  %v9845_v63 = vld [vmem:[%s14309_s4 + $0x128] sm:$0xff] }
  0xcf   : > { %3513 = vmatpush.bf16.msrb.mxu2 %v9845_v63 }
  0xd0   : > { %v1181_v5 = vmax.f32 %v1102_v3, 0.0  ;;  %v9777_v3 = vld [vmem:[%s10648_s30 + $0x68] sm:$0xff] }
  0xd1   : > { %v1338_v7 = vld [vmem:[#allocation2 + $0x18] sm:$0x1] }
  0xd2   : > { %1260 = vst [vmem:[#allocation2 + $0x20] sm:$0xff] %v1181_v5  ;;  %v1342_v8 = vpack.c.bf16 %v1338_v7, %v1338_v7 }
  0xd3   : > { %v824_v9 = vpop.f32.mrf.mxu0  ;;  %3514 = vmatpush.bf16.msrb.mxu2 %v9844_v6 }
  0xd4   : > { %v1020_v11 = vmul.f32 %v10696_v28, %v824_v9  ;;  %v1542_v13 = vunpack.c.l.b16 %v1342_v8 }
  0xd6   : > { %v1103_v14 = vadd.f32 %v10701_v29, %v1020_v11  ;;  %v1544_v15 = vpack.c.b16 %v1542_v13, %v1541_v12  ;;  %v9843_v12 = vld [vmem:[%s14309_s4 + $0x118] sm:$0xff] }
  0xd7   : > { %3515 = vmatpush.bf16.msrb.mxu2 %v9843_v12  ;;  %v9780_v12 = vld [vmem:[%s10648_s30 + $0x80] sm:$0xff] }
  0xd8   : > { %v1182_v18 = vmax.f32 %v1103_v14, 0.0  ;;  %3448 = vmatmul.bf16.gmra.mxu1 %v1544_v15 }
  0xd9   : > { %v1343_v24 = vld [vmem:[#allocation2 + $0x19] sm:$0xff] }
  0xda   : > { %1261 = vst [vmem:[#allocation2 + $0x28] sm:$0xff] %v1182_v18  ;;  %v1347_v30 = vpack.c.bf16 %v1343_v24, %v1343_v24 }
  0xdb   : > { %v827_v20 = vpop.f32.mrf.mxu0  ;;  %3516 = vmatpush.bf16.msrb.mxu2 %v9842_v17 }
  0xdc   : > { %v1021_v23 = vmul.f32 %v10696_v28, %v827_v20  ;;  %v1551_v36 = vunpack.c.l.b16 %v1347_v30 }
  0xde   : > { %v1104_v25 = vadd.f32 %v10701_v29, %v1021_v23  ;;  %7331 = vmatmul.msk.bf16.gmra.mxu0 %vm675_vm2, %v9775_v19  ;;  %v9855_v23 = vld [vmem:[%s14309_s4 + $0x178] sm:$0xff] }
  0xdf   : > { %3517 = vmatpush.bf16.msrb.mxu2 %v9841_v22  ;;  %3530 = vmatpush.bf16.msrb.mxu3 %v9855_v23 }
  0xe0   : > { %v1183_v27 = vmax.f32 %v1104_v25, 0.0  ;;  %v9778_v25 = vld [vmem:[%s10648_s30 + $0x70] sm:$0xff] }
  0xe1   : > { %v1344_v31 = vld [vmem:[#allocation2 + $0x21] sm:$0xff] }
  0xe2   : > { %1262 = vst [vmem:[#allocation2 + $0x30] sm:$0xff] %v1183_v27  ;;  %v1348_v32 = vpack.c.bf16 %v1344_v31, %v1344_v31  ;;  %v9840_v31 = vld [vmem:[%s14309_s4 + $0x100] sm:$0xff] }
  0xe3   : > { %v829_v33 = vpop.f32.mrf.mxu0  ;;  %3518 = vmatpush.bf16.msrb.mxu2 %v9840_v31 }
  0xe4   : > { %v1022_v35 = vmul.f32 %v10696_v28, %v829_v33  ;;  %v1552_v37 = vunpack.c.l.b16 %v1348_v32  ;;  %v9854_v32 = vld [vmem:[%s14309_s4 + $0x170] sm:$0xff] }
  0xe5   : > { %3531 = vmatpush.bf16.msrb.mxu3 %v9854_v32 }
  0xe6   : > { %v1105_v38 = vadd.f32 %v10701_v29, %v1022_v35  ;;  %v1555_v39 = vpack.c.b16 %v1552_v37, %v1551_v36  ;;  %v9853_v37 = vld [vmem:[%s14309_s4 + $0x168] sm:$0xff] }
  0xe8   : > { %v1184_v41 = vmax.f32 %v1105_v38, 0.0  ;;  %3462 = vmatmul.bf16.vlgmr.msra.gmra.mxu2 %v1555_v39 }
  0xe9   : > { %v1345_v44 = vld [vmem:[#allocation2 + $0x29] sm:$0xff]  ;;  %v1346_v45 = vld [vmem:[#allocation2 + $0x31] sm:$0x1]  ;;  %3532 = vmatpush.bf16.msrb.mxu3 %v9853_v37 }
  0xea   : > { %1263 = vst [vmem:[#allocation2 + $0x38] sm:$0xff] %v1184_v41  ;;  %v1349_v49 = vpack.c.bf16 %v1345_v44, %v1345_v44  ;;  %v1350_v50 = vpack.c.bf16 %v1346_v45, %v1346_v45 }
  0xeb   : > { %v832_v43 = vpop.f32.mrf.mxu0 }
  0xec   : > { %v1023_v47 = vmul.f32 %v10696_v28, %v832_v43  ;;  %v1553_v54 = vunpack.c.l.b16 %v1349_v49  ;;  %v1554_v55 = vunpack.c.l.b16 %v1350_v50  ;;  %v9852_v43 = vld [vmem:[%s14309_s4 + $0x160] sm:$0xff]  ;;  %v9851_v49 = vld [vmem:[%s14309_s4 + $0x158] sm:$0xff] }
  0xed   : > { %3533 = vmatpush.bf16.msrb.mxu3 %v9852_v43 }
  0xee   : > { %v1106_v48 = vadd.f32 %v10701_v29, %v1023_v47  ;;  %7332 = vmatmul.msk.bf16.gmra.mxu0 %vm675_vm2, %v9776_v42  ;;  %v1556_v62 = vpack.c.b16 %v1554_v55, %v1553_v54  ;;  %v9850_v55 = vld [vmem:[%s14309_s4 + $0x150] sm:$0xff] }
  0xf0   : > { %v1185_v53 = vmax.f32 %v1106_v48, 0.0 }
  0xf1   : > { %v1351_v60 = vld [vmem:[#allocation2 + $0x32] sm:$0xff]  ;;  %3534 = vmatpush.bf16.msrb.mxu3 %v9851_v49 }
  0xf2   : > { %1264 = vst [vmem:[#allocation2 + $0x40] sm:$0xff] %v1185_v53  ;;  %v1355_v1 = vpack.c.bf16 %v1351_v60, %v1351_v60  ;;  %v9849_v60 = vld [vmem:[%s14309_s4 + $0x148] sm:$0xff] }
  0xf3   : > { %v834_v56 = vpop.f32.mrf.mxu0 }
  0xf4   : > { %v1024_v59 = vmul.f32 %v10696_v28, %v834_v56  ;;  %v1563_v8 = vunpack.c.l.b16 %v1355_v1 }
  0xf5   : > { %3535 = vmatpush.bf16.msrb.mxu3 %v9850_v55 }
  0xf6   : > { %v1107_v61 = vadd.f32 %v10701_v29, %v1024_v59 }
  0xf8   : > { %v1186_v0 = vmax.f32 %v1107_v61, 0.0  ;;  %3467 = vmatmul.bf16.gmra.mxu2 %v1556_v62  ;;  %v9863_v61 = vld [vmem:[%s14309_s4 + $0x1b8] sm:$0xff] }
  0xf9   : > { %v1352_v2 = vld [vmem:[#allocation2 + $0x3a] sm:$0xff]  ;;  %3536 = vmatpush.bf16.msrb.mxu3 %v9849_v60  ;;  %3549 = vmatpush.bf16.msra.mxu1 %v9863_v61  ;;  %v9782_v61 = vld [vmem:[%s10648_s30 + $0x90] sm:$0xff] }
  0xfa   : > { %1265 = vst [vmem:[#allocation2 + $0x48] sm:$0xff] %v1186_v0  ;;  %v1356_v4 = vpack.c.bf16 %v1352_v2, %v1352_v2  ;;  %v9848_v2 = vld [vmem:[%s14309_s4 + $0x140] sm:$0xff] }
  0xfb   : > { %v837_v5 = vpop.f32.mrf.mxu0 }
  0xfc   : > { %v1025_v7 = vmul.f32 %v10696_v28, %v837_v5  ;;  %v1564_v9 = vunpack.c.l.b16 %v1356_v4 }
  0xfd   : > { %3537 = vmatpush.bf16.msrb.mxu3 %v9848_v2  ;;  %v9878_v2 = vld [vmem:[%s14309_s4 + $0x230] sm:$0xff] }
  0xfe   : > { %v1108_v10 = vadd.f32 %v10701_v29, %v1025_v7  ;;  %7333 = vmatmul.msk.bf16.gmra.mxu0 %vm675_vm2, %v9777_v3  ;;  %v1567_v11 = vpack.c.b16 %v1564_v9, %v1563_v8  ;;  %v9862_v3 = vld [vmem:[%s14309_s4 + $0x1b0] sm:$0xff]  ;;  %v9861_v8 = vld [vmem:[%s14309_s4 + $0x1a8] sm:$0xff] }
  0xff   : > { %3550 = vmatpush.bf16.msra.mxu1 %v9862_v3 }
 0x100   : > { %v1187_v13 = vmax.f32 %v1108_v10, 0.0  ;;  %3481 = vmatmul.bf16.vlgmr.msra.gmra.mxu3 %v1567_v11 }
 0x101   : > { %v1353_v15 = vld [vmem:[#allocation2 + $0x42] sm:$0xff]  ;;  %v1354_v16 = vld [vmem:[#allocation2 + $0x4a] sm:$0x1] }
 0x102   : > { %1266 = vst [vmem:[#allocation2 + $0x50] sm:$0xff] %v1187_v13  ;;  %v1357_v20 = vpack.c.bf16 %v1353_v15, %v1353_v15  ;;  %v1358_v21 = vpack.c.bf16 %v1354_v16, %v1354_v16  ;;  %v9860_v15 = vld [vmem:[%s14309_s4 + $0x1a0] sm:$0xff] }
 0x103   : > { %v839_v14 = vpop.f32.mrf.mxu0  ;;  %3551 = vmatpush.bf16.msra.mxu1 %v9861_v8  ;;  %v9877_v8 = vld [vmem:[%s14309_s4 + $0x228] sm:$0xff] }
 0x104   : > { %v1026_v18 = vmul.f32 %v10696_v28, %v839_v14  ;;  %v1565_v26 = vunpack.c.l.b16 %v1357_v20  ;;  %v1566_v27 = vunpack.c.l.b16 %v1358_v21  ;;  %v9859_v21 = vld [vmem:[%s14309_s4 + $0x198] sm:$0xff] }
 0x106   : > { %v1109_v19 = vadd.f32 %v10701_v29, %v1026_v18  ;;  %v1568_v36 = vpack.c.b16 %v1566_v27, %v1565_v26  ;;  %v9858_v26 = vld [vmem:[%s14309_s4 + $0x190] sm:$0xff] }
 0x107   : > { %3552 = vmatpush.bf16.msra.mxu1 %v9860_v15 }
 0x108   : > { %v1188_v24 = vmax.f32 %v1109_v19, 0.0 }
 0x109   : > { %v1359_v34 = vld [vmem:[#allocation2 + $0x4b] sm:$0xff] }
 0x10a   : > { %1267 = vst [vmem:[#allocation2 + $0x58] sm:$0xff] %v1188_v24  ;;  %v1363_v39 = vpack.c.bf16 %v1359_v34, %v1359_v34  ;;  %v9871_v34 = vld [vmem:[%s14309_s4 + $0x1f8] sm:$0xff] }
 0x10b   : > { %v842_v30 = vpop.f32.mrf.mxu0  ;;  %3553 = vmatpush.bf16.msra.mxu1 %v9859_v21  ;;  %3568 = vmatpush.bf16.msra.mxu2 %v9871_v34 }
 0x10c   : > { %v1027_v33 = vmul.f32 %v10696_v28, %v842_v30  ;;  %v1575_v45 = vunpack.c.l.b16 %v1363_v39 }
 0x10e   : > { %v1110_v35 = vadd.f32 %v10701_v29, %v1027_v33  ;;  %7334 = vmatmul.msk.bf16.gmra.mxu0 %vm675_vm2, %v9778_v25  ;;  %v9857_v33 = vld [vmem:[%s14309_s4 + $0x188] sm:$0xff] }
 0x10f   : > { %3554 = vmatpush.bf16.msra.mxu1 %v9858_v26 }
 0x110   : > { %v1189_v38 = vmax.f32 %v1110_v35, 0.0  ;;  %3486 = vmatmul.bf16.gmra.mxu3 %v1568_v36  ;;  %v9781_v36 = vld [vmem:[%s10648_s30 + $0x88] sm:$0xff] }
 0x111   : > { %v1360_v40 = vld [vmem:[#allocation2 + $0x53] sm:$0xff] }
 0x112   : > { %1268 = vst [vmem:[#allocation2 + $0x60] sm:$0xff] %v1189_v38  ;;  %v1364_v41 = vpack.c.bf16 %v1360_v40, %v1360_v40  ;;  %v9856_v40 = vld [vmem:[%s14309_s4 + $0x180] sm:$0xff] }
 0x113   : > { %v844_v42 = vpop.f32.mrf.mxu0  ;;  %3555 = vmatpush.bf16.msra.mxu1 %v9857_v33 }
 0x114   : > { %v1028_v44 = vmul.f32 %v10696_v28, %v844_v42  ;;  %v1576_v46 = vunpack.c.l.b16 %v1364_v41  ;;  %v9870_v41 = vld [vmem:[%s14309_s4 + $0x1f0] sm:$0xff] }
 0x115   : > { %3569 = vmatpush.bf16.msra.mxu2 %v9870_v41 }
 0x116   : > { %v1111_v47 = vadd.f32 %v10701_v29, %v1028_v44  ;;  %v1579_v48 = vpack.c.b16 %v1576_v46, %v1575_v45  ;;  %v9869_v46 = vld [vmem:[%s14309_s4 + $0x1e8] sm:$0xff] }
 0x117   : > { %3556 = vmatpush.bf16.msra.mxu1 %v9856_v40  ;;  %v9872_v40 = vld [vmem:[%s14309_s4 + $0x200] sm:$0xff] }
 0x118   : > { %v1190_v50 = vmax.f32 %v1111_v47, 0.0  ;;  %3500 = vmatmul.bf16.vlgmr.msrb.gmra.mxu1 %v1579_v48 }
 0x119   : > { %v1361_v53 = vld [vmem:[#allocation2 + $0x5b] sm:$0xff]  ;;  %v1362_v54 = vld [vmem:[#allocation2 + $0x63] sm:$0x1]  ;;  %3570 = vmatpush.bf16.msra.mxu2 %v9869_v46 }
 0x11a   : > { %1269 = vst [vmem:[#allocation2 + $0x68] sm:$0xff] %v1190_v50  ;;  %v1365_v58 = vpack.c.bf16 %v1361_v53, %v1361_v53  ;;  %v1366_v59 = vpack.c.bf16 %v1362_v54, %v1362_v54  ;;  %v9784_v46 = vld [vmem:[%s10648_s30 + $0xa0] sm:$0xff] }
 0x11b   : > { %v847_v52 = vpop.f32.mrf.mxu0 }
 0x11c   : > { %v1029_v56 = vmul.f32 %v10696_v28, %v847_v52  ;;  %v1577_v63 = vunpack.c.l.b16 %v1365_v58  ;;  %v1578_v0 = vunpack.c.l.b16 %v1366_v59  ;;  %v9868_v52 = vld [vmem:[%s14309_s4 + $0x1e0] sm:$0xff]  ;;  %v9867_v58 = vld [vmem:[%s14309_s4 + $0x1d8] sm:$0xff] }
 0x11d   : > { %3571 = vmatpush.bf16.msra.mxu2 %v9868_v52  ;;  %v9879_v59 = vld [vmem:[%s14309_s4 + $0x238] sm:$0xff] }
 0x11e   : > { %v1112_v57 = vadd.f32 %v10701_v29, %v1029_v56  ;;  %7335 = vmatmul.msk.bf16.gmra.mxu0 %vm675_vm2, %v9779_v51  ;;  %v1580_v7 = vpack.c.b16 %v1578_v0, %v1577_v63  ;;  %3587 = vmatpush.bf16.msra.mxu3 %v9879_v59 }
 0x120   : > { %v1191_v62 = vmax.f32 %v1112_v57, 0.0 }
 0x121   : > { %v1367_v5 = vld [vmem:[#allocation2 + $0x64] sm:$0xff]  ;;  %3572 = vmatpush.bf16.msra.mxu2 %v9867_v58  ;;  %v9887_v58 = vld [vmem:[%s14309_s4 + $0x278] sm:$0xff] }
 0x122   : > { %1270 = vst [vmem:[#allocation2 + $0x70] sm:$0xff] %v1191_v62  ;;  %v1371_v10 = vpack.c.bf16 %v1367_v5, %v1367_v5  ;;  %3588 = vmatpush.bf16.msra.mxu3 %v9878_v2  ;;  %3606 = vmatpush.bf16.msrb.mxu1 %v9887_v58 }
 0x123   : > { %v849_v1 = vpop.f32.mrf.mxu0 }
 0x124   : > { %v1030_v4 = vmul.f32 %v10696_v28, %v849_v1  ;;  %v1587_v17 = vunpack.c.l.b16 %v1371_v10  ;;  %v9866_v1 = vld [vmem:[%s14309_s4 + $0x1d0] sm:$0xff] }
 0x125   : > { %3573 = vmatpush.bf16.msra.mxu2 %v9866_v1 }
 0x126   : > { %v1113_v6 = vadd.f32 %v10701_v29, %v1030_v4  ;;  %3589 = vmatpush.bf16.msra.mxu3 %v9877_v8 }
 0x128   : > { %v1192_v9 = vmax.f32 %v1113_v6, 0.0  ;;  %3505 = vmatmul.bf16.gmra.mxu1 %v1580_v7  ;;  %v9865_v7 = vld [vmem:[%s14309_s4 + $0x1c8] sm:$0xff] }
 0x129   : > { %v1368_v11 = vld [vmem:[#allocation2 + $0x6c] sm:$0xff]  ;;  %3574 = vmatpush.bf16.msra.mxu2 %v9865_v7 }
 0x12a   : > { %1271 = vst [vmem:[#allocation2 + $0x78] sm:$0xff] %v1192_v9  ;;  %v1372_v13 = vpack.c.bf16 %v1368_v11, %v1368_v11  ;;  %v9885_v7 = vld [vmem:[%s14309_s4 + $0x268] sm:$0xff] }
 0x12b   : > { %v852_v14 = vpop.f32.mrf.mxu0 }
 0x12c   : > { %v1031_v16 = vmul.f32 %v10696_v28, %v852_v14  ;;  %v1588_v18 = vunpack.c.l.b16 %v1372_v13  ;;  %v9864_v13 = vld [vmem:[%s14309_s4 + $0x1c0] sm:$0xff] }
 0x12d   : > { %v9876_v14 = vld [vmem:[%s14309_s4 + $0x220] sm:$0xff]  ;;  %3575 = vmatpush.bf16.msra.mxu2 %v9864_v13 }
 0x12e   : > { %v1114_v19 = vadd.f32 %v10701_v29, %v1031_v16  ;;  %7336 = vmatmul.msk.bf16.gmra.mxu0 %vm675_vm2, %v9780_v12  ;;  %v1591_v20 = vpack.c.b16 %v1588_v18, %v1587_v17  ;;  %3590 = vmatpush.bf16.msra.mxu3 %v9876_v14 }
 0x130   : > { %v1193_v22 = vmax.f32 %v1114_v19, 0.0  ;;  %3519 = vmatmul.bf16.vlgmr.msrb.gmra.mxu2 %v1591_v20  ;;  %v9875_v19 = vld [vmem:[%s14309_s4 + $0x218] sm:$0xff] }
 0x131   : > { %v1369_v24 = vld [vmem:[#allocation2 + $0x74] sm:$0xff]  ;;  %v1370_v25 = vld [vmem:[#allocation2 + $0x7c] sm:$0x1] }
 0x132   : > { %1272 = vst [vmem:[#allocation2 + $0x80] sm:$0xff] %v1193_v22  ;;  %v1373_v31 = vpack.c.bf16 %v1369_v24, %v1369_v24  ;;  %v1374_v32 = vpack.c.bf16 %v1370_v25, %v1370_v25  ;;  %3591 = vmatpush.bf16.msra.mxu3 %v9875_v19 }
 0x133   : > { %v854_v23 = vpop.f32.mrf.mxu0 }
 0x134   : > { %v1032_v27 = vmul.f32 %v10696_v28, %v854_v23  ;;  %v1589_v37 = vunpack.c.l.b16 %v1373_v31  ;;  %v1590_v38 = vunpack.c.l.b16 %v1374_v32  ;;  %v9783_v23 = vld [vmem:[%s10648_s30 + $0x98] sm:$0xff]  ;;  %v9874_v31 = vld [vmem:[%s14309_s4 + $0x210] sm:$0xff] }
 0x136   : > { %v1115_v30 = vadd.f32 %v10701_v29, %v1032_v27  ;;  %v1592_v45 = vpack.c.b16 %v1590_v38, %v1589_v37  ;;  %3592 = vmatpush.bf16.msra.mxu3 %v9874_v31 }
 0x138   : > { %v1194_v35 = vmax.f32 %v1115_v30, 0.0 }
 0x139   : > { %v1375_v43 = vld [vmem:[#allocation2 + $0x7d] sm:$0xff] }
 0x13a   : > { %1273 = vst [vmem:[#allocation2 + $0x88] sm:$0xff] %v1194_v35  ;;  %v1379_v48 = vpack.c.bf16 %v1375_v43, %v1375_v43  ;;  %v9873_v35 = vld [vmem:[%s14309_s4 + $0x208] sm:$0xff] }
 0x13b   : > { %v857_v39 = vpop.f32.mrf.mxu0  ;;  %3593 = vmatpush.bf16.msra.mxu3 %v9873_v35 }
 0x13c   : > { %v1033_v42 = vmul.f32 %v10696_v28, %v857_v39  ;;  %v1599_v54 = vunpack.c.l.b16 %v1379_v48 }
 0x13e   : > { %v1116_v44 = vadd.f32 %v10701_v29, %v1033_v42  ;;  %7337 = vmatmul.msk.bf16.gmra.mxu0 %vm675_vm2, %v9781_v36 }
 0x13f   : > { %3594 = vmatpush.bf16.msra.mxu3 %v9872_v40  ;;  %v9895_v40 = vld [vmem:[%s14309_s4 + $0x2b8] sm:$0xff] }
 0x140   : > { %v1195_v47 = vmax.f32 %v1116_v44, 0.0  ;;  %3524 = vmatmul.bf16.gmra.mxu2 %v1592_v45  ;;  %v3444_v44 = vpop.f32.mrf.mxu1 }
 0x141   : > { %v1376_v49 = vld [vmem:[#allocation2 + $0x85] sm:$0xff]  ;;  %3625 = vmatpush.bf16.msrb.mxu2 %v9895_v40 }
 0x142   : > { %1274 = vst [vmem:[#allocation2 + $0x90] sm:$0xff] %v1195_v47  ;;  %v1380_v50 = vpack.c.bf16 %v1376_v49, %v1376_v49 }
 0x143   : > { %v859_v51 = vpop.f32.mrf.mxu0 }
 0x144   : > { %v1034_v53 = vmul.f32 %v10696_v28, %v859_v51  ;;  %v1600_v55 = vunpack.c.l.b16 %v1380_v50 }
 0x146   : > { %v1117_v56 = vadd.f32 %v10701_v29, %v1034_v53  ;;  %v1603_v57 = vpack.c.b16 %v1600_v55, %v1599_v54 }
 0x148   : > { %v1196_v60 = vmax.f32 %v1117_v56, 0.0  ;;  %3538 = vmatmul.bf16.vlgmr.msrb.gmra.mxu3 %v1603_v57 }
 0x149   : > { %v1377_v62 = vld [vmem:[#allocation2 + $0x8d] sm:$0xff]  ;;  %v1378_v0 = vld [vmem:[#allocation2 + $0x95] sm:$0x1] }
 0x14a   : > { %1275 = vst [vmem:[#allocation2 + $0x98] sm:$0xff] %v1196_v60  ;;  %v1381_v5 = vpack.c.bf16 %v1377_v62, %v1377_v62  ;;  %v1382_v6 = vpack.c.bf16 %v1378_v0, %v1378_v0  ;;  %v10971_v60 = vpop.f32.mrf.mxu1 }
 0x14b   : > { %v862_v63 = vpop.f32.mrf.mxu0 }
 0x14c   : > { %v1035_v3 = vmul.f32 %v10696_v28, %v862_v63  ;;  %v1601_v10 = vunpack.c.l.b16 %v1381_v5  ;;  %v1602_v11 = vunpack.c.l.b16 %v1382_v6 }
 0x14e   : > { %v1118_v4 = vadd.f32 %v10701_v29, %v1035_v3  ;;  %7338 = vmatmul.msk.bf16.gmra.mxu0 %vm675_vm2, %v9782_v61  ;;  %v1604_v18 = vpack.c.b16 %v1602_v11, %v1601_v10  ;;  %v9886_v3 = vld [vmem:[%s14309_s4 + $0x270] sm:$0xff] }
 0x14f   : > { %3607 = vmatpush.bf16.msrb.mxu1 %v9886_v3 }
 0x150   : > { %v1197_v9 = vmax.f32 %v1118_v4, 0.0 }
 0x151   : > { %v1383_v16 = vld [vmem:[#allocation2 + $0x96] sm:$0xff] }
 0x152   : > { %1276 = vst [vmem:[#allocation2 + $0xa0] sm:$0xff] %v1197_v9  ;;  %v1387_v21 = vpack.c.bf16 %v1383_v16, %v1383_v16  ;;  %v9785_v9 = vld [vmem:[%s10648_s30 + $0xa8] sm:$0xff]  ;;  %v9884_v16 = vld [vmem:[%s14309_s4 + $0x260] sm:$0xff] }
 0x153   : > { %v864_v12 = vpop.f32.mrf.mxu0  ;;  %3608 = vmatpush.bf16.msrb.mxu1 %v9885_v7  ;;  %v9890_v7 = vld [vmem:[%s14309_s4 + $0x290] sm:$0xff] }
 0x154   : > { %v1036_v15 = vmul.f32 %v10696_v28, %v864_v12  ;;  %v1611_v27 = vunpack.c.l.b16 %v1387_v21 }
 0x155   : > { %v3449_v8 = vpop.f32.mrf.mxu1 }
 0x156   : > { %v1119_v17 = vadd.f32 %v10701_v29, %v1036_v15 }
 0x157   : > { %3609 = vmatpush.bf16.msrb.mxu1 %v9884_v16  ;;  %v9888_v16 = vld [vmem:[%s14309_s4 + $0x280] sm:$0xff] }
 0x158   : > { %v1198_v20 = vmax.f32 %v1119_v17, 0.0  ;;  %3543 = vmatmul.bf16.gmra.mxu3 %v1604_v18 }
 0x159   : > { %v1384_v22 = vld [vmem:[#allocation2 + $0x9e] sm:$0xff] }
 0x15a   : > { %1277 = vst [vmem:[#allocation2 + $0xa8] sm:$0xff] %v1198_v20  ;;  %v1388_v24 = vpack.c.bf16 %v1384_v22, %v1384_v22  ;;  %v9883_v22 = vld [vmem:[%s14309_s4 + $0x258] sm:$0xff] }
 0x15b   : > { %v867_v25 = vpop.f32.mrf.mxu0  ;;  %3610 = vmatpush.bf16.msrb.mxu1 %v9883_v22 }
 0x15c   : > { %v1037_v26 = vmul.f32 %v10696_v28, %v867_v25  ;;  %v1612_v30 = vunpack.c.l.b16 %v1388_v24 }
 0x15e   : > { %v1120_v32 = vadd.f32 %v10701_v29, %v1037_v26  ;;  %7339 = vmatmul.msk.bf16.gmra.mxu0 %vm675_vm2, %v9783_v23  ;;  %v1615_v33 = vpack.c.b16 %v1612_v30, %v1611_v27 }
 0x160   : > { %v1199_v34 = vmax.f32 %v1120_v32, 0.0  ;;  %3557 = vmatmul.bf16.vlgmr.msra.gmra.mxu1 %v1615_v33  ;;  %v9882_v33 = vld [vmem:[%s14309_s4 + $0x250] sm:$0xff] }
 0x161   : > { %v1385_v37 = vld [vmem:[#allocation2 + $0xa6] sm:$0xff]  ;;  %v1386_v38 = vld [vmem:[#allocation2 + $0xae] sm:$0x1]  ;;  %3611 = vmatpush.bf16.msrb.mxu1 %v9882_v33 }
 0x162   : > { %1278 = vst [vmem:[#allocation2 + $0xb0] sm:$0xff] %v1199_v34  ;;  %v1389_v42 = vpack.c.bf16 %v1385_v37, %v1385_v37  ;;  %v1390_v43 = vpack.c.bf16 %v1386_v38, %v1386_v38 }
 0x163   : > { %v869_v36 = vpop.f32.mrf.mxu0 }
 0x164   : > { %v1038_v39 = vmul.f32 %v10696_v28, %v869_v36  ;;  %v1613_v47 = vunpack.c.l.b16 %v1389_v42  ;;  %v1614_v48 = vunpack.c.l.b16 %v1390_v43 }
 0x166   : > { %v1121_v41 = vadd.f32 %v10701_v29, %v1038_v39  ;;  %v1616_v55 = vpack.c.b16 %v1614_v48, %v1613_v47  ;;  %v9881_v39 = vld [vmem:[%s14309_s4 + $0x248] sm:$0xff]  ;;  %v11014_v47 = vpop.f32.mrf.mxu1 }
 0x167   : > { %3612 = vmatpush.bf16.msrb.mxu1 %v9881_v39  ;;  %v9899_v39 = vld [vmem:[%s14309_s4 + $0x2d8] sm:$0xff] }
 0x168   : > { %v1200_v45 = vmax.f32 %v1121_v41, 0.0  ;;  %v9786_v41 = vld [vmem:[%s10648_s30 + $0xb0] sm:$0xff] }
 0x169   : > { %v1391_v53 = vld [vmem:[#allocation2 + $0xaf] sm:$0xff] }
 0x16a   : > { %1279 = vst [vmem:[#allocation2 + $0xb8] sm:$0xff] %v1200_v45  ;;  %v1395_v57 = vpack.c.bf16 %v1391_v53, %v1391_v53  ;;  %v9880_v45 = vld [vmem:[%s14309_s4 + $0x240] sm:$0xff] }
 0x16b   : > { %v872_v49 = vpop.f32.mrf.mxu0  ;;  %v3463_v50 = vpop.f32.mrf.mxu2  ;;  %3613 = vmatpush.bf16.msrb.mxu1 %v9880_v45 }
 0x16c   : > { %v1039_v51 = vmul.f32 %v10696_v28, %v872_v49  ;;  %v3464_v52 = vadd.f32 %v3463_v50, %v3444_v44  ;;  %v1623_v1 = vunpack.c.l.b16 %v1395_v57  ;;  %v9893_v50 = vld [vmem:[%s14309_s4 + $0x2a8] sm:$0xff] }
 0x16e   : > { %v1122_v54 = vadd.f32 %v10701_v29, %v1039_v51  ;;  %7340 = vmatmul.msk.bf16.gmra.mxu0 %vm675_vm2, %v9784_v46  ;;  %v9894_v46 = vld [vmem:[%s14309_s4 + $0x2b0] sm:$0xff] }
 0x16f   : > { %3626 = vmatpush.bf16.msrb.mxu2 %v9894_v46 }
 0x170   : > { %v1201_v56 = vmax.f32 %v1122_v54, 0.0  ;;  %3562 = vmatmul.bf16.gmra.mxu1 %v1616_v55  ;;  %v9892_v54 = vld [vmem:[%s14309_s4 + $0x2a0] sm:$0xff] }
 0x171   : > { %v1392_v59 = vld [vmem:[#allocation2 + $0xb7] sm:$0xff] }
 0x172   : > { %1280 = vst [vmem:[#allocation2 + $0xc0] sm:$0xff] %v1201_v56  ;;  %v1396_v61 = vpack.c.bf16 %v1392_v59, %v1392_v59 }
 0x173   : > { %v874_v62 = vpop.f32.mrf.mxu0  ;;  %v10973_v63 = vpop.f32.mrf.mxu2  ;;  %3627 = vmatpush.bf16.msrb.mxu2 %v9893_v50 }
 0x174   : > { %v1040_v0 = vmul.f32 %v10696_v28, %v874_v62  ;;  %v1624_v2 = vunpack.c.l.b16 %v1396_v61  ;;  %v9891_v62 = vld [vmem:[%s14309_s4 + $0x298] sm:$0xff] }
 0x176   : > { %v1123_v4 = vadd.f32 %v10701_v29, %v1040_v0  ;;  %v1627_v5 = vpack.c.b16 %v1624_v2, %v1623_v1  ;;  %v9787_v1 = vld [vmem:[%s10648_s30 + $0xb8] sm:$0xff] }
 0x177   : > { %3628 = vmatpush.bf16.msrb.mxu2 %v9892_v54  ;;  %v9911_v54 = vld [vmem:[%s14309_s4 + $0x338] sm:$0xff] }
 0x178   : > { %v1202_v6 = vmax.f32 %v1123_v4, 0.0  ;;  %3576 = vmatmul.bf16.vlgmr.msra.gmra.mxu2 %v1627_v5  ;;  %3663 = vmatpush.bf16.msra.mxu1 %v9911_v54  ;;  %v9917_v54 = vld [vmem:[%s14309_s4 + $0x368] sm:$0xff] }
 0x179   : > { %v1393_v12 = vld [vmem:[#allocation2 + $0xbf] sm:$0xff]  ;;  %v1394_v13 = vld [vmem:[#allocation2 + $0xc7] sm:$0x1] }
 0x17a   : > { %v1397_v18 = vpack.c.bf16 %v1393_v12, %v1393_v12  ;;  %v1398_v19 = vpack.c.bf16 %v1394_v13, %v1394_v13  ;;  %v1403_v21 = vpack.c.bf16 %v1202_v6, %v1202_v6  ;;  %v9889_v12 = vld [vmem:[%s14309_s4 + $0x288] sm:$0xff]  ;;  %v9903_v13 = vld [vmem:[%s14309_s4 + $0x2f8] sm:$0xff] }
 0x17b   : > { %v877_v10 = vpop.f32.mrf.mxu0  ;;  %v3468_v11 = vpop.f32.mrf.mxu2  ;;  %3629 = vmatpush.bf16.msrb.mxu2 %v9891_v62  ;;  %3644 = vmatpush.bf16.msrb.mxu3 %v9903_v13  ;;  %v9896_v62 = vld [vmem:[%s14309_s4 + $0x2c0] sm:$0xff] }
 0x17c   : > { %v1041_v14 = vmul.f32 %v10696_v28, %v877_v10  ;;  %v3469_v15 = vadd.f32 %v3468_v11, %v3449_v8  ;;  %v1625_v23 = vunpack.c.l.b16 %v1397_v18  ;;  %v1626_v24 = vunpack.c.l.b16 %v1398_v19 }
 0x17d   : > { %v1635_v31 = vunpack.c.l.b16 %v1403_v21 }
 0x17e   : > { %v1124_v17 = vadd.f32 %v10701_v29, %v1041_v14  ;;  %7341 = vmatmul.msk.bf16.gmra.mxu0 %vm675_vm2, %v9785_v9  ;;  %v1628_v36 = vpack.c.b16 %v1626_v24, %v1625_v23 }
 0x17f   : > { %3630 = vmatpush.bf16.msrb.mxu2 %v9890_v7 }
 0x180   : > { %v1203_v20 = vmax.f32 %v1124_v17, 0.0  ;;  %v9902_v17 = vld [vmem:[%s14309_s4 + $0x2f0] sm:$0xff] }
 0x181   : > { %3645 = vmatpush.bf16.msrb.mxu3 %v9902_v17  ;;  %v9908_v17 = vld [vmem:[%s14309_s4 + $0x320] sm:$0xff] }
 0x182   : > { %v1404_v25 = vpack.c.bf16 %v1203_v20, %v1203_v20 }
 0x183   : > { %v879_v26 = vpop.f32.mrf.mxu0  ;;  %v3482_v30 = vpop.f32.mrf.mxu3  ;;  %3631 = vmatpush.bf16.msrb.mxu2 %v9889_v12 }
 0x184   : > { %v1042_v27 = vmul.f32 %v10696_v28, %v879_v26  ;;  %v1636_v32 = vunpack.c.l.b16 %v1404_v25  ;;  %v3483_v34 = vadd.f32 %v3482_v30, %v3464_v52  ;;  %v9788_v25 = vld [vmem:[%s10648_s30 + $0xc0] sm:$0xff] }
 0x186   : > { %v1125_v35 = vadd.f32 %v10701_v29, %v1042_v27  ;;  %v1639_v37 = vpack.c.b16 %v1636_v32, %v1635_v31  ;;  %v11060_v27 = vpop.f32.mrf.mxu2 }
 0x187   : > { %3632 = vmatpush.bf16.msrb.mxu2 %v9888_v16 }
 0x188   : > { %v1204_v38 = vmax.f32 %v1125_v35, 0.0  ;;  %3581 = vmatmul.bf16.gmra.mxu2 %v1628_v36  ;;  %3595 = vmatmul.bf16.vlgmr.msra.gmra.mxu3 %v1639_v37  ;;  %v11074_v35 = vld [vmem:[%s14308_s3] ss:$0 sm:$0xff] }
 0x18a   : > { %v1405_v61 = vpack.c.bf16 %v1204_v38, %v1204_v38 }
 0x18b   : > { %v882_v42 = vpop.f32.mrf.mxu0  ;;  %v11006_v44 = vpop.f32.mrf.mxu3 }
 0x18c   : > { %v1043_v43 = vmul.f32 %v10696_v28, %v882_v42  ;;  %v1637_v5 = vunpack.c.l.b16 %v1405_v61 }
 0x18e   : > { %v1126_v48 = vadd.f32 %v10701_v29, %v1043_v43  ;;  %7342 = vmatmul.msk.bf16.gmra.mxu0 %vm675_vm2, %v9786_v41 }
 0x190   : > { %v1205_v49 = vmax.f32 %v1126_v48, 0.0  ;;  %v9898_v48 = vld [vmem:[%s14309_s4 + $0x2d0] sm:$0xff] }
 0x192   : > { %1284 = vst [vmem:[#allocation2 + $0xe0] sm:$0xff] %v1205_v49 }
 0x193   : > { %v884_v51 = vpop.f32.mrf.mxu0  ;;  %v3487_v53 = vpop.f32.mrf.mxu3 }
 0x194   : > { %v1044_v52 = vmul.f32 %v10696_v28, %v884_v51  ;;  %v3488_v55 = vadd.f32 %v3487_v53, %v3469_v15  ;;  %v9897_v53 = vld [vmem:[%s14309_s4 + $0x2c8] sm:$0xff] }
 0x195   : > { %v3501_v56 = vpop.f32.mrf.mxu1 }
 0x196   : > { %v1127_v57 = vadd.f32 %v10701_v29, %v1044_v52  ;;  %v11026_v58 = vadd.f32 %v3501_v56, %v3483_v34  ;;  %v9900_v34 = vld [vmem:[%s14309_s4 + $0x2e0] sm:$0xff] }
 0x198   : > { %v1206_v59 = vmax.f32 %v1127_v57, 0.0 }
 0x199   : > { %v1402_v0 = vld [vmem:[#allocation2 + $0xe0] sm:$0x1] }
 0x19a   : > { %1285 = vst [vmem:[#allocation2 + $0xe8] sm:$0xff] %v1206_v59  ;;  %v1406_v2 = vpack.c.bf16 %v1402_v0, %v1402_v0  ;;  %v9910_v0 = vld [vmem:[%s14309_s4 + $0x330] sm:$0xff] }
 0x19b   : > { %v887_v3 = vpop.f32.mrf.mxu0  ;;  %3664 = vmatpush.bf16.msra.mxu1 %v9910_v0  ;;  %v11108_v12 = vpop.f32.mrf.mxu3 }
 0x19c   : > { %v1045_v4 = vmul.f32 %v10696_v28, %v887_v3  ;;  %v1638_v6 = vunpack.c.l.b16 %v1406_v2 }
 0x19d   : > { %v11036_v8 = vpop.f32.mrf.mxu1 }
 0x19e   : > { %v1128_v9 = vadd.f32 %v10701_v29, %v1045_v4  ;;  %7343 = vmatmul.msk.bf16.gmra.mxu0 %vm675_vm2, %v9787_v1  ;;  %v1640_v10 = vpack.c.b16 %v1638_v6, %v1637_v5  ;;  %v9909_v6 = vld [vmem:[%s14309_s4 + $0x328] sm:$0xff] }
 0x19f   : > { %3665 = vmatpush.bf16.msra.mxu1 %v9909_v6 }
 0x1a0   : > { %v1207_v11 = vmax.f32 %v1128_v9, 0.0  ;;  %3600 = vmatmul.bf16.gmra.mxu3 %v1640_v10 }
 0x1a1   : > { %v1407_v19 = vld [vmem:[#allocation2 + $0xe1] sm:$0xff] }
 0x1a2   : > { %1286 = vst [vmem:[#allocation2 + $0xf0] sm:$0xff] %v1207_v11  ;;  %v1411_v23 = vpack.c.bf16 %v1407_v19, %v1407_v19 }
 0x1a3   : > { %v889_v14 = vpop.f32.mrf.mxu0  ;;  %3666 = vmatpush.bf16.msra.mxu1 %v9908_v17 }
 0x1a4   : > { %v1046_v15 = vmul.f32 %v10696_v28, %v889_v14  ;;  %v9901_v28 = vld [vmem:[%s14309_s4 + $0x2e8] sm:$0xff]  ;;  %v1647_v32 = vunpack.c.l.b16 %v1411_v23  ;;  %v9790_v23 = vld [vmem:[%s10648_s30 + $0xd0] sm:$0xff] }
 0x1a5   : > { %v3506_v18 = vpop.f32.mrf.mxu1  ;;  %3646 = vmatpush.bf16.msrb.mxu3 %v9901_v28 }
 0x1a6   : > { %v1129_v20 = vadd.f32 %v10701_v29, %v1046_v15  ;;  %v11054_v21 = vadd.f32 %v3506_v18, %v3488_v55  ;;  %v11065_v29 = vld [vmem:[%s14307_s2] ss:$0 sm:$0xff]  ;;  %v9789_v55 = vld [vmem:[%s10648_s30 + $0xc8] sm:$0xff] }
 0x1a8   : > { %v1208_v22 = vmax.f32 %v1129_v20, 0.0 }
 0x1a9   : > { %v1408_v24 = vld [vmem:[#allocation2 + $0xe9] sm:$0xff]  ;;  %3647 = vmatpush.bf16.msrb.mxu3 %v9900_v34 }
 0x1aa   : > { %1287 = vst [vmem:[#allocation2 + $0xf8] sm:$0xff] %v1208_v22  ;;  %v1412_v26 = vpack.c.bf16 %v1408_v24, %v1408_v24  ;;  %v9907_v22 = vld [vmem:[%s14309_s4 + $0x318] sm:$0xff] }
 0x1ab   : > { %v892_v30 = vpop.f32.mrf.mxu0  ;;  %3667 = vmatpush.bf16.msra.mxu1 %v9907_v22 }
 0x1ac   : > { %v1047_v31 = vmul.f32 %v11065_v29, %v892_v30  ;;  %v1648_v33 = vunpack.c.l.b16 %v1412_v26  ;;  %v9906_v30 = vld [vmem:[%s14309_s4 + $0x310] sm:$0xff] }
 0x1ad   : > { %3648 = vmatpush.bf16.msrb.mxu3 %v9899_v39 }
 0x1ae   : > { %v1130_v36 = vadd.f32 %v11074_v35, %v1047_v31  ;;  %7344 = vmatmul.msk.bf16.gmra.mxu0 %vm675_vm2, %v9788_v25  ;;  %v1651_v37 = vpack.c.b16 %v1648_v33, %v1647_v32 }
 0x1af   : > { %3668 = vmatpush.bf16.msra.mxu1 %v9906_v30 }
 0x1b0   : > { %v1209_v38 = vmax.f32 %v1130_v36, 0.0  ;;  %3614 = vmatmul.bf16.vlgmr.msrb.gmra.mxu1 %v1651_v37  ;;  %v9905_v37 = vld [vmem:[%s14309_s4 + $0x308] sm:$0xff] }
 0x1b1   : > { %v1409_v42 = vld [vmem:[#allocation2 + $0xf1] sm:$0xff]  ;;  %v1410_v43 = vld [vmem:[#allocation2 + $0xf9] sm:$0x1]  ;;  %3649 = vmatpush.bf16.msrb.mxu3 %v9898_v48  ;;  %v11141_v48 = vpop.f32.mrf.mxu1 }
 0x1b2   : > { %1288 = vst [vmem:[#allocation2 + $0x100] sm:$0xff] %v1209_v38  ;;  %v1413_v50 = vpack.c.bf16 %v1409_v42, %v1409_v42  ;;  %v1414_v51 = vpack.c.bf16 %v1410_v43, %v1410_v43  ;;  %v9919_v38 = vld [vmem:[%s14309_s4 + $0x378] sm:$0xff] }
 0x1b3   : > { %v894_v40 = vpop.f32.mrf.mxu0  ;;  %v3520_v41 = vpop.f32.mrf.mxu2  ;;  %3682 = vmatpush.bf16.msra.mxu2 %v9919_v38  ;;  %3669 = vmatpush.bf16.msra.mxu1 %v9905_v37 }
 0x1b4   : > { %v1048_v45 = vmul.f32 %v11065_v29, %v894_v40  ;;  %v3521_v46 = vadd.f32 %v3520_v41, %v11026_v58  ;;  %v1649_v56 = vunpack.c.l.b16 %v1413_v50  ;;  %v1650_v57 = vunpack.c.l.b16 %v1414_v51 }
 0x1b5   : > { %3650 = vmatpush.bf16.msrb.mxu3 %v9897_v53 }
 0x1b6   : > { %v1131_v49 = vadd.f32 %v11074_v35, %v1048_v45  ;;  %v1652_v3 = vpack.c.b16 %v1650_v57, %v1649_v56  ;;  %v9904_v45 = vld [vmem:[%s14309_s4 + $0x300] sm:$0xff]  ;;  %v9791_v56 = vld [vmem:[%s10648_s30 + $0xd8] sm:$0xff] }
 0x1b7   : > { %3670 = vmatpush.bf16.msra.mxu1 %v9904_v45 }
 0x1b8   : > { %v1210_v52 = vmax.f32 %v1131_v49, 0.0 }
 0x1b9   : > { %v1415_v1 = vld [vmem:[#allocation2 + $0xfa] sm:$0xff]  ;;  %3651 = vmatpush.bf16.msrb.mxu3 %v9896_v62 }
 0x1ba   : > { %1289 = vst [vmem:[#allocation2 + $0x108] sm:$0xff] %v1210_v52  ;;  %v1419_v5 = vpack.c.bf16 %v1415_v1, %v1415_v1 }
 0x1bb   : > { %v897_v58 = vpop.f32.mrf.mxu0  ;;  %v11094_v59 = vpop.f32.mrf.mxu2 }
 0x1bc   : > { %v1049_v61 = vmul.f32 %v11065_v29, %v897_v58  ;;  %v1659_v15 = vunpack.c.l.b16 %v1419_v5 }
 0x1be   : > { %v1132_v2 = vadd.f32 %v11074_v35, %v1049_v61  ;;  %7345 = vmatmul.msk.bf16.gmra.mxu0 %vm675_vm2, %v9789_v55 }
 0x1c0   : > { %v1211_v4 = vmax.f32 %v1132_v2, 0.0  ;;  %3619 = vmatmul.bf16.gmra.mxu1 %v1652_v3  ;;  %v9916_v2 = vld [vmem:[%s14309_s4 + $0x360] sm:$0xff] }
 0x1c1   : > { %v1416_v7 = vld [vmem:[#allocation2 + $0x102] sm:$0xff] }
 0x1c2   : > { %1290 = vst [vmem:[#allocation2 + $0x110] sm:$0xff] %v1211_v4  ;;  %v1420_v9 = vpack.c.bf16 %v1416_v7, %v1416_v7 }
 0x1c3   : > { %v899_v10 = vpop.f32.mrf.mxu0  ;;  %v3525_v11 = vpop.f32.mrf.mxu2 }
 0x1c4   : > { %v1050_v13 = vmul.f32 %v11065_v29, %v899_v10  ;;  %v3526_v14 = vadd.f32 %v3525_v11, %v11054_v21  ;;  %v1660_v16 = vunpack.c.l.b16 %v1420_v9  ;;  %v9915_v10 = vld [vmem:[%s14309_s4 + $0x358] sm:$0xff] }
 0x1c6   : > { %v1133_v18 = vadd.f32 %v11074_v35, %v1050_v13  ;;  %v1663_v19 = vpack.c.b16 %v1660_v16, %v1659_v15  ;;  %v9914_v16 = vld [vmem:[%s14309_s4 + $0x350] sm:$0xff] }
 0x1c8   : > { %v1212_v20 = vmax.f32 %v1133_v18, 0.0  ;;  %3633 = vmatmul.bf16.vlgmr.msrb.gmra.mxu2 %v1663_v19 }
 0x1c9   : > { %v1417_v21 = vld [vmem:[#allocation2 + $0x10a] sm:$0xff]  ;;  %v1418_v24 = vld [vmem:[#allocation2 + $0x112] sm:$0x1] }
 0x1ca   : > { %1291 = vst [vmem:[#allocation2 + $0x118] sm:$0xff] %v1212_v20  ;;  %v1421_v33 = vpack.c.bf16 %v1417_v21, %v1417_v21  ;;  %v1422_v34 = vpack.c.bf16 %v1418_v24, %v1418_v24  ;;  %v9792_v21 = vld [vmem:[%s10648_s30 + $0xe0] sm:$0xff] }
 0x1cb   : > { %v902_v28 = vpop.f32.mrf.mxu0  ;;  %v3539_v26 = vpop.f32.mrf.mxu3 }
 0x1cc   : > { %v1051_v25 = vmul.f32 %v11065_v29, %v902_v28  ;;  %v3540_v31 = vadd.f32 %v3539_v26, %v3521_v46  ;;  %v1661_v39 = vunpack.c.l.b16 %v1421_v33  ;;  %v1662_v40 = vunpack.c.l.b16 %v1422_v34  ;;  %v9918_v46 = vld [vmem:[%s14309_s4 + $0x370] sm:$0xff]  ;;  %v9927_v28 = vld [vmem:[%s14309_s4 + $0x3b8] sm:$0xff] }
 0x1cd   : > { %3683 = vmatpush.bf16.msra.mxu2 %v9918_v46  ;;  %3701 = vmatpush.bf16.msra.mxu3 %v9927_v28  ;;  %v11187_v46 = vpop.f32.mrf.mxu2 }
 0x1ce   : > { %v1134_v32 = vadd.f32 %v11074_v35, %v1051_v25  ;;  %7346 = vmatmul.msk.bf16.gmra.mxu0 %vm675_vm2, %v9790_v23  ;;  %v1664_v51 = vpack.c.b16 %v1662_v40, %v1661_v39  ;;  %v9913_v23 = vld [vmem:[%s14309_s4 + $0x348] sm:$0xff] }
 0x1d0   : > { %v1213_v36 = vmax.f32 %v1134_v32, 0.0  ;;  %v9926_v32 = vld [vmem:[%s14309_s4 + $0x3b0] sm:$0xff] }
 0x1d1   : > { %v1423_v49 = vld [vmem:[#allocation2 + $0x113] sm:$0xff]  ;;  %3684 = vmatpush.bf16.msra.mxu2 %v9917_v54  ;;  %3702 = vmatpush.bf16.msra.mxu3 %v9926_v32 }
 0x1d2   : > { %1292 = vst [vmem:[#allocation2 + $0x120] sm:$0xff] %v1213_v36  ;;  %v1427_v53 = vpack.c.bf16 %v1423_v49, %v1423_v49 }
 0x1d3   : > { %v904_v41 = vpop.f32.mrf.mxu0  ;;  %v11133_v43 = vpop.f32.mrf.mxu3 }
 0x1d4   : > { %v1052_v42 = vmul.f32 %v11065_v29, %v904_v41  ;;  %v1671_v0 = vunpack.c.l.b16 %v1427_v53  ;;  %v9925_v41 = vld [vmem:[%s14309_s4 + $0x3a8] sm:$0xff]  ;;  %v9924_v53 = vld [vmem:[%s14309_s4 + $0x3a0] sm:$0xff] }
 0x1d5   : > { %3685 = vmatpush.bf16.msra.mxu2 %v9916_v2  ;;  %3703 = vmatpush.bf16.msra.mxu3 %v9925_v41 }
 0x1d6   : > { %v1135_v50 = vadd.f32 %v11074_v35, %v1052_v42 }
 0x1d8   : > { %v1214_v52 = vmax.f32 %v1135_v50, 0.0  ;;  %3638 = vmatmul.bf16.gmra.mxu2 %v1664_v51 }
 0x1d9   : > { %v1424_v55 = vld [vmem:[#allocation2 + $0x11b] sm:$0xff]  ;;  %3686 = vmatpush.bf16.msra.mxu2 %v9915_v10  ;;  %3704 = vmatpush.bf16.msra.mxu3 %v9924_v53 }
 0x1da   : > { %1293 = vst [vmem:[#allocation2 + $0x128] sm:$0xff] %v1214_v52  ;;  %v1428_v57 = vpack.c.bf16 %v1424_v55, %v1424_v55 }
 0x1db   : > { %v907_v58 = vpop.f32.mrf.mxu0  ;;  %v3544_v62 = vpop.f32.mrf.mxu3 }
 0x1dc   : > { %v1053_v61 = vmul.f32 %v11065_v29, %v907_v58  ;;  %v1672_v1 = vunpack.c.l.b16 %v1428_v57  ;;  %v3545_v3 = vadd.f32 %v3544_v62, %v3526_v14  ;;  %v9923_v57 = vld [vmem:[%s14309_s4 + $0x398] sm:$0xff]  ;;  %v9793_v58 = vld [vmem:[%s10648_s30 + $0xe8] sm:$0xff] }
 0x1dd   : > { %v3558_v4 = vpop.f32.mrf.mxu1  ;;  %3687 = vmatpush.bf16.msra.mxu2 %v9914_v16  ;;  %3705 = vmatpush.bf16.msra.mxu3 %v9923_v57  ;;  %v9930_v57 = vld [vmem:[%s14309_s4 + $0x3d0] sm:$0xff] }
 0x1de   : > { %v1136_v5 = vadd.f32 %v11074_v35, %v1053_v61  ;;  %v11153_v6 = vadd.f32 %v3558_v4, %v3540_v31  ;;  %7347 = vmatmul.msk.bf16.gmra.mxu0 %vm675_vm2, %v9791_v56  ;;  %v1675_v7 = vpack.c.b16 %v1672_v1, %v1671_v0  ;;  %v9912_v31 = vld [vmem:[%s14309_s4 + $0x340] sm:$0xff]  ;;  %v9922_v4 = vld [vmem:[%s14309_s4 + $0x390] sm:$0xff] }
 0x1e0   : > { %v1215_v9 = vmax.f32 %v1136_v5, 0.0  ;;  %3652 = vmatmul.bf16.vlgmr.msrb.gmra.mxu3 %v1675_v7 }
 0x1e1   : > { %v1425_v13 = vld [vmem:[#allocation2 + $0x123] sm:$0xff]  ;;  %v1426_v14 = vld [vmem:[#allocation2 + $0x12b] sm:$0x1]  ;;  %3688 = vmatpush.bf16.msra.mxu2 %v9913_v23  ;;  %3706 = vmatpush.bf16.msra.mxu3 %v9922_v4  ;;  %v9795_v4 = vld [vmem:[%s10648_s30 + $0xf8] sm:$0xff] }
 0x1e2   : > { %1294 = vst [vmem:[#allocation2 + $0x130] sm:$0xff] %v1215_v9  ;;  %v1429_v19 = vpack.c.bf16 %v1425_v13, %v1425_v13  ;;  %v1430_v20 = vpack.c.bf16 %v1426_v14, %v1426_v14 }
 0x1e3   : > { %v909_v11 = vpop.f32.mrf.mxu0 }
 0x1e4   : > { %v1054_v15 = vmul.f32 %v11065_v29, %v909_v11  ;;  %v1673_v24 = vunpack.c.l.b16 %v1429_v19  ;;  %v1674_v25 = vunpack.c.l.b16 %v1430_v20  ;;  %v9921_v11 = vld [vmem:[%s14309_s4 + $0x388] sm:$0xff]  ;;  %v9920_v20 = vld [vmem:[%s14309_s4 + $0x380] sm:$0xff] }
 0x1e5   : > { %v11163_v17 = vpop.f32.mrf.mxu1  ;;  %3689 = vmatpush.bf16.msra.mxu2 %v9912_v31  ;;  %3707 = vmatpush.bf16.msra.mxu3 %v9921_v11  ;;  %v9794_v31 = vld [vmem:[%s10648_s30 + $0xf0] sm:$0xff] }
 0x1e6   : > { %v1137_v18 = vadd.f32 %v11074_v35, %v1054_v15  ;;  %v1676_v38 = vpack.c.b16 %v1674_v25, %v1673_v24 }
 0x1e8   : > { %v1216_v22 = vmax.f32 %v1137_v18, 0.0  ;;  %v11213_v18 = vpop.f32.mrf.mxu3 }
 0x1e9   : > { %v1431_v34 = vld [vmem:[#allocation2 + $0x12c] sm:$0xff]  ;;  %3708 = vmatpush.bf16.msra.mxu3 %v9920_v20 }
 0x1ea   : > { %1295 = vst [vmem:[#allocation2 + $0x138] sm:$0xff] %v1216_v22  ;;  %v1435_v40 = vpack.c.bf16 %v1431_v34, %v1431_v34  ;;  %v9934_v22 = vld [vmem:[%s14309_s4 + $0x3f0] sm:$0xff] }
 0x1eb   : > { %v912_v26 = vpop.f32.mrf.mxu0 }
 0x1ec   : > { %v1055_v30 = vmul.f32 %v11065_v29, %v912_v26  ;;  %v1683_v51 = vunpack.c.l.b16 %v1435_v40  ;;  %v9933_v26 = vld [vmem:[%s14309_s4 + $0x3e8] sm:$0xff] }
 0x1ed   : > { %v3563_v33 = vpop.f32.mrf.mxu1 }
 0x1ee   : > { %v1138_v36 = vadd.f32 %v11074_v35, %v1055_v30  ;;  %v11181_v37 = vadd.f32 %v3563_v33, %v3545_v3  ;;  %7348 = vmatmul.msk.bf16.gmra.mxu0 %vm675_vm2, %v9792_v21 }
 0x1f0   : > { %v1217_v39 = vmax.f32 %v1138_v36, 0.0  ;;  %3657 = vmatmul.bf16.gmra.mxu3 %v1676_v38 }
 0x1f1   : > { %v1432_v42 = vld [vmem:[#allocation2 + $0x134] sm:$0xff] }
 0x1f2   : > { %1296 = vst [vmem:[#allocation2 + $0x140] sm:$0xff] %v1217_v39  ;;  %v1436_v45 = vpack.c.bf16 %v1432_v42, %v1432_v42  ;;  %v9932_v42 = vld [vmem:[%s14309_s4 + $0x3e0] sm:$0xff] }
 0x1f3   : > { %v914_v49 = vpop.f32.mrf.mxu0 }
 0x1f4   : > { %v1056_v50 = vmul.f32 %v11065_v29, %v914_v49  ;;  %v1684_v52 = vunpack.c.l.b16 %v1436_v45 }
 0x1f6   : > { %v1139_v54 = vadd.f32 %v11074_v35, %v1056_v50  ;;  %v1687_v55 = vpack.c.b16 %v1684_v52, %v1683_v51  ;;  %v9943_v52 = vld [vmem:[%s14309_s4 + $0x438] sm:$0xff] }
 0x1f7   : > { %3739 = vmatpush.bf16.msrb.mxu2 %v9943_v52 }
 0x1f8   : > { %v1218_v56 = vmax.f32 %v1139_v54, 0.0  ;;  %3671 = vmatmul.bf16.vlgmr.msra.gmra.mxu1 %v1687_v55 }
 0x1f9   : > { %v1433_v0 = vld [vmem:[#allocation2 + $0x13c] sm:$0xff]  ;;  %v1434_v1 = vld [vmem:[#allocation2 + $0x144] sm:$0x1] }
 0x1fa   : > { %1297 = vst [vmem:[#allocation2 + $0x148] sm:$0xff] %v1218_v56  ;;  %v1437_v7 = vpack.c.bf16 %v1433_v0, %v1433_v0  ;;  %v1438_v9 = vpack.c.bf16 %v1434_v1, %v1434_v1 }
 0x1fb   : > { %v917_v61 = vpop.f32.mrf.mxu0  ;;  %v3577_v62 = vpop.f32.mrf.mxu2 }
 0x1fc   : > { %v1057_v2 = vmul.f32 %v11065_v29, %v917_v61  ;;  %v3578_v3 = vadd.f32 %v3577_v62, %v11153_v6  ;;  %v9935_v6 = vld [vmem:[%s14309_s4 + $0x3f8] sm:$0xff]  ;;  %v1685_v13 = vunpack.c.l.b16 %v1437_v7  ;;  %v1686_v14 = vunpack.c.l.b16 %v1438_v9 }
 0x1fd   : > { %3720 = vmatpush.bf16.msrb.mxu1 %v9935_v6  ;;  %v9928_v6 = vld [vmem:[%s14309_s4 + $0x3c0] sm:$0xff] }
 0x1fe   : > { %v1140_v5 = vadd.f32 %v11074_v35, %v1057_v2  ;;  %7349 = vmatmul.msk.bf16.gmra.mxu0 %vm675_vm2, %v9793_v58  ;;  %v1688_v21 = vpack.c.b16 %v1686_v14, %v1685_v13  ;;  %v9942_v58 = vld [vmem:[%s14309_s4 + $0x430] sm:$0xff]  ;;  %v9929_v2 = vld [vmem:[%s14309_s4 + $0x3c8] sm:$0xff]  ;;  %v9940_v13 = vld [vmem:[%s14309_s4 + $0x420] sm:$0xff] }
 0x1ff   : > { %3740 = vmatpush.bf16.msrb.mxu2 %v9942_v58 }
 0x200   : > { %v1219_v10 = vmax.f32 %v1140_v5, 0.0 }
 0x201   : > { %v1439_v23 = vld [vmem:[#allocation2 + $0x145] sm:$0xff]  ;;  %3721 = vmatpush.bf16.msrb.mxu1 %v9934_v22 }
 0x202   : > { %1298 = vst [vmem:[#allocation2 + $0x150] sm:$0xff] %v1219_v10  ;;  %v1443_v25 = vpack.c.bf16 %v1439_v23, %v1439_v23  ;;  %v9939_v23 = vld [vmem:[%s14309_s4 + $0x418] sm:$0xff] }
 0x203   : > { %v919_v15 = vpop.f32.mrf.mxu0  ;;  %v11211_v16 = vpop.f32.mrf.mxu2 }
 0x204   : > { %v1058_v19 = vmul.f32 %v11065_v29, %v919_v15  ;;  %v1695_v39 = vunpack.c.l.b16 %v1443_v25 }
 0x205   : > { %3722 = vmatpush.bf16.msrb.mxu1 %v9933_v26 }
 0x206   : > { %v1141_v28 = vadd.f32 %v11074_v35, %v1058_v19 }
 0x208   : > { %v1220_v24 = vmax.f32 %v1141_v28, 0.0  ;;  %3676 = vmatmul.bf16.gmra.mxu1 %v1688_v21 }
 0x209   : > { %v1440_v30 = vld [vmem:[#allocation2 + $0x14d] sm:$0xff]  ;;  %3723 = vmatpush.bf16.msrb.mxu1 %v9932_v42 }
 0x20a   : > { %1299 = vst [vmem:[#allocation2 + $0x158] sm:$0xff] %v1220_v24  ;;  %v1444_v32 = vpack.c.bf16 %v1440_v30, %v1440_v30 }
 0x20b   : > { %v922_v33 = vpop.f32.mrf.mxu0  ;;  %v3582_v34 = vpop.f32.mrf.mxu2 }
 0x20c   : > { %v1059_v36 = vmul.f32 %v11065_v29, %v922_v33  ;;  %v3583_v38 = vadd.f32 %v3582_v34, %v11181_v37  ;;  %v1696_v40 = vunpack.c.l.b16 %v1444_v32  ;;  %v3596_v41 = vpop.f32.mrf.mxu3  ;;  %v9931_v37 = vld [vmem:[%s14309_s4 + $0x3d8] sm:$0xff]  ;;  %v9938_v33 = vld [vmem:[%s14309_s4 + $0x410] sm:$0xff]  ;;  %v11275_v34 = vpop.f32.mrf.mxu1 }
 0x20d   : > { %v11232_v45 = vadd.f32 %v3596_v41, %v3578_v3  ;;  %3724 = vmatpush.bf16.msrb.mxu1 %v9931_v37  ;;  %v9941_v3 = vld [vmem:[%s14309_s4 + $0x428] sm:$0xff]  ;;  %v9936_v37 = vld [vmem:[%s14309_s4 + $0x400] sm:$0xff] }
 0x20e   : > { %v1142_v49 = vadd.f32 %v11074_v35, %v1059_v36  ;;  %7350 = vmatmul.msk.bf16.gmra.mxu0 %vm675_vm2, %v9794_v31  ;;  %v1699_v50 = vpack.c.b16 %v1696_v40, %v1695_v39  ;;  %3741 = vmatpush.bf16.msrb.mxu2 %v9941_v3  ;;  %v9937_v41 = vld [vmem:[%s14309_s4 + $0x408] sm:$0xff] }
 0x210   : > { %v1221_v51 = vmax.f32 %v1142_v49, 0.0  ;;  %3690 = vmatmul.bf16.vlgmr.msra.gmra.mxu2 %v1699_v50 }
 0x211   : > { %v1441_v54 = vld [vmem:[#allocation2 + $0x155] sm:$0xff]  ;;  %v1442_v55 = vld [vmem:[#allocation2 + $0x15d] sm:$0x1]  ;;  %3725 = vmatpush.bf16.msrb.mxu1 %v9930_v57 }
 0x212   : > { %1300 = vst [vmem:[#allocation2 + $0x160] sm:$0xff] %v1221_v51  ;;  %v1445_v62 = vpack.c.bf16 %v1441_v54, %v1441_v54  ;;  %v1446_v0 = vpack.c.bf16 %v1442_v55, %v1442_v55  ;;  %3742 = vmatpush.bf16.msrb.mxu2 %v9940_v13 }
 0x213   : > { %v924_v53 = vpop.f32.mrf.mxu0 }
 0x214   : > { %v1060_v56 = vmul.f32 %v11065_v29, %v924_v53  ;;  %v1697_v5 = vunpack.c.l.b16 %v1445_v62  ;;  %v1698_v7 = vunpack.c.l.b16 %v1446_v0  ;;  %v11257_v10 = vpop.f32.mrf.mxu3 }
 0x215   : > { %3726 = vmatpush.bf16.msrb.mxu1 %v9929_v2 }
 0x216   : > { %v1143_v61 = vadd.f32 %v11074_v35, %v1060_v56  ;;  %v1700_v19 = vpack.c.b16 %v1698_v7, %v1697_v5  ;;  %3743 = vmatpush.bf16.msrb.mxu2 %v9939_v23  ;;  %v9951_v7 = vld [vmem:[%s14309_s4 + $0x478] sm:$0xff] }
 0x217   : > { %3758 = vmatpush.bf16.msrb.mxu3 %v9951_v7 }
 0x218   : > { %v1222_v1 = vmax.f32 %v1143_v61, 0.0 }
 0x219   : > { %v1447_v14 = vld [vmem:[#allocation2 + $0x15e] sm:$0xff]  ;;  %3727 = vmatpush.bf16.msrb.mxu1 %v9928_v6 }
 0x21a   : > { %1301 = vst [vmem:[#allocation2 + $0x168] sm:$0xff] %v1222_v1  ;;  %v1451_v22 = vpack.c.bf16 %v1447_v14, %v1447_v14  ;;  %3744 = vmatpush.bf16.msrb.mxu2 %v9938_v33 }
 0x21b   : > { %v927_v9 = vpop.f32.mrf.mxu0 }
 0x21c   : > { %v1061_v11 = vmul.f32 %v11065_v29, %v927_v9  ;;  %v1707_v31 = vunpack.c.l.b16 %v1451_v22 }
 0x21e   : > { %v1144_v15 = vadd.f32 %v11074_v35, %v1061_v11  ;;  %7351 = vmatmul.msk.bf16.gmra.mxu0 %vm675_vm2, %v9795_v4  ;;  %3745 = vmatpush.bf16.msrb.mxu2 %v9937_v41  ;;  %v9797_v11 = vld [vmem:[%s10648_s30 + $0x108] sm:$0xff] }
 0x220   : > { %v1223_v20 = vmax.f32 %v1144_v15, 0.0  ;;  %3695 = vmatmul.bf16.gmra.mxu2 %v1700_v19 }
 0x221   : > { %v1448_v28 = vld [vmem:[#allocation2 + $0x166] sm:$0xff] }
 0x222   : > { %1302 = vst [vmem:[#allocation2 + $0x170] sm:$0xff] %v1223_v20  ;;  %v1452_v21 = vpack.c.bf16 %v1448_v28, %v1448_v28  ;;  %3746 = vmatpush.bf16.msrb.mxu2 %v9936_v37  ;;  %v9950_v20 = vld [vmem:[%s14309_s4 + $0x470] sm:$0xff] }
 0x223   : > { %v929_v24 = vpop.f32.mrf.mxu0  ;;  %v3601_v25 = vpop.f32.mrf.mxu3  ;;  %3759 = vmatpush.bf16.msrb.mxu3 %v9950_v20 }
 0x224   : > { %v1062_v26 = vmul.f32 %v11065_v29, %v929_v24  ;;  %v3602_v30 = vadd.f32 %v3601_v25, %v3583_v38  ;;  %v1708_v32 = vunpack.c.l.b16 %v1452_v21  ;;  %v9796_v38 = vld [vmem:[%s10648_s30 + $0x100] sm:$0xff]  ;;  %v9949_v25 = vld [vmem:[%s14309_s4 + $0x468] sm:$0xff] }
 0x226   : > { %v1145_v36 = vadd.f32 %v11074_v35, %v1062_v26  ;;  %v1711_v39 = vpack.c.b16 %v1708_v32, %v1707_v31  ;;  %v11306_v26 = vpop.f32.mrf.mxu2 }
 0x227   : > { %3760 = vmatpush.bf16.msrb.mxu3 %v9949_v25  ;;  %v9956_v25 = vld [vmem:[%s14309_s4 + $0x4a0] sm:$0xff] }
 0x228   : > { %v1224_v40 = vmax.f32 %v1145_v36, 0.0  ;;  %3709 = vmatmul.bf16.vlgmr.msra.gmra.mxu3 %v1711_v39 }
 0x229   : > { %v1449_v49 = vld [vmem:[#allocation2 + $0x16e] sm:$0xff]  ;;  %v1450_v50 = vld [vmem:[#allocation2 + $0x176] sm:$0x1] }
 0x22a   : > { %1303 = vst [vmem:[#allocation2 + $0x178] sm:$0xff] %v1224_v40  ;;  %v1453_v55 = vpack.c.bf16 %v1449_v49, %v1449_v49  ;;  %v1454_v56 = vpack.c.bf16 %v1450_v50, %v1450_v50  ;;  %v9947_v49 = vld [vmem:[%s14309_s4 + $0x458] sm:$0xff]  ;;  %v9798_v50 = vld [vmem:[%s10648_s30 + $0x110] sm:$0xff] }
 0x22b   : > { %v932_v42 = vpop.f32.mrf.mxu0 }
 0x22c   : > { %v1063_v51 = vmul.f32 %v11065_v29, %v932_v42  ;;  %v1709_v58 = vunpack.c.l.b16 %v1453_v55  ;;  %v1710_v61 = vunpack.c.l.b16 %v1454_v56 }
 0x22d   : > { %v3615_v52 = vpop.f32.mrf.mxu1 }
 0x22e   : > { %v1146_v53 = vadd.f32 %v11074_v35, %v1063_v51  ;;  %v3616_v54 = vadd.f32 %v3615_v52, %v11232_v45  ;;  %7352 = vmatmul.msk.bf16.gmra.mxu0 %vm675_vm2, %v9796_v38  ;;  %v1712_v4 = vpack.c.b16 %v1710_v61, %v1709_v58 }
 0x230   : > { %v1225_v57 = vmax.f32 %v1146_v53, 0.0 }
 0x231   : > { %v1455_v2 = vld [vmem:[#allocation2 + $0x177] sm:$0xff] }
 0x232   : > { %1304 = vst [vmem:[#allocation2 + $0x180] sm:$0xff] %v1225_v57  ;;  %v1459_v5 = vpack.c.bf16 %v1455_v2, %v1455_v2 }
 0x233   : > { %v934_v62 = vpop.f32.mrf.mxu0 }
 0x234   : > { %v1064_v0 = vmul.f32 %v11065_v29, %v934_v62  ;;  %v1719_v15 = vunpack.c.l.b16 %v1459_v5  ;;  %v9946_v62 = vld [vmem:[%s14309_s4 + $0x450] sm:$0xff] }
 0x235   : > { %v11290_v1 = vpop.f32.mrf.mxu1 }
 0x236   : > { %v1147_v3 = vadd.f32 %v11074_v35, %v1064_v0 }
 0x238   : > { %v1226_v45 = vmax.f32 %v1147_v3, 0.0  ;;  %3714 = vmatmul.bf16.gmra.mxu3 %v1712_v4 }
 0x239   : > { %v1456_v9 = vld [vmem:[#allocation2 + $0x17f] sm:$0xff] }
 0x23a   : > { %1305 = vst [vmem:[#allocation2 + $0x188] sm:$0xff] %v1226_v45  ;;  %v1460_v6 = vpack.c.bf16 %v1456_v9, %v1456_v9  ;;  %v9959_v45 = vld [vmem:[%s14309_s4 + $0x4b8] sm:$0xff] }
 0x23b   : > { %v937_v13 = vpop.f32.mrf.mxu0  ;;  %3777 = vmatpush.bf16.msra.mxu1 %v9959_v45 }
 0x23c   : > { %v1065_v14 = vmul.f32 %v11065_v29, %v937_v13  ;;  %v1720_v19 = vunpack.c.l.b16 %v1460_v6  ;;  %v9958_v6 = vld [vmem:[%s14309_s4 + $0x4b0] sm:$0xff] }
 0x23d   : > { %v3620_v22 = vpop.f32.mrf.mxu1 }
 0x23e   : > { %v1148_v23 = vadd.f32 %v11074_v35, %v1065_v14  ;;  %v3621_v28 = vadd.f32 %v3620_v22, %v3602_v30  ;;  %7353 = vmatmul.msk.bf16.gmra.mxu0 %vm675_vm2, %v9797_v11  ;;  %v1723_v21 = vpack.c.b16 %v1720_v19, %v1719_v15  ;;  %v9948_v30 = vld [vmem:[%s14309_s4 + $0x460] sm:$0xff]  ;;  %v9957_v15 = vld [vmem:[%s14309_s4 + $0x4a8] sm:$0xff]  ;;  %v9799_v19 = vld [vmem:[%s10648_s30 + $0x118] sm:$0xff] }
 0x23f   : > { %3761 = vmatpush.bf16.msrb.mxu3 %v9948_v30  ;;  %v9944_v11 = vld [vmem:[%s14309_s4 + $0x440] sm:$0xff]  ;;  %3778 = vmatpush.bf16.msra.mxu1 %v9958_v6 }
 0x240   : > { %v1227_v24 = vmax.f32 %v1148_v23, 0.0  ;;  %3728 = vmatmul.bf16.vlgmr.msrb.gmra.mxu1 %v1723_v21  ;;  %v11343_v23 = vpop.f32.mrf.mxu3 }
 0x241   : > { %v1457_v32 = vld [vmem:[#allocation2 + $0x187] sm:$0xff]  ;;  %v1458_v33 = vld [vmem:[#allocation2 + $0x18f] sm:$0x1] }
 0x242   : > { %v1461_v40 = vpack.c.bf16 %v1457_v32, %v1457_v32  ;;  %v1462_v41 = vpack.c.bf16 %v1458_v33, %v1458_v33  ;;  %v1467_v42 = vpack.c.bf16 %v1227_v24, %v1227_v24 }
 0x243   : > { %v939_v31 = vpop.f32.mrf.mxu0  ;;  %3762 = vmatpush.bf16.msrb.mxu3 %v9947_v49  ;;  %3779 = vmatpush.bf16.msra.mxu1 %v9957_v15  ;;  %v9954_v49 = vld [vmem:[%s14309_s4 + $0x490] sm:$0xff] }
 0x244   : > { %v1066_v36 = vmul.f32 %v11065_v29, %v939_v31  ;;  %v1721_v51 = vunpack.c.l.b16 %v1461_v40  ;;  %v1722_v37 = vunpack.c.l.b16 %v1462_v41  ;;  %v1731_v58 = vunpack.c.l.b16 %v1467_v42 }
 0x246   : > { %v1149_v39 = vadd.f32 %v11074_v35, %v1066_v36  ;;  %v1724_v2 = vpack.c.b16 %v1722_v37, %v1721_v51  ;;  %v9955_v36 = vld [vmem:[%s14309_s4 + $0x498] sm:$0xff] }
 0x247   : > { %3763 = vmatpush.bf16.msrb.mxu3 %v9946_v62  ;;  %3780 = vmatpush.bf16.msra.mxu1 %v9956_v25  ;;  %v9952_v62 = vld [vmem:[%s14309_s4 + $0x480] sm:$0xff] }
 0x248   : > { %v1228_v38 = vmax.f32 %v1149_v39, 0.0 }
 0x24a   : > { %v1468_v52 = vpack.c.bf16 %v1228_v38, %v1228_v38 }
 0x24b   : > { %v942_v53 = vpop.f32.mrf.mxu0  ;;  %v3634_v55 = vpop.f32.mrf.mxu2  ;;  %3781 = vmatpush.bf16.msra.mxu1 %v9955_v36  ;;  %v9963_v36 = vld [vmem:[%s14309_s4 + $0x4d8] sm:$0xff] }
 0x24c   : > { %v1067_v56 = vmul.f32 %v11065_v29, %v942_v53  ;;  %v3635_v57 = vadd.f32 %v3634_v55, %v3616_v54  ;;  %v1732_v61 = vunpack.c.l.b16 %v1468_v52  ;;  %v9945_v54 = vld [vmem:[%s14309_s4 + $0x448] sm:$0xff]  ;;  %v9967_v55 = vld [vmem:[%s14309_s4 + $0x4f8] sm:$0xff] }
 0x24d   : > { %3764 = vmatpush.bf16.msrb.mxu3 %v9945_v54  ;;  %v9953_v53 = vld [vmem:[%s14309_s4 + $0x488] sm:$0xff]  ;;  %3796 = vmatpush.bf16.msra.mxu2 %v9967_v55 }
 0x24e   : > { %v1150_v0 = vadd.f32 %v11074_v35, %v1067_v56  ;;  %7354 = vmatmul.msk.bf16.gmra.mxu0 %vm675_vm2, %v9798_v50  ;;  %v1735_v3 = vpack.c.b16 %v1732_v61, %v1731_v58  ;;  %v9800_v56 = vld [vmem:[%s10648_s30 + $0x120] sm:$0xff]  ;;  %v9961_v55 = vld [vmem:[%s14309_s4 + $0x4c8] sm:$0xff] }
 0x24f   : > { %3782 = vmatpush.bf16.msra.mxu1 %v9954_v49  ;;  %v9962_v49 = vld [vmem:[%s14309_s4 + $0x4d0] sm:$0xff] }
 0x250   : > { %v1229_v4 = vmax.f32 %v1150_v0, 0.0  ;;  %3733 = vmatmul.bf16.gmra.mxu1 %v1724_v2  ;;  %3747 = vmatmul.bf16.vlgmr.msrb.gmra.mxu2 %v1735_v3  ;;  %v9966_v0 = vld [vmem:[%s14309_s4 + $0x4f0] sm:$0xff]  ;;  %v11375_v2 = vpop.f32.mrf.mxu1 }
 0x251   : > { %3765 = vmatpush.bf16.msrb.mxu3 %v9944_v11  ;;  %3797 = vmatpush.bf16.msra.mxu2 %v9966_v0 }
 0x252   : > { %v1469_v33 = vpack.c.bf16 %v1229_v4, %v1229_v4 }
 0x253   : > { %v944_v5 = vpop.f32.mrf.mxu0  ;;  %v11329_v7 = vpop.f32.mrf.mxu2  ;;  %3783 = vmatpush.bf16.msra.mxu1 %v9953_v53 }
 0x254   : > { %v1068_v9 = vmul.f32 %v11065_v29, %v944_v5  ;;  %v1733_v38 = vunpack.c.l.b16 %v1469_v33  ;;  %v9965_v5 = vld [vmem:[%s14309_s4 + $0x4e8] sm:$0xff] }
 0x255   : > { %3798 = vmatpush.bf16.msra.mxu2 %v9965_v5 }
 0x256   : > { %v1151_v13 = vadd.f32 %v11074_v35, %v1068_v9 }
 0x257   : > { %3784 = vmatpush.bf16.msra.mxu1 %v9952_v62 }
 0x258   : > { %v1230_v14 = vmax.f32 %v1151_v13, 0.0 }
 0x25a   : > { %1309 = vst [vmem:[#allocation2 + $0x1a8] sm:$0xff] %v1230_v14 }
 0x25b   : > { %v947_v20 = vpop.f32.mrf.mxu0  ;;  %v3639_v22 = vpop.f32.mrf.mxu2 }
 0x25c   : > { %v1069_v21 = vmul.f32 %v11065_v29, %v947_v20  ;;  %v3640_v24 = vadd.f32 %v3639_v22, %v3621_v28  ;;  %v9964_v20 = vld [vmem:[%s14309_s4 + $0x4e0] sm:$0xff] }
 0x25d   : > { %3799 = vmatpush.bf16.msra.mxu2 %v9964_v20 }
 0x25e   : > { %v1152_v31 = vadd.f32 %v11074_v35, %v1069_v21  ;;  %7355 = vmatmul.msk.bf16.gmra.mxu0 %vm675_vm2, %v9799_v19 }
 0x260   : > { %v1231_v32 = vmax.f32 %v1152_v31, 0.0 }
 0x261   : > { %v1466_v30 = vld [vmem:[#allocation2 + $0x1a8] sm:$0x1]  ;;  %3800 = vmatpush.bf16.msra.mxu2 %v9963_v36  ;;  %v9972_v36 = vld [vmem:[%s14309_s4 + $0x520] sm:$0xff] }
 0x262   : > { %1310 = vst [vmem:[#allocation2 + $0x1b0] sm:$0xff] %v1231_v32  ;;  %v1470_v39 = vpack.c.bf16 %v1466_v30, %v1466_v30  ;;  %v9801_v30 = vld [vmem:[%s10648_s30 + $0x128] sm:$0xff] }
 0x263   : > { %v949_v28 = vpop.f32.mrf.mxu0  ;;  %v3653_v41 = vpop.f32.mrf.mxu3 }
 0x264   : > { %v1070_v40 = vmul.f32 %v11065_v29, %v949_v28  ;;  %v1734_v42 = vunpack.c.l.b16 %v1470_v39  ;;  %v3654_v50 = vadd.f32 %v3653_v41, %v3635_v57  ;;  %v10182_v39 = vld [vmem:[%s14312_s7 + $0x574] sm:$0xf] }
 0x265   : > { %3801 = vmatpush.bf16.msra.mxu2 %v9962_v49 }
 0x266   : > { %v1153_v51 = vadd.f32 %v11074_v35, %v1070_v40  ;;  %v1736_v37 = vpack.c.b16 %v1734_v42, %v1733_v38 }
 0x268   : > { %v1232_v52 = vmax.f32 %v1153_v51, 0.0  ;;  %3752 = vmatmul.bf16.gmra.mxu2 %v1736_v37 }
 0x269   : > { %v1471_v3 = vld [vmem:[#allocation2 + $0x1a9] sm:$0xff]  ;;  %3802 = vmatpush.bf16.msra.mxu2 %v9961_v55 }
 0x26a   : > { %1311 = vst [vmem:[#allocation2 + $0x1b8] sm:$0xff] %v1232_v52  ;;  %v1475_v45 = vpack.c.bf16 %v1471_v3, %v1471_v3  ;;  %v9960_v3 = vld [vmem:[%s14309_s4 + $0x4c0] sm:$0xff] }
 0x26b   : > { %v952_v58 = vpop.f32.mrf.mxu0  ;;  %v11367_v61 = vpop.f32.mrf.mxu3 }
 0x26c   : > { %v1071_v57 = vmul.f32 %v11065_v29, %v952_v58  ;;  %v1743_v15 = vunpack.c.l.b16 %v1475_v45 }
 0x26d   : > { %3803 = vmatpush.bf16.msra.mxu2 %v9960_v3 }
 0x26e   : > { %v1154_v4 = vadd.f32 %v11074_v35, %v1071_v57  ;;  %7356 = vmatmul.msk.bf16.gmra.mxu0 %vm675_vm2, %v9800_v56  ;;  %v9975_v56 = vld [vmem:[%s14309_s4 + $0x538] sm:$0xff] }
 0x26f   : > { %3815 = vmatpush.bf16.msra.mxu3 %v9975_v56 }
 0x270   : > { %v1233_v54 = vmax.f32 %v1154_v4, 0.0  ;;  %v9974_v4 = vld [vmem:[%s14309_s4 + $0x530] sm:$0xff] }
 0x271   : > { %v1472_v9 = vld [vmem:[#allocation2 + $0x1b1] sm:$0xff] }
 0x272   : > { %1312 = vst [vmem:[#allocation2 + $0x1c0] sm:$0xff] %v1233_v54  ;;  %v1476_v11 = vpack.c.bf16 %v1472_v9, %v1472_v9 }
 0x273   : > { %v954_v6 = vpop.f32.mrf.mxu0  ;;  %v3658_v14 = vpop.f32.mrf.mxu3  ;;  %3816 = vmatpush.bf16.msra.mxu3 %v9974_v4 }
 0x274   : > { %v1072_v13 = vmul.f32 %v11065_v29, %v954_v6  ;;  %v1744_v19 = vunpack.c.l.b16 %v1476_v11  ;;  %v3659_v22 = vadd.f32 %v3658_v14, %v3640_v24  ;;  %v8860_v24 = vld [vmem:[%s14312_s7 + $0x578] sm:$0xf0]  ;;  %v9973_v14 = vld [vmem:[%s14309_s4 + $0x528] sm:$0xff] }
 0x275   : > { %v3672_v21 = vpop.f32.mrf.mxu1  ;;  %v8863_v38 = vor.u32 %v10182_v39, %v8860_v24 }
 0x276   : > { %v1155_v25 = vadd.f32 %v11074_v35, %v1072_v13  ;;  %v11387_v31 = vadd.f32 %v3672_v21, %v3654_v50  ;;  %v1747_v32 = vpack.c.b16 %v1744_v19, %v1743_v15  ;;  %v9802_v19 = vld [vmem:[%s10648_s30 + $0x130] sm:$0xff]  ;;  %v11427_v21 = vpop.f32.mrf.mxu2 }
 0x277   : > { %6839 = vmatpush.bf16.msrb.mxu0 %v8863_v38  ;;  %3817 = vmatpush.bf16.msra.mxu3 %v9973_v14 }
 0x278   : > { %v1234_v33 = vmax.f32 %v1155_v25, 0.0  ;;  %3766 = vmatmul.bf16.vlgmr.msrb.gmra.mxu3 %v1747_v32 }
 0x279   : > { %v1473_v40 = vld [vmem:[#allocation2 + $0x1b9] sm:$0xff]  ;;  %v1474_v41 = vld [vmem:[#allocation2 + $0x1c1] sm:$0x1] }
 0x27a   : > { %1313 = vst [vmem:[#allocation2 + $0x1c8] sm:$0xff] %v1234_v33  ;;  %v1477_v37 = vpack.c.bf16 %v1473_v40, %v1473_v40  ;;  %v1478_v52 = vpack.c.bf16 %v1474_v41, %v1474_v41  ;;  %v437_v41 = vld [vmem:[%s10648_s30 + $0x138] sm:$0x1]  ;;  %s7074_s30 = scalar_lea.hbm %s14315_s10, %s9761_s26  ;;  %s10477_s26 = scalar_lea.hbm %s14315_s10, 4 }
 0x27b   : > { %v957_v28 = vpop.f32.mrf.mxu0  ;;  %3818 = vmatpush.bf16.msra.mxu3 %v9972_v36  ;;  %v605_v55 = vunpack.c.l.b16 %v437_v41  ;;  %s7078_s11 = sshll.u32 %s7074_s30, 4  ;;  %s7079_s11 = int_to_ptr.hbm [resolvable:$true] %s7078_s11 }
 0x27c   : > { %v1073_v42 = vmul.f32 %v11065_v29, %v957_v28  ;;  %v1745_v58 = vunpack.c.l.b16 %v1477_v37  ;;  %v1746_v57 = vunpack.c.l.b16 %v1478_v52  ;;  %v9971_v28 = vld [vmem:[%s14309_s4 + $0x518] sm:$0xff]  ;;  %v9970_v37 = vld [vmem:[%s14309_s4 + $0x510] sm:$0xff]  ;;  %v11452_v52 = vld [vmem:[%s14308_s3] ss:$0 sm:$0xff]  ;;  %s10471_s12 = sshra.s32 %s7079_s11, 4  ;;  %s10472_s12 = int_to_ptr.hbm [resolvable:$true] %s10471_s12 }
 0x27d   : > { %v11403_v50 = vpop.f32.mrf.mxu1  ;;  %s10473_s18 = scalar_lea.hbm %s10472_s12, 2  ;;  %p10478_p0 = scmp.lt.s32.totalorder %s10472_s12, %s14315_s10 }
 0x27e   : > { %v1156_v51 = vadd.f32 %v11074_v35, %v1073_v42  ;;  %7357 = vmatmul.msk.bf16.gmra.mxu0 %vm675_vm2, %v9801_v30  ;;  %v1748_v11 = vpack.c.b16 %v1746_v57, %v1745_v58  ;;  %p10474_p11 = scmp.ne.s32.totalorder %s10472_s12, %s10473_s18  ;;  %p10479_p1 = scmp.lt.s32.totalorder %s10477_s26, %s10473_s18 }
 0x27f   : > { %3819 = vmatpush.bf16.msra.mxu3 %v9971_v28 }
 0x280   : > { %v1235_v53 = vmax.f32 %v1156_v51, 0.0  ;;  %p10475_p12 = pnand %p10474_p11, %p10615_p5  ;;  %p10480_p2 = por %p10479_p1, %p10478_p0 }
 0x281   : > { %v1479_v45 = vld [vmem:[#allocation2 + $0x1c2] sm:$0xff] }
 0x282   : > { %1314 = vst [vmem:[#allocation2 + $0x1d0] sm:$0xff] %v1235_v53  ;;  %v1483_v13 = vpack.c.bf16 %v1479_v45, %v1479_v45  ;;  %p10476_p13 = pneg %p10475_p12 }
 0x283   : > { %v959_v62 = vpop.f32.mrf.mxu0  ;;  %3820 = vmatpush.bf16.msra.mxu3 %v9970_v37 }
 0x284   : > { %v1074_v0 = vmul.f32 %v11065_v29, %v959_v62  ;;  %v1755_v32 = vunpack.c.l.b16 %v1483_v13  ;;  %v9983_v62 = vld [vmem:[%s14309_s4 + $0x578] sm:$0xff]  ;;  %p10481_p3 = pnand %p10480_p2, %p10476_p13 }
 0x285   : > { %v3677_v54 = vpop.f32.mrf.mxu1  ;;  %3834 = vmatpush.bf16.msrb.mxu1 %v9983_v62 }
 0x286   : > { %v1157_v5 = vadd.f32 %v11074_v35, %v1074_v0  ;;  %v11421_v9 = vadd.f32 %v3677_v54, %v3659_v22  ;;  %v645_v0 = vpack.c.b16 %v605_v55, %v605_v55 }
 0x288   : > { %v1236_v6 = vmax.f32 %v1157_v5, 0.0  ;;  %3771 = vmatmul.bf16.gmra.mxu3 %v1748_v11  ;;  %v9968_v11 = vld [vmem:[%s14309_s4 + $0x500] sm:$0xff] }
 0x289   : > { %v1480_v15 = vld [vmem:[#allocation2 + $0x1ca] sm:$0xff] }
 0x28a   : > { %1315 = vst [vmem:[#allocation2 + $0x1d8] sm:$0xff] %v1236_v6  ;;  %v1484_v20 = vpack.c.bf16 %v1480_v15, %v1480_v15  ;;  %v9982_v6 = vld [vmem:[%s14309_s4 + $0x570] sm:$0xff] }
 0x28b   : > { %v962_v25 = vpop.f32.mrf.mxu0  ;;  %3835 = vmatpush.bf16.msrb.mxu1 %v9982_v6 }
 0x28c   : > { %v1075_v22 = vmul.f32 %v11065_v29, %v962_v25  ;;  %v1756_v33 = vunpack.c.l.b16 %v1484_v20  ;;  %v9981_v25 = vld [vmem:[%s14309_s4 + $0x568] sm:$0xff] }
 0x28e   : > { %v1158_v30 = vadd.f32 %v11074_v35, %v1075_v22  ;;  %7358 = vmatmul.msk.bf16.gmra.mxu0 %vm675_vm2, %v9802_v19  ;;  %v1759_v39 = vpack.c.b16 %v1756_v33, %v1755_v32  ;;  %v11442_v35 = vld [vmem:[%s14307_s2] ss:$0 sm:$0xff] }
 0x28f   : > { %3836 = vmatpush.bf16.msrb.mxu1 %v9981_v25 }
 0x290   : > { %v1237_v24 = vmax.f32 %v1158_v30, 0.0  ;;  %3785 = vmatmul.bf16.vlgmr.msra.gmra.mxu1 %v1759_v39  ;;  %v11475_v30 = vpop.f32.mrf.mxu3 }
 0x291   : > { %v1481_v38 = vld [vmem:[#allocation2 + $0x1d2] sm:$0xff]  ;;  %v1482_v42 = vld [vmem:[#allocation2 + $0x1da] sm:$0x1] }
 0x292   : > { %1316 = vst [vmem:[#allocation2 + $0x1e0] sm:$0xff] %v1237_v24  ;;  %v1485_v56 = vpack.c.bf16 %v1481_v38, %v1481_v38  ;;  %v1486_v58 = vpack.c.bf16 %v1482_v42, %v1482_v42 }
 0x293   : > { %v964_v29 = vpop.f32.mrf.mxu0  ;;  %v3691_v40 = vpop.f32.mrf.mxu2 }
 0x294   : > { %v1076_v49 = vmul.f32 %v11442_v35, %v964_v29  ;;  %v3692_v51 = vadd.f32 %v3691_v40, %v11387_v31  ;;  %v9969_v31 = vld [vmem:[%s14309_s4 + $0x508] sm:$0xff]  ;;  %v1757_v3 = vunpack.c.l.b16 %v1485_v56  ;;  %v1758_v4 = vunpack.c.l.b16 %v1486_v58  ;;  %v9980_v40 = vld [vmem:[%s14309_s4 + $0x560] sm:$0xff]  ;;  %v9978_v58 = vld [vmem:[%s14309_s4 + $0x550] sm:$0xff] }
 0x295   : > { %3821 = vmatpush.bf16.msra.mxu3 %v9969_v31  ;;  %3837 = vmatpush.bf16.msrb.mxu1 %v9980_v40 }
 0x296   : > { %v1159_v53 = vadd.f32 %v11452_v52, %v1076_v49  ;;  %v1760_v15 = vpack.c.b16 %v1758_v4, %v1757_v3  ;;  %v9979_v49 = vld [vmem:[%s14309_s4 + $0x558] sm:$0xff]  ;;  %v9977_v4 = vld [vmem:[%s14309_s4 + $0x548] sm:$0xff] }
 0x298   : > { %v1238_v57 = vmax.f32 %v1159_v53, 0.0 }
 0x299   : > { %v1487_v13 = vld [vmem:[#allocation2 + $0x1db] sm:$0xff]  ;;  %3822 = vmatpush.bf16.msra.mxu3 %v9968_v11  ;;  %3838 = vmatpush.bf16.msrb.mxu1 %v9979_v49 }
 0x29a   : > { %1317 = vst [vmem:[#allocation2 + $0x1e8] sm:$0xff] %v1238_v57  ;;  %v1491_v20 = vpack.c.bf16 %v1487_v13, %v1487_v13  ;;  %v9988_v49 = vld [vmem:[%s14309_s4 + $0x5a0] sm:$0xff] }
 0x29b   : > { %v967_v54 = vpop.f32.mrf.mxu0  ;;  %v11461_v45 = vpop.f32.mrf.mxu2 }
 0x29c   : > { %v1077_v5 = vmul.f32 %v11442_v35, %v967_v54  ;;  %v1767_v28 = vunpack.c.l.b16 %v1491_v20  ;;  %v9991_v54 = vld [vmem:[%s14309_s4 + $0x5b8] sm:$0xff] }
 0x29d   : > { %3839 = vmatpush.bf16.msrb.mxu1 %v9978_v58  ;;  %3853 = vmatpush.bf16.msrb.mxu2 %v9991_v54 }
 0x29e   : > { %v1160_v14 = vadd.f32 %v11452_v52, %v1077_v5  ;;  %7359 = vmatmul.msk.bf16.gmra.mxu0 %vm675_vm2, %v645_v0 }
 0x2a0   : > { %v1239_v19 = vmax.f32 %v1160_v14, 0.0  ;;  %3790 = vmatmul.bf16.gmra.mxu1 %v1760_v15  ;;  %v9976_v14 = vld [vmem:[%s14309_s4 + $0x540] sm:$0xff]  ;;  %v9990_v15 = vld [vmem:[%s14309_s4 + $0x5b0] sm:$0xff] }
 0x2a1   : > { %v1488_v22 = vld [vmem:[#allocation2 + $0x1e3] sm:$0xff]  ;;  %3840 = vmatpush.bf16.msrb.mxu1 %v9977_v4  ;;  %3854 = vmatpush.bf16.msrb.mxu2 %v9990_v15 }
 0x2a2   : > { %1318 = vst [vmem:[#allocation2 + $0x1f0] sm:$0xff] %v1239_v19  ;;  %v1492_v32 = vpack.c.bf16 %v1488_v22, %v1488_v22  ;;  %v11506_v19 = vpop.f32.mrf.mxu1 }
 0x2a3   : > { %v969_v33 = vpop.f32.mrf.mxu0  ;;  %v3696_v36 = vpop.f32.mrf.mxu2 }
 0x2a4   : > { %v1078_v39 = vmul.f32 %v11442_v35, %v969_v33  ;;  %v3697_v24 = vadd.f32 %v3696_v36, %v11421_v9  ;;  %v1768_v29 = vunpack.c.l.b16 %v1492_v32  ;;  %v9989_v36 = vld [vmem:[%s14309_s4 + $0x5a8] sm:$0xff] }
 0x2a5   : > { %3841 = vmatpush.bf16.msrb.mxu1 %v9976_v14  ;;  %3855 = vmatpush.bf16.msrb.mxu2 %v9989_v36  ;;  %v9999_v14 = vld [vmem:[%s14309_s4 + $0x5f8] sm:$0xff] }
 0x2a6   : > { %v1161_v41 = vadd.f32 %v11452_v52, %v1078_v39  ;;  %v1771_v38 = vpack.c.b16 %v1768_v29, %v1767_v28  ;;  %3872 = vmatpush.bf16.msrb.mxu3 %v9999_v14 }
 0x2a8   : > { %v1240_v42 = vmax.f32 %v1161_v41, 0.0  ;;  %3804 = vmatmul.bf16.vlgmr.msra.gmra.mxu2 %v1771_v38 }
 0x2a9   : > { %v1489_v53 = vld [vmem:[#allocation2 + $0x1eb] sm:$0xff]  ;;  %v1490_v9 = vld [vmem:[#allocation2 + $0x1f3] sm:$0x1]  ;;  %3856 = vmatpush.bf16.msrb.mxu2 %v9988_v49 }
 0x2aa   : > { %1319 = vst [vmem:[#allocation2 + $0x1f8] sm:$0xff] %v1240_v42  ;;  %v1493_v62 = vpack.c.bf16 %v1489_v53, %v1489_v53  ;;  %v1494_v0 = vpack.c.bf16 %v1490_v9, %v1490_v9 }
 0x2ab   : > { %v972_v37 = vpop.f32.mrf.mxu0  ;;  %v3710_v56 = vpop.f32.mrf.mxu3 }
 0x2ac   : > { %v1079_v55 = vmul.f32 %v11442_v35, %v972_v37  ;;  %v3711_v57 = vadd.f32 %v3710_v56, %v3692_v51  ;;  %v1769_v5 = vunpack.c.l.b16 %v1493_v62  ;;  %v1770_v11 = vunpack.c.l.b16 %v1494_v0 }
 0x2ae   : > { %v1162_v31 = vadd.f32 %v11452_v52, %v1079_v55  ;;  %v1772_v22 = vpack.c.b16 %v1770_v11, %v1769_v5 }
 0x2b0   : > { %v1241_v3 = vmax.f32 %v1162_v31, 0.0  ;;  %v9987_v31 = vld [vmem:[%s14309_s4 + $0x598] sm:$0xff] }
 0x2b1   : > { %v1495_v20 = vld [vmem:[#allocation2 + $0x1f4] sm:$0xff]  ;;  %3857 = vmatpush.bf16.msrb.mxu2 %v9987_v31 }
 0x2b2   : > { %1320 = vst [vmem:[#allocation2 + $0x200] sm:$0xff] %v1241_v3  ;;  %v1499_v33 = vpack.c.bf16 %v1495_v20, %v1495_v20 }
 0x2b3   : > { %v974_v6 = vpop.f32.mrf.mxu0  ;;  %v11498_v13 = vpop.f32.mrf.mxu3 }
 0x2b4   : > { %v1080_v51 = vmul.f32 %v11442_v35, %v974_v6  ;;  %v1779_v38 = vunpack.c.l.b16 %v1499_v33 }
 0x2b6   : > { %v1163_v25 = vadd.f32 %v11452_v52, %v1080_v51  ;;  %v9985_v51 = vld [vmem:[%s14309_s4 + $0x588] sm:$0xff] }
 0x2b8   : > { %v1242_v32 = vmax.f32 %v1163_v25, 0.0  ;;  %3809 = vmatmul.bf16.gmra.mxu2 %v1772_v22  ;;  %v10180_v25 = vld [vmem:[%s14312_s7 + $0x564] sm:$0xf]  ;;  %v8852_v22 = vld [vmem:[%s14312_s7 + $0x568] sm:$0xf0] }
 0x2b9   : > { %v1496_v39 = vld [vmem:[#allocation2 + $0x1fc] sm:$0xff]  ;;  %v8855_v33 = vor.u32 %v10180_v25, %v8852_v22  ;;  %v10006_v25 = vld [vmem:[%s14309_s4 + $0x630] sm:$0xff] }
 0x2ba   : > { %1321 = vst [vmem:[#allocation2 + $0x208] sm:$0xff] %v1242_v32  ;;  %v1500_v28 = vpack.c.bf16 %v1496_v39, %v1496_v39  ;;  %v9984_v39 = vld [vmem:[%s14309_s4 + $0x580] sm:$0xff] }
 0x2bb   : > { %v977_v29 = vpop.f32.mrf.mxu0  ;;  %v3715_v41 = vpop.f32.mrf.mxu3  ;;  %6840 = vmatpush.bf16.msrb.mxu0 %v8855_v33 }
 0x2bc   : > { %v1081_v40 = vmul.f32 %v11442_v35, %v977_v29  ;;  %v1780_v42 = vunpack.c.l.b16 %v1500_v28  ;;  %v3716_v37 = vadd.f32 %v3715_v41, %v3697_v24  ;;  %v9998_v28 = vld [vmem:[%s14309_s4 + $0x5f0] sm:$0xff] }
 0x2bd   : > { %v3729_v53 = vpop.f32.mrf.mxu1  ;;  %3873 = vmatpush.bf16.msrb.mxu3 %v9998_v28  ;;  %v10005_v28 = vld [vmem:[%s14309_s4 + $0x628] sm:$0xff] }
 0x2be   : > { %v1164_v9 = vadd.f32 %v11452_v52, %v1081_v40  ;;  %v11517_v55 = vadd.f32 %v3729_v53, %v3711_v57  ;;  %v1783_v56 = vpack.c.b16 %v1780_v42, %v1779_v38  ;;  %v9986_v57 = vld [vmem:[%s14309_s4 + $0x590] sm:$0xff] }
 0x2bf   : > { %3858 = vmatpush.bf16.msrb.mxu2 %v9986_v57 }
 0x2c0   : > { %v1243_v58 = vmax.f32 %v1164_v9, 0.0  ;;  %3823 = vmatmul.bf16.vlgmr.msra.gmra.mxu3 %v1783_v56  ;;  %v9997_v9 = vld [vmem:[%s14309_s4 + $0x5e8] sm:$0xff] }
 0x2c1   : > { %v1497_v0 = vld [vmem:[#allocation2 + $0x204] sm:$0xff]  ;;  %v1498_v3 = vld [vmem:[#allocation2 + $0x20c] sm:$0x1]  ;;  %3874 = vmatpush.bf16.msrb.mxu3 %v9997_v9 }
 0x2c2   : > { %1322 = vst [vmem:[#allocation2 + $0x210] sm:$0xff] %v1243_v58  ;;  %v1501_v5 = vpack.c.bf16 %v1497_v0, %v1497_v0  ;;  %v1502_v11 = vpack.c.bf16 %v1498_v3, %v1498_v3  ;;  %v9996_v3 = vld [vmem:[%s14309_s4 + $0x5e0] sm:$0xff] }
 0x2c3   : > { %v979_v62 = vpop.f32.mrf.mxu0  ;;  %3859 = vmatpush.bf16.msrb.mxu2 %v9985_v51 }
 0x2c4   : > { %v1082_v24 = vmul.f32 %v11442_v35, %v979_v62  ;;  %v1781_v15 = vunpack.c.l.b16 %v1501_v5  ;;  %v1782_v20 = vunpack.c.l.b16 %v1502_v11  ;;  %v9995_v5 = vld [vmem:[%s14309_s4 + $0x5d8] sm:$0xff] }
 0x2c5   : > { %v11526_v4 = vpop.f32.mrf.mxu1  ;;  %3875 = vmatpush.bf16.msrb.mxu3 %v9996_v3  ;;  %v10007_v11 = vld [vmem:[%s14309_s4 + $0x638] sm:$0xff] }
 0x2c6   : > { %v1165_v54 = vadd.f32 %v11452_v52, %v1082_v24  ;;  %v1784_v42 = vpack.c.b16 %v1782_v20, %v1781_v15  ;;  %3891 = vmatpush.bf16.msra.mxu1 %v10007_v11  ;;  %v9994_v20 = vld [vmem:[%s14309_s4 + $0x5d0] sm:$0xff] }
 0x2c7   : > { %3860 = vmatpush.bf16.msrb.mxu2 %v9984_v39  ;;  %v9993_v39 = vld [vmem:[%s14309_s4 + $0x5c8] sm:$0xff]  ;;  %v10002_v11 = vld [vmem:[%s14309_s4 + $0x610] sm:$0xff] }
 0x2c8   : > { %v1244_v6 = vmax.f32 %v1165_v54, 0.0 }
 0x2c9   : > { %v1503_v40 = vld [vmem:[#allocation2 + $0x20d] sm:$0xff]  ;;  %3876 = vmatpush.bf16.msrb.mxu3 %v9995_v5 }
 0x2ca   : > { %1323 = vst [vmem:[#allocation2 + $0x218] sm:$0xff] %v1244_v6  ;;  %v1507_v53 = vpack.c.bf16 %v1503_v40, %v1503_v40  ;;  %3892 = vmatpush.bf16.msra.mxu1 %v10006_v25 }
 0x2cb   : > { %v982_v32 = vpop.f32.mrf.mxu0 }
 0x2cc   : > { %v1083_v36 = vmul.f32 %v11442_v35, %v982_v32  ;;  %v1791_v0 = vunpack.c.l.b16 %v1507_v53  ;;  %v10004_v53 = vld [vmem:[%s14309_s4 + $0x620] sm:$0xff] }
 0x2cd   : > { %v3734_v29 = vpop.f32.mrf.mxu1  ;;  %3877 = vmatpush.bf16.msrb.mxu3 %v9994_v20 }
 0x2ce   : > { %v1166_v41 = vadd.f32 %v11452_v52, %v1083_v36  ;;  %v11549_v38 = vadd.f32 %v3734_v29, %v3716_v37  ;;  %3893 = vmatpush.bf16.msra.mxu1 %v10005_v28 }
 0x2d0   : > { %v1245_v49 = vmax.f32 %v1166_v41, 0.0  ;;  %3828 = vmatmul.bf16.gmra.mxu3 %v1784_v42 }
 0x2d1   : > { %v1504_v56 = vld [vmem:[#allocation2 + $0x215] sm:$0xff]  ;;  %3878 = vmatpush.bf16.msrb.mxu3 %v9993_v39 }
 0x2d2   : > { %1324 = vst [vmem:[#allocation2 + $0x220] sm:$0xff] %v1245_v49  ;;  %v1508_v58 = vpack.c.bf16 %v1504_v56, %v1504_v56  ;;  %v9992_v49 = vld [vmem:[%s14309_s4 + $0x5c0] sm:$0xff]  ;;  %3894 = vmatpush.bf16.msra.mxu1 %v10004_v53 }
 0x2d3   : > { %v984_v31 = vpop.f32.mrf.mxu0 }
 0x2d4   : > { %v1084_v62 = vmul.f32 %v11442_v35, %v984_v31  ;;  %v1792_v37 = vunpack.c.l.b16 %v1508_v58 }
 0x2d5   : > { %3879 = vmatpush.bf16.msrb.mxu3 %v9992_v49 }
 0x2d6   : > { %v1167_v24 = vadd.f32 %v11452_v52, %v1084_v62  ;;  %v1795_v57 = vpack.c.b16 %v1792_v37, %v1791_v0  ;;  %v10003_v0 = vld [vmem:[%s14309_s4 + $0x618] sm:$0xff] }
 0x2d7   : > { %3895 = vmatpush.bf16.msra.mxu1 %v10003_v0 }
 0x2d8   : > { %v1246_v54 = vmax.f32 %v1167_v24, 0.0  ;;  %3842 = vmatmul.bf16.vlgmr.msrb.gmra.mxu1 %v1795_v57 }
 0x2d9   : > { %v1505_v51 = vld [vmem:[#allocation2 + $0x21d] sm:$0xff]  ;;  %v1506_v14 = vld [vmem:[#allocation2 + $0x225] sm:$0x1] }
 0x2da   : > { %1325 = vst [vmem:[#allocation2 + $0x228] sm:$0xff] %v1246_v54  ;;  %v1509_v32 = vpack.c.bf16 %v1505_v51, %v1505_v51  ;;  %v1510_v33 = vpack.c.bf16 %v1506_v14, %v1506_v14 }
 0x2db   : > { %v987_v6 = vpop.f32.mrf.mxu0  ;;  %3896 = vmatpush.bf16.msra.mxu1 %v10002_v11 }
 0x2dc   : > { %v1085_v15 = vmul.f32 %v11442_v35, %v987_v6  ;;  %v1793_v29 = vunpack.c.l.b16 %v1509_v32  ;;  %v1794_v40 = vunpack.c.l.b16 %v1510_v33  ;;  %v10000_v33 = vld [vmem:[%s14309_s4 + $0x600] sm:$0xff] }
 0x2de   : > { %v1168_v22 = vadd.f32 %v11452_v52, %v1085_v15  ;;  %v1796_v58 = vpack.c.b16 %v1794_v40, %v1793_v29  ;;  %v10001_v15 = vld [vmem:[%s14309_s4 + $0x608] sm:$0xff] }
 0x2df   : > { %3897 = vmatpush.bf16.msra.mxu1 %v10001_v15 }
 0x2e0   : > { %v1247_v36 = vmax.f32 %v1168_v22, 0.0 }
 0x2e1   : > { %v1511_v9 = vld [vmem:[#allocation2 + $0x226] sm:$0xff] }
 0x2e2   : > { %1326 = vst [vmem:[#allocation2 + $0x230] sm:$0xff] %v1247_v36  ;;  %v1515_v62 = vpack.c.bf16 %v1511_v9, %v1511_v9 }
 0x2e3   : > { %v989_v41 = vpop.f32.mrf.mxu0  ;;  %3898 = vmatpush.bf16.msra.mxu1 %v10000_v33 }
 0x2e4   : > { %v1086_v42 = vmul.f32 %v11442_v35, %v989_v41  ;;  %v1803_v54 = vunpack.c.l.b16 %v1515_v62 }
 0x2e6   : > { %v1169_v56 = vadd.f32 %v11452_v52, %v1086_v42 }
 0x2e8   : > { %v1248_v31 = vmax.f32 %v1169_v56, 0.0  ;;  %3847 = vmatmul.bf16.gmra.mxu1 %v1796_v58 }
 0x2e9   : > { %v1512_v37 = vld [vmem:[#allocation2 + $0x22e] sm:$0xff] }
 0x2ea   : > { %1327 = vst [vmem:[#allocation2 + $0x238] sm:$0xff] %v1248_v31  ;;  %v1516_v3 = vpack.c.bf16 %v1512_v37, %v1512_v37 }
 0x2eb   : > { %v992_v24 = vpop.f32.mrf.mxu0 }
 0x2ec   : > { %v1087_v57 = vmul.f32 %v11442_v35, %v992_v24  ;;  %v1804_v5 = vunpack.c.l.b16 %v1516_v3 }
 0x2ee   : > { %v1170_v6 = vadd.f32 %v11452_v52, %v1087_v57  ;;  %v1807_v51 = vpack.c.b16 %v1804_v5, %v1803_v54 }
 0x2f0   : > { %v1249_v14 = vmax.f32 %v1170_v6, 0.0  ;;  %3861 = vmatmul.bf16.vlgmr.msrb.gmra.mxu2 %v1807_v51 }
 0x2f1   : > { %v1513_v25 = vld [vmem:[#allocation2 + $0x236] sm:$0xff]  ;;  %v1514_v22 = vld [vmem:[#allocation2 + $0x23e] sm:$0x1] }
 0x2f2   : > { %1328 = vst [vmem:[#allocation2 + $0x240] sm:$0xff] %v1249_v14  ;;  %v1517_v39 = vpack.c.bf16 %v1513_v25, %v1513_v25  ;;  %v1518_v28 = vpack.c.bf16 %v1514_v22, %v1514_v22 }
 0x2f3   : > { %v994_v20 = vpop.f32.mrf.mxu0 }
 0x2f4   : > { %v1088_v32 = vmul.f32 %v11442_v35, %v994_v20  ;;  %v1805_v40 = vunpack.c.l.b16 %v1517_v39  ;;  %v1806_v41 = vunpack.c.l.b16 %v1518_v28 }
 0x2f6   : > { %v1171_v36 = vadd.f32 %v11452_v52, %v1088_v32  ;;  %v1808_v56 = vpack.c.b16 %v1806_v41, %v1805_v40 }
 0x2f8   : > { %v1250_v29 = vmax.f32 %v1171_v36, 0.0 }
 0x2f9   : > { %v1519_v53 = vld [vmem:[#allocation2 + $0x23f] sm:$0xff] }
 0x2fa   : > { %1329 = vst [vmem:[#allocation2 + $0x248] sm:$0xff] %v1250_v29  ;;  %v1523_v31 = vpack.c.bf16 %v1519_v53, %v1519_v53  ;;  %v8844_v53 = vld [vmem:[%s14312_s7 + $0x558] sm:$0xf0] }
 0x2fb   : > { %v997_v42 = vpop.f32.mrf.mxu0 }
 0x2fc   : > { %v1089_v49 = vmul.f32 %v11442_v35, %v997_v42  ;;  %v1815_v24 = vunpack.c.l.b16 %v1523_v31 }
 0x2fe   : > { %v1172_v9 = vadd.f32 %v11452_v52, %v1089_v49  ;;  %v10178_v49 = vld [vmem:[%s14312_s7 + $0x554] sm:$0xf] }
 0x300   : > { %v1251_v58 = vmax.f32 %v1172_v9, 0.0  ;;  %3866 = vmatmul.bf16.gmra.mxu2 %v1808_v56  ;;  %v8847_v9 = vor.u32 %v10178_v49, %v8844_v53 }
 0x301   : > { %v1520_v62 = vld [vmem:[#allocation2 + $0x247] sm:$0xff] }
 0x302   : > { %1330 = vst [vmem:[#allocation2 + $0x250] sm:$0xff] %v1251_v58  ;;  %v1524_v0 = vpack.c.bf16 %v1520_v62, %v1520_v62  ;;  %6841 = vmatpush.bf16.msrb.mxu0 %v8847_v9  ;;  %v8210_v9 = vld [vmem:[%s14312_s7 + $0x60] sm:$0xf] }
 0x303   : > { %v999_v37 = vpop.f32.mrf.mxu0 }
 0x304   : > { %v1090_v3 = vmul.f32 %v11442_v35, %v999_v37  ;;  %v1816_v57 = vunpack.c.l.b16 %v1524_v0 }
 0x306   : > { %v1173_v54 = vadd.f32 %v11452_v52, %v1090_v3  ;;  %v1819_v5 = vpack.c.b16 %v1816_v57, %v1815_v24 }
 0x308   : > { %v1252_v11 = vmax.f32 %v1173_v54, 0.0  ;;  %3880 = vmatmul.bf16.vlgmr.msrb.gmra.mxu3 %v1819_v5 }
 0x309   : > { %v1521_v51 = vld [vmem:[#allocation2 + $0x24f] sm:$0xff]  ;;  %v1522_v14 = vld [vmem:[#allocation2 + $0x257] sm:$0x1] }
 0x30a   : > { %v1525_v25 = vpack.c.bf16 %v1521_v51, %v1521_v51  ;;  %v1526_v22 = vpack.c.bf16 %v1522_v14, %v1522_v14  ;;  %v1531_v33 = vpack.c.bf16 %v1252_v11, %v1252_v11 }
 0x30b   : > { %v1002_v6 = vpop.f32.mrf.mxu0 }
 0x30c   : > { %v1091_v15 = vmul.f32 %v11442_v35, %v1002_v6  ;;  %v1817_v36 = vunpack.c.l.b16 %v1525_v25  ;;  %v1818_v39 = vunpack.c.l.b16 %v1526_v22  ;;  %v1827_v41 = vunpack.c.l.b16 %v1531_v33  ;;  %v11623_v25 = vpop.f32.mrf.mxu1  ;;  %v10023_v33 = vld [vmem:[%s14312_s7 + $0x74] sm:$0xf0] }
 0x30e   : > { %v1174_v20 = vadd.f32 %v11452_v52, %v1091_v15  ;;  %v1820_v58 = vpack.c.b16 %v1818_v39, %v1817_v36  ;;  %v11619_v15 = vpop.f32.mrf.mxu2  ;;  %v8282_v36 = vld [vmem:[%s14312_s7 + $0xf0] sm:$0xf] }
 0x310   : > { %v1253_v32 = vmax.f32 %v1174_v20, 0.0  ;;  %v11621_v20 = vpop.f32.mrf.mxu3 }
 0x312   : > { %v1532_v28 = vpack.c.bf16 %v1253_v32, %v1253_v32  ;;  %v8218_v32 = vld [vmem:[%s14312_s7 + $0x70] sm:$0xf] }
 0x313   : > { %v1004_v29 = vpop.f32.mrf.mxu0 }
 0x314   : > { %v1092_v40 = vmul.f32 %v11442_v35, %v1004_v29  ;;  %v1828_v42 = vunpack.c.l.b16 %v1532_v28  ;;  %v8219_v29 = vor.u32 %v10023_v33, %v8218_v32  ;;  %v8330_v32 = vld [vmem:[%s14312_s7 + $0x150] sm:$0xf]  ;;  %v10051_v33 = vld [vmem:[%s14312_s7 + $0x154] sm:$0xf0] }
 0x316   : > { %v1175_v56 = vadd.f32 %v11452_v52, %v1092_v40  ;;  %v1831_v31 = vpack.c.b16 %v1828_v42, %v1827_v41  ;;  %v11625_v22 = vpop.f32.mrf.mxu2  ;;  %v10039_v40 = vld [vmem:[%s14312_s7 + $0xf4] sm:$0xf0]  ;;  %v8346_v41 = vld [vmem:[%s14312_s7 + $0x170] sm:$0xf]  ;;  %6384 = vmatpush.bf16.msra.mxu2 %v8219_v29  ;;  %v8331_v29 = vor.u32 %v10051_v33, %v8330_v32 }
 0x317   : > { %v10055_v42 = vld [vmem:[%s14312_s7 + $0x174] sm:$0xf0]  ;;  %v8283_v49 = vor.u32 %v10039_v40, %v8282_v36 }
 0x318   : > { %v1254_v62 = vmax.f32 %v1175_v56, 0.0  ;;  %3885 = vmatmul.bf16.gmra.mxu3 %v1820_v58  ;;  %3899 = vmatmul.bf16.vlgmr.msra.gmra.mxu1 %v1831_v31  ;;  %v8347_v53 = vor.u32 %v10055_v42, %v8346_v41  ;;  %v10021_v56 = vld [vmem:[%s14312_s7 + $0x64] sm:$0xf0]  ;;  %v8274_v58 = vld [vmem:[%s14312_s7 + $0xe0] sm:$0xf] }
 0x319   : > { %6397 = vmatpush.bf16.msra.mxu3 %v8283_v49  ;;  %v8211_v31 = vor.u32 %v10021_v56, %v8210_v9  ;;  %v8194_v41 = vld [vmem:[%s14312_s7 + $0x40] sm:$0xf]  ;;  %v10017_v42 = vld [vmem:[%s14312_s7 + $0x44] sm:$0xf0] }
 0x31a   : > { %v1533_v54 = vpack.c.bf16 %v1254_v62, %v1254_v62  ;;  %6410 = vmatpush.bf16.msrb.mxu1 %v8347_v53  ;;  %v10037_v62 = vld [vmem:[%s14312_s7 + $0xe4] sm:$0xf0]  ;;  %v8258_v49 = vld [vmem:[%s14312_s7 + $0xc0] sm:$0xf]  ;;  %v8195_v53 = vor.u32 %v10017_v42, %v8194_v41 }
 0x31b   : > { %v1007_v0 = vpop.f32.mrf.mxu0  ;;  %6385 = vmatpush.bf16.msra.mxu2 %v8211_v31  ;;  %v10033_v9 = vld [vmem:[%s14312_s7 + $0xc4] sm:$0xf0]  ;;  %v8322_v56 = vld [vmem:[%s14312_s7 + $0x140] sm:$0xf] }
 0x31c   : > { %v1093_v37 = vmul.f32 %v11442_v35, %v1007_v0  ;;  %v1829_v6 = vunpack.c.l.b16 %v1533_v54  ;;  %v11627_v35 = vpop.f32.mrf.mxu3  ;;  %v8338_v0 = vld [vmem:[%s14312_s7 + $0x160] sm:$0xf]  ;;  %v8202_v54 = vld [vmem:[%s14312_s7 + $0x50] sm:$0xf]  ;;  %v8259_v31 = vor.u32 %v10033_v9, %v8258_v49 }
 0x31d   : > { %v8242_v41 = vld [vmem:[%s14312_s7 + $0xa0] sm:$0xf] }
 0x31e   : > { %v1176_v3 = vadd.f32 %v11452_v52, %v1093_v37  ;;  %v11629_v52 = vpop.f32.mrf.mxu1  ;;  %v11640_v39 = vpop.f32.mrf.mxu2  ;;  %v10053_v37 = vld [vmem:[%s14312_s7 + $0x164] sm:$0xf0]  ;;  %v8306_v9 = vld [vmem:[%s14312_s7 + $0x120] sm:$0xf] }
 0x320   : > { %v1255_v24 = vmax.f32 %v1176_v3, 0.0  ;;  %v8275_v3 = vor.u32 %v10037_v62, %v8274_v58  ;;  %v10049_v58 = vld [vmem:[%s14312_s7 + $0x144] sm:$0xf0] }
 0x321   : > { %v8323_v62 = vor.u32 %v10049_v58, %v8322_v56  ;;  %v10045_v56 = vld [vmem:[%s14312_s7 + $0x124] sm:$0xf0] }
 0x322   : > { %1334 = vst [vmem:[#allocation2 + $0x270] sm:$0x1] %v1255_v24  ;;  %v8339_v24 = vor.u32 %v10053_v37, %v8338_v0  ;;  %6398 = vmatpush.bf16.msra.mxu3 %v8275_v3  ;;  %v8186_v0 = vld [vmem:[%s14312_s7 + $0x30] sm:$0xf]  ;;  %v10015_v37 = vld [vmem:[%s14312_s7 + $0x34] sm:$0xf0] }
 0x323   : > { %v1009_v57 = vpop.f32.mrf.mxu0  ;;  %v8250_v3 = vld [vmem:[%s14312_s7 + $0xb0] sm:$0xf] }
 0x324   : > { %v11642_v28 = vpop.f32.mrf.mxu3  ;;  %6411 = vmatpush.bf16.msrb.mxu1 %v8339_v24 }
 0x326   : > { %v11671_v57 = vpop.f32.mrf.mxu1 }
 0x328   : > { %6412 = vmatpush.bf16.msrb.mxu1 %v8331_v29  ;;  %v10013_v29 = vld [vmem:[%s14312_s7 + $0x24] sm:$0xf0] }
 0x329   : > { %v1530_v5 = vld [vmem:[#allocation2 + $0x270] sm:$0x1] }
 0x32a   : > { %v1534_v11 = vpack.c.bf16 %v1530_v5, %v1530_v5  ;;  %v10019_v5 = vld [vmem:[%s14312_s7 + $0x54] sm:$0xf0] }
 0x32c   : > { %v1830_v51 = vunpack.c.l.b16 %v1534_v11  ;;  %v8266_v11 = vld [vmem:[%s14312_s7 + $0xd0] sm:$0xf]  ;;  %v11693_v40 = vpop.f32.mrf.mxu3  ;;  %6413 = vmatpush.bf16.msrb.mxu1 %v8323_v62  ;;  %v10176_v62 = vld [vmem:[%s14312_s7 + $0x544] sm:$0xf] }
 0x32e   : > { %v1832_v14 = vpack.c.b16 %v1830_v51, %v1829_v6  ;;  %v11682_v6 = vpop.f32.mrf.mxu2  ;;  %v8203_v51 = vor.u32 %v10019_v5, %v8202_v54  ;;  %v11722_v24 = vpop.f32.mrf.mxu1  ;;  %v8187_v54 = vor.u32 %v10015_v37, %v8186_v0  ;;  %v10031_v5 = vld [vmem:[%s14312_s7 + $0xb4] sm:$0xf0]  ;;  %v8836_v0 = vld [vmem:[%s14312_s7 + $0x548] sm:$0xf0] }
 0x32f   : > { %v8839_v37 = vor.u32 %v10176_v62, %v8836_v0  ;;  %v8226_v62 = vld [vmem:[%s14312_s7 + $0x80] sm:$0xf] }
 0x330   : > { %3904 = vmatmul.bf16.gmra.mxu1 %v1832_v14  ;;  %v10035_v14 = vld [vmem:[%s14312_s7 + $0xd4] sm:$0xf0]  ;;  %6386 = vmatpush.bf16.msra.mxu2 %v8203_v51 }
 0x331   : > { %v8267_v36 = vor.u32 %v10035_v14, %v8266_v11  ;;  %v8314_v11 = vld [vmem:[%s14312_s7 + $0x130] sm:$0xf]  ;;  %v10047_v51 = vld [vmem:[%s14312_s7 + $0x134] sm:$0xf0]  ;;  %v8251_v14 = vor.u32 %v10031_v5, %v8250_v3  ;;  %6842 = vmatpush.bf16.msrb.mxu0 %v8839_v37 }
 0x332   : > { %v8315_v32 = vor.u32 %v10047_v51, %v8314_v11  ;;  %v8170_v3 = vld [vmem:[%s14312_s7 + $0x10] sm:$0xf]  ;;  %v10027_v51 = vld [vmem:[%s14312_s7 + $0x94] sm:$0xf0] }
 0x333   : > { %6399 = vmatpush.bf16.msra.mxu3 %v8267_v36  ;;  %v8178_v36 = vld [vmem:[%s14312_s7 + $0x20] sm:$0xf]  ;;  %v8234_v5 = vld [vmem:[%s14312_s7 + $0x90] sm:$0xf] }
 0x334   : > { %6387 = vmatpush.bf16.msra.mxu2 %v8195_v53  ;;  %6414 = vmatpush.bf16.msrb.mxu1 %v8315_v32  ;;  %v11744_v42 = vpop.f32.mrf.mxu3  ;;  %v8179_v49 = vor.u32 %v10013_v29, %v8178_v36  ;;  %v10029_v53 = vld [vmem:[%s14312_s7 + $0xa4] sm:$0xf0]  ;;  %v10043_v32 = vld [vmem:[%s14312_s7 + $0x114] sm:$0xf0]  ;;  %v8235_v36 = vor.u32 %v10027_v51, %v8234_v5 }
 0x335   : > { %v8243_v58 = vor.u32 %v10029_v53, %v8242_v41  ;;  %v10174_v41 = vld [vmem:[%s14312_s7 + $0x534] sm:$0xf]  ;;  %v10041_v5 = vld [vmem:[%s14312_s7 + $0x104] sm:$0xf0] }
 0x336   : > { %v11733_v33 = vpop.f32.mrf.mxu2  ;;  %v11785_v53 = vpop.f32.mrf.mxu1 }
 0x337   : > { %6400 = vmatpush.bf16.msra.mxu3 %v8259_v31  ;;  %v8307_v31 = vor.u32 %v10045_v56, %v8306_v9 }
 0x338   : > { %6388 = vmatpush.bf16.msra.mxu2 %v8187_v54  ;;  %v10011_v54 = vld [vmem:[%s14312_s7 + $0x14] sm:$0xf0] }
 0x339   : > { %6415 = vmatpush.bf16.msrb.mxu1 %v8307_v31  ;;  %v8171_v11 = vor.u32 %v10011_v54, %v8170_v3  ;;  %v10009_v31 = vld [vmem:[%s14312_s7 + $0x4] sm:$0xf0]  ;;  %v8290_v54 = vld [vmem:[%s14312_s7 + $0x100] sm:$0xf] }
 0x33a   : > { %v10025_v3 = vld [vmem:[%s14312_s7 + $0x84] sm:$0xf0]  ;;  %v8291_v51 = vor.u32 %v10041_v5, %v8290_v54  ;;  %v8812_v5 = vld [vmem:[%s14312_s7 + $0x518] sm:$0xf0] }
 0x33b   : > { %6401 = vmatpush.bf16.msra.mxu3 %v8251_v14  ;;  %v8298_v14 = vld [vmem:[%s14312_s7 + $0x110] sm:$0xf] }
 0x33c   : > { %6389 = vmatpush.bf16.msra.mxu2 %v8179_v49  ;;  %v8299_v29 = vor.u32 %v10043_v32, %v8298_v14  ;;  %v8828_v49 = vld [vmem:[%s14312_s7 + $0x538] sm:$0xf0]  ;;  %v10172_v14 = vld [vmem:[%s14312_s7 + $0x524] sm:$0xf]  ;;  %v8820_v32 = vld [vmem:[%s14312_s7 + $0x528] sm:$0xf0] }
 0x33d   : > { %v8831_v56 = vor.u32 %v10174_v41, %v8828_v49  ;;  %v10071_v41 = vld [vmem:[%s14312_s7 + $0x1f4] sm:$0xf0]  ;;  %v8474_v49 = vld [vmem:[%s14312_s7 + $0x270] sm:$0xf] }
 0x33e   : > { %v11787_v9 = vpop.f32.mrf.mxu2  ;;  %6416 = vmatpush.bf16.msrb.mxu1 %v8299_v29  ;;  %v8823_v29 = vor.u32 %v10172_v14, %v8820_v32 }
 0x33f   : > { %6402 = vmatpush.bf16.msra.mxu3 %v8243_v58  ;;  %v8162_v58 = vld [vmem:[%s14312_s7] sm:$0xf]  ;;  %6843 = vmatpush.bf16.msrb.mxu0 %v8831_v56  ;;  %v10087_v56 = vld [vmem:[%s14312_s7 + $0x274] sm:$0xf0] }
 0x340   : > { %6390 = vmatpush.bf16.msra.mxu2 %v8171_v11  ;;  %v8163_v37 = vor.u32 %v10009_v31, %v8162_v58  ;;  %v8227_v11 = vor.u32 %v10025_v3, %v8226_v62  ;;  %v8475_v31 = vor.u32 %v10087_v56, %v8474_v49  ;;  %v8538_v62 = vld [vmem:[%s14312_s7 + $0x2f0] sm:$0xf]  ;;  %v10170_v3 = vld [vmem:[%s14312_s7 + $0x514] sm:$0xf] }
 0x341   : > { %v8815_v14 = vor.u32 %v10170_v3, %v8812_v5  ;;  %v8804_v3 = vld [vmem:[%s14312_s7 + $0x508] sm:$0xf0] }
 0x342   : > { %6417 = vmatpush.bf16.msrb.mxu1 %v8291_v51  ;;  %v10069_v51 = vld [vmem:[%s14312_s7 + $0x1e4] sm:$0xf0] }
 0x343   : > { %6403 = vmatpush.bf16.msra.mxu3 %v8235_v36  ;;  %v11798_v0 = vpop.f32.mrf.mxu3  ;;  %v8410_v36 = vld [vmem:[%s14312_s7 + $0x1f0] sm:$0xf]  ;;  %6844 = vmatpush.bf16.msrb.mxu0 %v8823_v29  ;;  %v10085_v29 = vld [vmem:[%s14312_s7 + $0x264] sm:$0xf0] }
 0x344   : > { %6391 = vmatpush.bf16.msra.mxu2 %v8163_v37  ;;  %v8411_v58 = vor.u32 %v10071_v41, %v8410_v36  ;;  %v10103_v37 = vld [vmem:[%s14312_s7 + $0x2f4] sm:$0xf0]  ;;  %v8466_v36 = vld [vmem:[%s14312_s7 + $0x260] sm:$0xf] }
 0x345   : > { %v8539_v54 = vor.u32 %v10103_v37, %v8538_v62  ;;  %v8530_v41 = vld [vmem:[%s14312_s7 + $0x2e0] sm:$0xf]  ;;  %v8467_v56 = vor.u32 %v10085_v29, %v8466_v36  ;;  %v10168_v37 = vld [vmem:[%s14312_s7 + $0x504] sm:$0xf]  ;;  %v8522_v29 = vld [vmem:[%s14312_s7 + $0x2d0] sm:$0xf] }
 0x346   : > { %v11867_v5 = vpop.f32.mrf.mxu2 }
 0x347   : > { %6404 = vmatpush.bf16.msra.mxu3 %v8227_v11  ;;  %v8402_v11 = vld [vmem:[%s14312_s7 + $0x1e0] sm:$0xf]  ;;  %6449 = vmatpush.bf16.msra.mxu1 %v8539_v54  ;;  %v8807_v54 = vor.u32 %v10168_v37, %v8804_v3 }
 0x348   : > { %6423 = vmatpush.bf16.msrb.mxu2 %v8411_v58  ;;  %v8403_v32 = vor.u32 %v10069_v51, %v8402_v11  ;;  %v10101_v58 = vld [vmem:[%s14312_s7 + $0x2e4] sm:$0xf0]  ;;  %6845 = vmatpush.bf16.msrb.mxu0 %v8815_v14  ;;  %v8394_v11 = vld [vmem:[%s14312_s7 + $0x1d0] sm:$0xf]  ;;  %v10083_v14 = vld [vmem:[%s14312_s7 + $0x254] sm:$0xf0] }
 0x349   : > { %v8531_v62 = vor.u32 %v10101_v58, %v8530_v41  ;;  %v10099_v41 = vld [vmem:[%s14312_s7 + $0x2d4] sm:$0xf0] }
 0x34b   : > { %6436 = vmatpush.bf16.msrb.mxu3 %v8475_v31  ;;  %v3466_v31 = vadd.f32 %v10973_v63, %v10971_v60  ;;  %v10067_v60 = vld [vmem:[%s14312_s7 + $0x1d4] sm:$0xf0]  ;;  %v8458_v63 = vld [vmem:[%s14312_s7 + $0x250] sm:$0xf]  ;;  %v11888_v58 = vpop.f32.mrf.mxu3  ;;  %6450 = vmatpush.bf16.msra.mxu1 %v8531_v62  ;;  %v10065_v62 = vld [vmem:[%s14312_s7 + $0x1c4] sm:$0xf0] }
 0x34c   : > { %6424 = vmatpush.bf16.msrb.mxu2 %v8403_v32  ;;  %v8395_v36 = vor.u32 %v10067_v60, %v8394_v11  ;;  %v8459_v37 = vor.u32 %v10083_v14, %v8458_v63  ;;  %v10246_v32 = vld [vmem:[%s14312_s7 + $0x774] sm:$0xf]  ;;  %6846 = vmatpush.bf16.msrb.mxu0 %v8807_v54  ;;  %v8386_v11 = vld [vmem:[%s14312_s7 + $0x1c0] sm:$0xf] }
 0x34d   : > { %v3485_v51 = vadd.f32 %v11006_v44, %v3466_v31  ;;  %v8523_v44 = vor.u32 %v10099_v41, %v8522_v29  ;;  %v8450_v60 = vld [vmem:[%s14312_s7 + $0x240] sm:$0xf]  ;;  %v8387_v14 = vor.u32 %v10065_v62, %v8386_v11  ;;  %v10079_v62 = vld [vmem:[%s14312_s7 + $0x234] sm:$0xf0] }
 0x34e   : > { %v8514_v54 = vld [vmem:[%s14312_s7 + $0x2c0] sm:$0xf] }
 0x34f   : > { %6437 = vmatpush.bf16.msrb.mxu3 %v8467_v56  ;;  %v9116_v56 = vld [vmem:[%s14312_s7 + $0x778] sm:$0xf0]  ;;  %v3504_v31 = vadd.f32 %v11036_v8, %v3485_v51  ;;  %v10081_v8 = vld [vmem:[%s14312_s7 + $0x244] sm:$0xf0]  ;;  %6451 = vmatpush.bf16.msra.mxu1 %v8523_v44  ;;  %v8378_v44 = vld [vmem:[%s14312_s7 + $0x1b0] sm:$0xf] }
 0x350   : > { %v9119_v3 = vor.u32 %v10246_v32, %v9116_v56  ;;  %6425 = vmatpush.bf16.msrb.mxu2 %v8395_v36  ;;  %v10097_v51 = vld [vmem:[%s14312_s7 + $0x2c4] sm:$0xf0]  ;;  %v8451_v29 = vor.u32 %v10081_v8, %v8450_v60  ;;  %v9108_v36 = vld [vmem:[%s14312_s7 + $0x768] sm:$0xf0]  ;;  %v8506_v60 = vld [vmem:[%s14312_s7 + $0x2b0] sm:$0xf] }
 0x351   : > { %v3523_v63 = vadd.f32 %v11094_v59, %v3504_v31  ;;  %v8515_v41 = vor.u32 %v10097_v51, %v8514_v54  ;;  %v10244_v59 = vld [vmem:[%s14312_s7 + $0x764] sm:$0xf]  ;;  %v10063_v31 = vld [vmem:[%s14312_s7 + $0x1b4] sm:$0xf0]  ;;  %v10242_v8 = vld [vmem:[%s14312_s7 + $0x754] sm:$0xf] }
 0x352   : > { %6891 = vmatpush.bf16.msra.mxu0 %v9119_v3  ;;  %v9111_v32 = vor.u32 %v10244_v59, %v9108_v36  ;;  %v8379_v11 = vor.u32 %v10063_v31, %v8378_v44  ;;  %v9100_v54 = vld [vmem:[%s14312_s7 + $0x758] sm:$0xf0]  ;;  %v10077_v31 = vld [vmem:[%s14312_s7 + $0x224] sm:$0xf0] }
 0x353   : > { %6438 = vmatpush.bf16.msrb.mxu3 %v8459_v37  ;;  %v3542_v37 = vadd.f32 %v11133_v43, %v3523_v63  ;;  %v8442_v43 = vld [vmem:[%s14312_s7 + $0x230] sm:$0xf]  ;;  %v11941_v63 = vpop.f32.mrf.mxu2  ;;  %6452 = vmatpush.bf16.msra.mxu1 %v8515_v41  ;;  %v9103_v59 = vor.u32 %v10242_v8, %v9100_v54  ;;  %v11953_v36 = vpop.f32.mrf.mxu3  ;;  %v8370_v41 = vld [vmem:[%s14312_s7 + $0x1a0] sm:$0xf]  ;;  %v10059_v54 = vld [vmem:[%s14312_s7 + $0x194] sm:$0xf0] }
 0x354   : > { %6426 = vmatpush.bf16.msrb.mxu2 %v8387_v14  ;;  %v10095_v14 = vld [vmem:[%s14312_s7 + $0x2b4] sm:$0xf0]  ;;  %v8362_v8 = vld [vmem:[%s14312_s7 + $0x190] sm:$0xf] }
 0x355   : > { %v11854_v49 = vpop.f32.mrf.mxu1  ;;  %v3561_v3 = vadd.f32 %v11163_v17, %v3542_v37  ;;  %v8443_v17 = vor.u32 %v10079_v62, %v8442_v43  ;;  %v10061_v37 = vld [vmem:[%s14312_s7 + $0x1a4] sm:$0xf0] }
 0x356   : > { %6892 = vmatpush.bf16.msra.mxu0 %v9111_v32  ;;  %v8434_v32 = vld [vmem:[%s14312_s7 + $0x220] sm:$0xf]  ;;  %v10093_v43 = vld [vmem:[%s14312_s7 + $0x2a4] sm:$0xf0] }
 0x357   : > { %6439 = vmatpush.bf16.msrb.mxu3 %v8451_v29  ;;  %v3580_v51 = vadd.f32 %v11211_v16, %v3561_v3  ;;  %v8507_v29 = vor.u32 %v10095_v14, %v8506_v60  ;;  %v8371_v16 = vor.u32 %v10061_v37, %v8370_v41  ;;  %v8498_v3 = vld [vmem:[%s14312_s7 + $0x2a0] sm:$0xf]  ;;  %v8435_v62 = vor.u32 %v10077_v31, %v8434_v32  ;;  %v8490_v41 = vld [vmem:[%s14312_s7 + $0x290] sm:$0xf]  ;;  %v10091_v37 = vld [vmem:[%s14312_s7 + $0x294] sm:$0xf0] }
 0x358   : > { %6427 = vmatpush.bf16.msrb.mxu2 %v8379_v11  ;;  %v8499_v60 = vor.u32 %v10093_v43, %v8498_v3  ;;  %v9092_v11 = vld [vmem:[%s14312_s7 + $0x748] sm:$0xf0]  ;;  %v9084_v31 = vld [vmem:[%s14312_s7 + $0x738] sm:$0xf0] }
 0x359   : > { %v3599_v44 = vadd.f32 %v11257_v10, %v3580_v51  ;;  %6453 = vmatpush.bf16.msra.mxu1 %v8507_v29  ;;  %v10240_v10 = vld [vmem:[%s14312_s7 + $0x744] sm:$0xf]  ;;  %v8426_v51 = vld [vmem:[%s14312_s7 + $0x210] sm:$0xf] }
 0x35a   : > { %6893 = vmatpush.bf16.msra.mxu0 %v9103_v59  ;;  %v9095_v14 = vor.u32 %v10240_v10, %v9092_v11  ;;  %v8363_v59 = vor.u32 %v10059_v54, %v8362_v8  ;;  %v10057_v10 = vld [vmem:[%s14312_s7 + $0x184] sm:$0xf0]  ;;  %v8418_v11 = vld [vmem:[%s14312_s7 + $0x200] sm:$0xf] }
 0x35b   : > { %6440 = vmatpush.bf16.msrb.mxu3 %v8443_v17  ;;  %v3618_v17 = vadd.f32 %v11290_v1, %v3599_v44  ;;  %v10075_v1 = vld [vmem:[%s14312_s7 + $0x214] sm:$0xf0]  ;;  %v8491_v44 = vor.u32 %v10091_v37, %v8490_v41  ;;  %v10073_v8 = vld [vmem:[%s14312_s7 + $0x204] sm:$0xf0]  ;;  %v8482_v54 = vld [vmem:[%s14312_s7 + $0x280] sm:$0xf] }
 0x35c   : > { %6428 = vmatpush.bf16.msrb.mxu2 %v8371_v16  ;;  %v10238_v16 = vld [vmem:[%s14312_s7 + $0x734] sm:$0xf] }
 0x35d   : > { %v11923_v56 = vpop.f32.mrf.mxu1  ;;  %v3637_v29 = vadd.f32 %v11329_v7, %v3618_v17  ;;  %6454 = vmatpush.bf16.msra.mxu1 %v8499_v60  ;;  %v8427_v7 = vor.u32 %v10075_v1, %v8426_v51  ;;  %v9087_v43 = vor.u32 %v10238_v16, %v9084_v31  ;;  %v8354_v60 = vld [vmem:[%s14312_s7 + $0x180] sm:$0xf]  ;;  %v10089_v51 = vld [vmem:[%s14312_s7 + $0x284] sm:$0xf0]  ;;  %v9076_v1 = vld [vmem:[%s14312_s7 + $0x728] sm:$0xf0] }
 0x35e   : > { %6894 = vmatpush.bf16.msra.mxu0 %v9095_v14  ;;  %v8355_v14 = vor.u32 %v10057_v10, %v8354_v60  ;;  %v10234_v16 = vld [vmem:[%s14312_s7 + $0x714] sm:$0xf]  ;;  %v9068_v31 = vld [vmem:[%s14312_s7 + $0x718] sm:$0xf0] }
 0x35f   : > { %6441 = vmatpush.bf16.msrb.mxu3 %v8435_v62  ;;  %v3656_v3 = vadd.f32 %v11367_v61, %v3637_v29  ;;  %v12009_v62 = vpop.f32.mrf.mxu2  ;;  %v3749_v61 = vadd.f32 %v11625_v22, %v11517_v55  ;;  %v12034_v29 = vpop.f32.mrf.mxu3  ;;  %v8419_v55 = vor.u32 %v10073_v8, %v8418_v11  ;;  %v8483_v22 = vor.u32 %v10089_v51, %v8482_v54  ;;  %v9060_v11 = vld [vmem:[%s14312_s7 + $0x708] sm:$0xf0] }
 0x360   : > { %6429 = vmatpush.bf16.msrb.mxu2 %v8363_v59  ;;  %v10236_v59 = vld [vmem:[%s14312_s7 + $0x724] sm:$0xf] }
 0x361   : > { %v3675_v17 = vadd.f32 %v11403_v50, %v3656_v3  ;;  %v3471_v50 = vadd.f32 %v11060_v27, %v11014_v47  ;;  %6455 = vmatpush.bf16.msra.mxu1 %v8491_v44  ;;  %v3768_v37 = vadd.f32 %v11627_v35, %v3749_v61  ;;  %v9071_v35 = vor.u32 %v10234_v16, %v9068_v31 }
 0x362   : > { %6895 = vmatpush.bf16.msra.mxu0 %v9087_v43 }
 0x363   : > { %6442 = vmatpush.bf16.msrb.mxu3 %v8427_v7  ;;  %v3694_v41 = vadd.f32 %v11461_v45, %v3675_v17  ;;  %v9079_v7 = vor.u32 %v10236_v59, %v9076_v1  ;;  %v3490_v47 = vadd.f32 %v11108_v12, %v3471_v50  ;;  %v3787_v44 = vadd.f32 %v11629_v52, %v3768_v37 }
 0x364   : > { %6430 = vmatpush.bf16.msrb.mxu2 %v8355_v14 }
 0x365   : > { %v12000_v32 = vpop.f32.mrf.mxu1  ;;  %v3713_v27 = vadd.f32 %v11498_v13, %v3694_v41  ;;  %v3509_v45 = vadd.f32 %v11141_v48, %v3490_v47  ;;  %6456 = vmatpush.bf16.msra.mxu1 %v8483_v22  ;;  %v3806_v13 = vadd.f32 %v11787_v9, %v3787_v44  ;;  %v10232_v48 = vld [vmem:[%s14312_s7 + $0x704] sm:$0xf] }
 0x366   : > { %6896 = vmatpush.bf16.msra.mxu0 %v9079_v7 }
 0x367   : > { %6443 = vmatpush.bf16.msrb.mxu3 %v8419_v55  ;;  %v3732_v12 = vadd.f32 %v11526_v4, %v3713_v27  ;;  %v3528_v52 = vadd.f32 %v11187_v46, %v3509_v45  ;;  %v3825_v10 = vadd.f32 %v11798_v0, %v3806_v13  ;;  %v9063_v46 = vor.u32 %v10232_v48, %v9060_v11 }
 0x369   : > { %v3751_v60 = vadd.f32 %v11640_v39, %v3732_v12  ;;  %v3547_v4 = vadd.f32 %v11213_v18, %v3528_v52  ;;  %v3844_v61 = vadd.f32 %v11854_v49, %v3825_v10  ;;  %v12077_v18 = vld [vmem:[%s14310_s5] ss:$0 sm:$0xff] }
 0x36a   : > { %6897 = vmatpush.bf16.msra.mxu0 %v9071_v35  ;;  %v10151_v35 = vld [vmem:[%s14312_s7 + $0x474] sm:$0xf0]  ;;  %v8594_v52 = vld [vmem:[%s14312_s7 + $0x360] sm:$0xf] }
 0x36b   : > { %v3770_v17 = vadd.f32 %v11642_v28, %v3751_v60  ;;  %v3566_v39 = vadd.f32 %v11275_v34, %v3547_v4 }
 0x36d   : > { %v12057_v3 = vpop.f32.mrf.mxu1  ;;  %v3789_v0 = vadd.f32 %v11671_v57, %v3770_v17  ;;  %v3585_v8 = vadd.f32 %v11306_v26, %v3566_v39  ;;  %v12084_v57 = vld [vmem:[%s14311_s6] ss:$0 sm:$0xff] }
 0x36e   : > { %6898 = vmatpush.bf16.msra.mxu0 %v9063_v46 }
 0x36f   : > { %v3808_v54 = vadd.f32 %v11867_v5, %v3789_v0  ;;  %v3604_v28 = vadd.f32 %v11343_v23, %v3585_v8  ;;  %v10133_v0 = vld [vmem:[%s14312_s7 + $0x3e4] sm:$0xf0] }
 0x370   : > { %v10149_v8 = vld [vmem:[%s14312_s7 + $0x464] sm:$0xf0] }
 0x371   : > { %v3827_v49 = vadd.f32 %v11888_v58, %v3808_v54  ;;  %v3623_v26 = vadd.f32 %v11375_v2, %v3604_v28  ;;  %v3754_v2 = vadd.f32 %v11682_v6, %v11549_v38  ;;  %v10119_v38 = vld [vmem:[%s14312_s7 + $0x374] sm:$0xf0]  ;;  %v8586_v28 = vld [vmem:[%s14312_s7 + $0x350] sm:$0xf] }
 0x373   : > { %v3862_v43 = vpop.f32.mrf.mxu2  ;;  %v3846_v55 = vadd.f32 %v11923_v56, %v3827_v49  ;;  %v3642_v59 = vadd.f32 %v11427_v21, %v3623_v26  ;;  %v3773_v21 = vadd.f32 %v11693_v40, %v3754_v2  ;;  %v10131_v26 = vld [vmem:[%s14312_s7 + $0x3d4] sm:$0xf0] }
 0x374   : > { %v3863_v14 = vadd.f32 %v3862_v43, %v3844_v61  ;;  %v10117_v61 = vld [vmem:[%s14312_s7 + $0x364] sm:$0xf0] }
 0x375   : > { %v3661_v58 = vadd.f32 %v11475_v30, %v3642_v59  ;;  %v3792_v30 = vadd.f32 %v11722_v24, %v3773_v21  ;;  %v8730_v24 = vld [vmem:[%s14312_s7 + $0x470] sm:$0xf] }
 0x376   : > { %v8731_v17 = vor.u32 %v10151_v35, %v8730_v24  ;;  %v8714_v59 = vld [vmem:[%s14312_s7 + $0x450] sm:$0xf] }
 0x377   : > { %v3680_v47 = vadd.f32 %v11506_v19, %v3661_v58  ;;  %v8602_v19 = vld [vmem:[%s14312_s7 + $0x370] sm:$0xf]  ;;  %v3811_v40 = vadd.f32 %v11941_v63, %v3792_v30  ;;  %v9364_v30 = vld [vmem:[%s14312_s7 + $0x968] sm:$0xf0] }
 0x378   : > { %v8603_v48 = vor.u32 %v10119_v38, %v8602_v19  ;;  %v8706_v38 = vld [vmem:[%s14312_s7 + $0x440] sm:$0xf]  ;;  %v8570_v35 = vld [vmem:[%s14312_s7 + $0x330] sm:$0xf] }
 0x379   : > { %v3699_v44 = vadd.f32 %v11619_v15, %v3680_v47  ;;  %v8666_v15 = vld [vmem:[%s14312_s7 + $0x3f0] sm:$0xf] }
 0x37b   : > { %v3864_v5 = vpop.f32.mrf.mxu2  ;;  %v3718_v31 = vadd.f32 %v11621_v20, %v3699_v44  ;;  %v10135_v20 = vld [vmem:[%s14312_s7 + $0x3f4] sm:$0xf0] }
 0x37c   : > { %v3865_v23 = vadd.f32 %v3864_v5, %v3846_v55  ;;  %v8667_v11 = vor.u32 %v10135_v20, %v8666_v15  ;;  %v10310_v5 = vld [vmem:[%s14312_s7 + $0x974] sm:$0xf]  ;;  %v9372_v55 = vld [vmem:[%s14312_s7 + $0x978] sm:$0xf0]  ;;  %v10145_v15 = vld [vmem:[%s14312_s7 + $0x444] sm:$0xf0] }
 0x37d   : > { %v3737_v6 = vadd.f32 %v11623_v25, %v3718_v31  ;;  %v3830_v25 = vadd.f32 %v11953_v36, %v3811_v40  ;;  %v9375_v2 = vor.u32 %v10310_v5, %v9372_v55  ;;  %v10308_v31 = vld [vmem:[%s14312_s7 + $0x964] sm:$0xf]  ;;  %v8690_v5 = vld [vmem:[%s14312_s7 + $0x420] sm:$0xf]  ;;  %v10141_v55 = vld [vmem:[%s14312_s7 + $0x424] sm:$0xf0] }
 0x37e   : > { %v9367_v24 = vor.u32 %v10308_v31, %v9364_v30  ;;  %v8546_v30 = vld [vmem:[%s14312_s7 + $0x300] sm:$0xf] }
 0x37f   : > { %v3756_v43 = vadd.f32 %v11733_v33, %v3737_v6  ;;  %v8658_v33 = vld [vmem:[%s14312_s7 + $0x3e0] sm:$0xf]  ;;  %v3849_v54 = vadd.f32 %v12000_v32, %v3830_v25  ;;  %v8650_v32 = vld [vmem:[%s14312_s7 + $0x3d0] sm:$0xf]  ;;  %v8707_v25 = vor.u32 %v10145_v15, %v8706_v38 }
 0x381   : > { %v3775_v36 = vadd.f32 %v11744_v42, %v3756_v43 }
 0x383   : > { %v3867_v12 = vpop.f32.mrf.mxu2  ;;  %v3794_v42 = vadd.f32 %v11785_v53, %v3775_v36  ;;  %v8659_v53 = vor.u32 %v10133_v0, %v8658_v33 }
 0x384   : > { %v3868_v49 = vadd.f32 %v3867_v12, %v3849_v54  ;;  %v10111_v12 = vld [vmem:[%s14312_s7 + $0x334] sm:$0xf0] }
 0x38b   : > { %v3881_v9 = vpop.f32.mrf.mxu3 }
 0x38c   : > { %v3882_v51 = vadd.f32 %v3881_v9, %v3863_v14  ;;  %v8722_v14 = vld [vmem:[%s14312_s7 + $0x460] sm:$0xf] }
 0x393   : > { %v3883_v1 = vpop.f32.mrf.mxu3 }
 0x394   : > { %v3884_v37 = vadd.f32 %v3883_v1, %v3865_v23  ;;  %v10147_v1 = vld [vmem:[%s14312_s7 + $0x454] sm:$0xf0] }
 0x395   : > { %v3900_v50 = vpop.f32.mrf.mxu1  ;;  %v8715_v21 = vor.u32 %v10147_v1, %v8714_v59  ;;  %v10304_v59 = vld [vmem:[%s14312_s7 + $0x944] sm:$0xf]  ;;  %v9348_v1 = vld [vmem:[%s14312_s7 + $0x948] sm:$0xf0] }
 0x396   : > { %v3901_v34 = vadd.f32 %v3900_v50, %v3882_v51  ;;  %v8595_v51 = vor.u32 %v10117_v61, %v8594_v52  ;;  %v10115_v50 = vld [vmem:[%s14312_s7 + $0x354] sm:$0xf0] }
 0x398   : > { %v3914_v22 = vmul.f32 %v12077_v18, %v3901_v34  ;;  %v8723_v34 = vor.u32 %v10149_v8, %v8722_v14  ;;  %v8571_v14 = vor.u32 %v10111_v12, %v8570_v35  ;;  %v10300_v35 = vld [vmem:[%s14312_s7 + $0x924] sm:$0xf]  ;;  %v9332_v12 = vld [vmem:[%s14312_s7 + $0x928] sm:$0xf0] }
 0x39a   : > { %v3922_v41 = vadd.f32 %v12084_v57, %v3914_v22  ;;  %v3813_v22 = vadd.f32 %v12009_v62, %v3794_v42  ;;  %v8578_v62 = vld [vmem:[%s14312_s7 + $0x340] sm:$0xf] }
 0x39b   : > { %v3886_v39 = vpop.f32.mrf.mxu3  ;;  %v8562_v42 = vld [vmem:[%s14312_s7 + $0x320] sm:$0xf] }
 0x39c   : > { %v3926_v7 = vmax.f32 %v3922_v41, 0.0  ;;  %v3887_v23 = vadd.f32 %v3886_v39, %v3868_v49  ;;  %v3832_v41 = vadd.f32 %v12034_v29, %v3813_v22  ;;  %v9356_v39 = vld [vmem:[%s14312_s7 + $0x958] sm:$0xf0]  ;;  %v8626_v49 = vld [vmem:[%s14312_s7 + $0x3a0] sm:$0xf] }
 0x39d   : > { %v3902_v27 = vpop.f32.mrf.mxu1 }
 0x39e   : > { %3930 = vst [vmem:[#allocation3] sm:$0xff] %v3926_v7  ;;  %v3903_v56 = vadd.f32 %v3902_v27, %v3884_v37  ;;  %v8587_v37 = vor.u32 %v10115_v50, %v8586_v28  ;;  %v8651_v7 = vor.u32 %v10131_v26, %v8650_v32  ;;  %v10113_v27 = vld [vmem:[%s14312_s7 + $0x344] sm:$0xf0]  ;;  %v3851_v19 = vadd.f32 %v12057_v3, %v3832_v41 }
 0x39f   : > { %v8579_v3 = vor.u32 %v10113_v27, %v8578_v62  ;;  %v10109_v32 = vld [vmem:[%s14312_s7 + $0x324] sm:$0xf0]  ;;  %v9351_v62 = vor.u32 %v10304_v59, %v9348_v1  ;;  %v10139_v27 = vld [vmem:[%s14312_s7 + $0x414] sm:$0xf0]  ;;  %v10296_v1 = vld [vmem:[%s14312_s7 + $0x904] sm:$0xf] }
 0x3a0   : > { %v3915_v16 = vmul.f32 %v12077_v18, %v3903_v56  ;;  %v3869_v56 = vpop.f32.mrf.mxu2  ;;  %v10125_v26 = vld [vmem:[%s14312_s7 + $0x3a4] sm:$0xf0] }
 0x3a1   : > { %v3870_v6 = vadd.f32 %v3869_v56, %v3851_v19  ;;  %v10105_v19 = vld [vmem:[%s14312_s7 + $0x304] sm:$0xf0] }
 0x3a2   : > { %v3923_v45 = vadd.f32 %v12084_v57, %v3915_v16  ;;  %v8642_v16 = vld [vmem:[%s14312_s7 + $0x3c0] sm:$0xf] }
 0x3a3   : > { %v3888_v40 = vpop.f32.mrf.mxu3 }
 0x3a4   : > { %v3927_v13 = vmax.f32 %v3923_v45, 0.0  ;;  %v10129_v45 = vld [vmem:[%s14312_s7 + $0x3c4] sm:$0xf0]  ;;  %v3889_v61 = vadd.f32 %v3888_v40, %v3870_v6  ;;  %v8674_v40 = vld [vmem:[%s14312_s7 + $0x400] sm:$0xf] }
 0x3a5   : > { %v3934_v60 = vld [vmem:[#allocation3] sm:$0x1]  ;;  %v3936_v63 = vld [vmem:[#allocation3 + $0x1] sm:$0x1]  ;;  %v3938_v10 = vld [vmem:[#allocation3 + $0x2] sm:$0x1]  ;;  %v8643_v43 = vor.u32 %v10129_v45, %v8642_v16 }
 0x3a6   : > { %3931 = vst [vmem:[#allocation3 + $0x8] sm:$0xff] %v3927_v13  ;;  %v12126_v4 = vpack.c.bf16 %v3934_v60, %v3934_v60  ;;  %v12128_v9 = vpack.c.bf16 %v3936_v63, %v3936_v63  ;;  %v12130_v46 = vpack.c.bf16 %v3938_v10, %v3938_v10  ;;  %v8634_v13 = vld [vmem:[%s14312_s7 + $0x3b0] sm:$0xf]  ;;  %v10127_v60 = vld [vmem:[%s14312_s7 + $0x3b4] sm:$0xf0] }
 0x3a7   : > { %v8698_v63 = vld [vmem:[%s14312_s7 + $0x430] sm:$0xf]  ;;  %v10143_v10 = vld [vmem:[%s14312_s7 + $0x434] sm:$0xf0]  ;;  %v3944_v36 = vld [vmem:[#allocation3 + $0x5] sm:$0x1]  ;;  %v8635_v8 = vor.u32 %v10127_v60, %v8634_v13 }
 0x3a8   : > { %6392 = vmatmul.bf16.vlgmr.msra.gmra.mxu2 %v12126_v4  ;;  %6405 = vmatmul.bf16.vlgmr.msra.gmra.mxu3 %v12128_v9  ;;  %v8699_v54 = vor.u32 %v10143_v10, %v8698_v63  ;;  %v9340_v16 = vld [vmem:[%s14312_s7 + $0x938] sm:$0xf0]  ;;  %v8610_v45 = vld [vmem:[%s14312_s7 + $0x380] sm:$0xf]  ;;  %v10121_v6 = vld [vmem:[%s14312_s7 + $0x384] sm:$0xf0] }
 0x3a9   : > { %6418 = vmatmul.bf16.vlgmr.msrb.gmra.mxu1 %v12130_v46  ;;  %6462 = vmatpush.bf16.msra.mxu2 %v8603_v48  ;;  %v3940_v48 = vld [vmem:[#allocation3 + $0x3] sm:$0x1]  ;;  %v8794_v13 = vld [vmem:[%s14312_s7 + $0x4f0] sm:$0xf] }
 0x3aa   : > { %6475 = vmatpush.bf16.msra.mxu3 %v8667_v11  ;;  %6488 = vmatpush.bf16.msrb.mxu1 %v8731_v17  ;;  %v3942_v11 = vld [vmem:[#allocation3 + $0x4] sm:$0x1]  ;;  %v10306_v17 = vld [vmem:[%s14312_s7 + $0x954] sm:$0xf]  ;;  %v12236_v28 = vpack.c.bf16 %v3940_v48, %v3940_v48  ;;  %v10183_v60 = vld [vmem:[%s14312_s7 + $0x574] sm:$0xf0]  ;;  %v8611_v48 = vor.u32 %v10121_v6, %v8610_v45 }
 0x3ab   : > { %v12238_v50 = vpack.c.bf16 %v3942_v11, %v3942_v11  ;;  %v8922_v63 = vld [vmem:[%s14312_s7 + $0x5f0] sm:$0xf]  ;;  %v10199_v10 = vld [vmem:[%s14312_s7 + $0x5f4] sm:$0xf0]  ;;  %v8834_v45 = vld [vmem:[%s14312_s7 + $0x540] sm:$0xf] }
 0x3ad   : > { %v3905_v58 = vpop.f32.mrf.mxu1  ;;  %6463 = vmatpush.bf16.msra.mxu2 %v8595_v51  ;;  %v3954_v47 = vld [vmem:[#allocation3 + $0xa] sm:$0x1]  ;;  %v3962_v56 = vld [vmem:[#allocation3 + $0xe] sm:$0x1] }
 0x3ae   : > { %v3906_v44 = vadd.f32 %v3905_v58, %v3887_v23  ;;  %6476 = vmatpush.bf16.msra.mxu3 %v8659_v53  ;;  %6489 = vmatpush.bf16.msrb.mxu1 %v8723_v34  ;;  %v12185_v29 = vpack.c.bf16 %v3954_v47, %v3954_v47  ;;  %v12246_v53 = vpack.c.bf16 %v3944_v36, %v3944_v36  ;;  %v8618_v47 = vld [vmem:[%s14312_s7 + $0x390] sm:$0xf] }
 0x3af   : > { %v9359_v34 = vor.u32 %v10306_v17, %v9356_v39  ;;  %v8563_v23 = vor.u32 %v10109_v32, %v8562_v42  ;;  %v8627_v58 = vor.u32 %v10125_v26, %v8626_v49  ;;  %v3946_v17 = vld [vmem:[#allocation3 + $0x6] sm:$0x1]  ;;  %v10298_v39 = vld [vmem:[%s14312_s7 + $0x914] sm:$0xf]  ;;  %v3950_v42 = vld [vmem:[#allocation3 + $0x8] sm:$0x1] }
 0x3b0   : > { %v3916_v20 = vmul.f32 %v12077_v18, %v3906_v44  ;;  %6847 = vmatmul.bf16.vlgmr.msrb.gmra.mxu0 %v12185_v29  ;;  %v8850_v32 = vld [vmem:[%s14312_s7 + $0x560] sm:$0xf]  ;;  %v10181_v49 = vld [vmem:[%s14312_s7 + $0x564] sm:$0xf0] }
 0x3b1   : > { %6464 = vmatpush.bf16.msra.mxu2 %v8587_v37  ;;  %6943 = vmatpush.bf16.msrb.mxu0 %v9375_v2  ;;  %v8691_v37 = vor.u32 %v10141_v55, %v8690_v5  ;;  %v10123_v2 = vld [vmem:[%s14312_s7 + $0x394] sm:$0xf0]  ;;  %v10197_v26 = vld [vmem:[%s14312_s7 + $0x5e4] sm:$0xf0]  ;;  %v12361_v5 = vpack.c.bf16 %v3946_v17, %v3946_v17 }
 0x3b2   : > { %v3924_v52 = vadd.f32 %v12084_v57, %v3916_v20  ;;  %6477 = vmatpush.bf16.msra.mxu3 %v8651_v7  ;;  %6490 = vmatpush.bf16.msrb.mxu1 %v8715_v21  ;;  %v10107_v7 = vld [vmem:[%s14312_s7 + $0x314] sm:$0xf0]  ;;  %v10302_v21 = vld [vmem:[%s14312_s7 + $0x934] sm:$0xf]  ;;  %v8619_v38 = vor.u32 %v10123_v2, %v8618_v47  ;;  %v12301_v20 = vpack.c.bf16 %v3962_v56, %v3962_v56  ;;  %v8842_v47 = vld [vmem:[%s14312_s7 + $0x550] sm:$0xf] }
 0x3b3   : > { %v10179_v2 = vld [vmem:[%s14312_s7 + $0x554] sm:$0xf0]  ;;  %v9628_v56 = vld [vmem:[%s14312_s7 + $0xb78] sm:$0xf0] }
 0x3b4   : > { %v3928_v33 = vmax.f32 %v3924_v52, 0.0  ;;  %v10167_v52 = vld [vmem:[%s14312_s7 + $0x4f4] sm:$0xf0] }
 0x3b5   : > { %v3907_v0 = vpop.f32.mrf.mxu1  ;;  %6465 = vmatpush.bf16.msra.mxu2 %v8579_v3  ;;  %6944 = vmatpush.bf16.msrb.mxu0 %v9367_v24  ;;  %v9343_v3 = vor.u32 %v10302_v21, %v9340_v16  ;;  %v10137_v24 = vld [vmem:[%s14312_s7 + $0x404] sm:$0xf0]  ;;  %v8795_v36 = vor.u32 %v10167_v52, %v8794_v13  ;;  %v8770_v16 = vld [vmem:[%s14312_s7 + $0x4c0] sm:$0xf]  ;;  %v10191_v17 = vld [vmem:[%s14312_s7 + $0x5b4] sm:$0xf0] }
 0x3b6   : > { %3932 = vst [vmem:[#allocation3 + $0x10] sm:$0xff] %v3928_v33  ;;  %v3908_v51 = vadd.f32 %v3907_v0, %v3889_v61  ;;  %6478 = vmatpush.bf16.msra.mxu3 %v8643_v43  ;;  %6491 = vmatpush.bf16.msrb.mxu1 %v8707_v25  ;;  %v8858_v43 = vld [vmem:[%s14312_s7 + $0x570] sm:$0xf]  ;;  %v8547_v25 = vor.u32 %v10105_v19, %v8546_v30  ;;  %v3948_v61 = vld [vmem:[#allocation3 + $0x7] sm:$0x1] }
 0x3b7   : > { %v8675_v11 = vor.u32 %v10137_v24, %v8674_v40  ;;  %v9335_v33 = vor.u32 %v10300_v35, %v9332_v12  ;;  %v9324_v0 = vld [vmem:[%s14312_s7 + $0x918] sm:$0xf0]  ;;  %v12363_v55 = vpack.c.bf16 %v3948_v61, %v3948_v61  ;;  %v10161_v19 = vld [vmem:[%s14312_s7 + $0x4c4] sm:$0xf0]  ;;  %v8898_v40 = vld [vmem:[%s14312_s7 + $0x5c0] sm:$0xf] }
 0x3b8   : > { %v3917_v22 = vmul.f32 %v12077_v18, %v3908_v51  ;;  %6431 = vmatmul.bf16.vlgmr.msrb.gmra.mxu2 %v12236_v28  ;;  %6444 = vmatmul.bf16.vlgmr.msrb.gmra.mxu3 %v12238_v50  ;;  %v8554_v18 = vld [vmem:[%s14312_s7 + $0x310] sm:$0xf]  ;;  %v10165_v51 = vld [vmem:[%s14312_s7 + $0x4e4] sm:$0xf0]  ;;  %v10372_v24 = vld [vmem:[%s14312_s7 + $0xb64] sm:$0xf]  ;;  %v8771_v12 = vor.u32 %v10161_v19, %v8770_v16 }
 0x3b9   : > { %6457 = vmatmul.bf16.vlgmr.msra.gmra.mxu1 %v12246_v53  ;;  %6466 = vmatpush.bf16.msra.mxu2 %v8571_v14  ;;  %v8555_v31 = vor.u32 %v10107_v7, %v8554_v18  ;;  %v8786_v14 = vld [vmem:[%s14312_s7 + $0x4e0] sm:$0xf]  ;;  %v12371_v18 = vpack.c.bf16 %v3950_v42, %v3950_v42  ;;  %v10163_v7 = vld [vmem:[%s14312_s7 + $0x4d4] sm:$0xf0]  ;;  %v9620_v35 = vld [vmem:[%s14312_s7 + $0xb68] sm:$0xf0] }
 0x3ba   : > { %v3925_v41 = vadd.f32 %v12084_v57, %v3917_v22  ;;  %6479 = vmatpush.bf16.msra.mxu3 %v8635_v8  ;;  %6492 = vmatpush.bf16.msrb.mxu1 %v8699_v54  ;;  %v8682_v57 = vld [vmem:[%s14312_s7 + $0x410] sm:$0xf]  ;;  %v8859_v8 = vor.u32 %v10183_v60, %v8858_v43  ;;  %v8923_v54 = vor.u32 %v10199_v10, %v8922_v63  ;;  %v10159_v60 = vld [vmem:[%s14312_s7 + $0x4b4] sm:$0xf0]  ;;  %v10370_v61 = vld [vmem:[%s14312_s7 + $0xb54] sm:$0xf] }
 0x3bb   : > { %6945 = vmatpush.bf16.msrb.mxu0 %v9359_v34  ;;  %v8683_v15 = vor.u32 %v10139_v27, %v8682_v57  ;;  %v8914_v34 = vld [vmem:[%s14312_s7 + $0x5e0] sm:$0xf]  ;;  %v9327_v22 = vor.u32 %v10298_v39, %v9324_v0  ;;  %v8787_v59 = vor.u32 %v10165_v51, %v8786_v14  ;;  %v10195_v57 = vld [vmem:[%s14312_s7 + $0x5d4] sm:$0xf0]  ;;  %v10374_v27 = vld [vmem:[%s14312_s7 + $0xb74] sm:$0xf]  ;;  %v9623_v10 = vor.u32 %v10372_v24, %v9620_v35 }
 0x3bc   : > { %v3929_v44 = vmax.f32 %v3925_v41, 0.0  ;;  %v8851_v41 = vor.u32 %v10181_v49, %v8850_v32  ;;  %v8826_v63 = vld [vmem:[%s14312_s7 + $0x530] sm:$0xf]  ;;  %v8754_v14 = vld [vmem:[%s14312_s7 + $0x4a0] sm:$0xf] }
 0x3bd   : > { %6467 = vmatpush.bf16.msra.mxu2 %v8563_v23  ;;  %v9316_v23 = vld [vmem:[%s14312_s7 + $0x908] sm:$0xf0]  ;;  %v3970_v6 = vld [vmem:[#allocation3 + $0x12] sm:$0x1]  ;;  %v8882_v32 = vld [vmem:[%s14312_s7 + $0x5a0] sm:$0xf] }
 0x3be   : > { %3933 = vst [vmem:[#allocation3 + $0x18] sm:$0x1] %v3929_v44  ;;  %6480 = vmatpush.bf16.msra.mxu3 %v8627_v58  ;;  %6493 = vmatpush.bf16.msrb.mxu1 %v8691_v37  ;;  %v8915_v58 = vor.u32 %v10197_v26, %v8914_v34  ;;  %v8778_v37 = vld [vmem:[%s14312_s7 + $0x4d0] sm:$0xf]  ;;  %v9319_v44 = vor.u32 %v10296_v1, %v9316_v23  ;;  %v10173_v51 = vld [vmem:[%s14312_s7 + $0x524] sm:$0xf0] }
 0x3bf   : > { %6946 = vmatpush.bf16.msrb.mxu0 %v9351_v62  ;;  %v8906_v62 = vld [vmem:[%s14312_s7 + $0x5d0] sm:$0xf]  ;;  %v8779_v21 = vor.u32 %v10163_v7, %v8778_v37  ;;  %v12424_v13 = vpack.c.bf16 %v3970_v6, %v3970_v6  ;;  %v10189_v49 = vld [vmem:[%s14312_s7 + $0x5a4] sm:$0xf0]  ;;  %v10368_v34 = vld [vmem:[%s14312_s7 + $0xb44] sm:$0xf] }
 0x3c0   : > { %6899 = vmatmul.bf16.vlgmr.msra.gmra.mxu0 %v12301_v20  ;;  %v8907_v30 = vor.u32 %v10195_v57, %v8906_v62  ;;  %v9604_v26 = vld [vmem:[%s14312_s7 + $0xb48] sm:$0xf0]  ;;  %v8883_v1 = vor.u32 %v10189_v49, %v8882_v32  ;;  %v8746_v23 = vld [vmem:[%s14312_s7 + $0x490] sm:$0xf]  ;;  %v10171_v7 = vld [vmem:[%s14312_s7 + $0x514] sm:$0xf0] }
 0x3c1   : > { %6468 = vmatpush.bf16.msra.mxu2 %v8555_v31  ;;  %v8843_v31 = vor.u32 %v10179_v2, %v8842_v47  ;;  %v9607_v37 = vor.u32 %v10368_v34, %v9604_v26  ;;  %v8874_v47 = vld [vmem:[%s14312_s7 + $0x590] sm:$0xf]  ;;  %v10187_v2 = vld [vmem:[%s14312_s7 + $0x594] sm:$0xf0]  ;;  %v10366_v62 = vld [vmem:[%s14312_s7 + $0xb34] sm:$0xf] }
 0x3c2   : > { %6481 = vmatpush.bf16.msra.mxu3 %v8619_v38  ;;  %6494 = vmatpush.bf16.msrb.mxu1 %v8683_v15  ;;  %v10177_v38 = vld [vmem:[%s14312_s7 + $0x544] sm:$0xf0]  ;;  %v9631_v15 = vor.u32 %v10374_v27, %v9628_v56  ;;  %v9596_v57 = vld [vmem:[%s14312_s7 + $0xb38] sm:$0xf0]  ;;  %v8738_v56 = vld [vmem:[%s14312_s7 + $0x480] sm:$0xf]  ;;  %v8875_v16 = vor.u32 %v10187_v2, %v8874_v47 }
 0x3c3   : > { %6947 = vmatpush.bf16.msrb.mxu0 %v9343_v3  ;;  %v10193_v3 = vld [vmem:[%s14312_s7 + $0x5c4] sm:$0xf0]  ;;  %v8835_v52 = vor.u32 %v10177_v38, %v8834_v45  ;;  %v8866_v19 = vld [vmem:[%s14312_s7 + $0x580] sm:$0xf]  ;;  %v9599_v45 = vor.u32 %v10366_v62, %v9596_v57  ;;  %v9588_v6 = vld [vmem:[%s14312_s7 + $0xb28] sm:$0xf0] }
 0x3c4   : > { %v8899_v43 = vor.u32 %v10193_v3, %v8898_v40  ;;  %v10185_v38 = vld [vmem:[%s14312_s7 + $0x584] sm:$0xf0]  ;;  %v8986_v40 = vld [vmem:[%s14312_s7 + $0x670] sm:$0xf]  ;;  %v10215_v3 = vld [vmem:[%s14312_s7 + $0x674] sm:$0xf0] }
 0x3c5   : > { %6469 = vmatpush.bf16.msra.mxu2 %v8547_v25  ;;  %v8762_v25 = vld [vmem:[%s14312_s7 + $0x4b0] sm:$0xf]  ;;  %v10360_v34 = vld [vmem:[%s14312_s7 + $0xb04] sm:$0xf]  ;;  %v9572_v26 = vld [vmem:[%s14312_s7 + $0xb08] sm:$0xf0] }
 0x3c6   : > { %6482 = vmatpush.bf16.msra.mxu3 %v8611_v48  ;;  %6495 = vmatpush.bf16.msrb.mxu1 %v8675_v11  ;;  %v10175_v48 = vld [vmem:[%s14312_s7 + $0x534] sm:$0xf0]  ;;  %v8890_v11 = vld [vmem:[%s14312_s7 + $0x5b0] sm:$0xf]  ;;  %v9575_v2 = vor.u32 %v10360_v34, %v9572_v26  ;;  %v3978_v57 = vld [vmem:[#allocation3 + $0x16] sm:$0x1] }
 0x3c7   : > { %6948 = vmatpush.bf16.msrb.mxu0 %v9335_v33  ;;  %v9612_v33 = vld [vmem:[%s14312_s7 + $0xb58] sm:$0xf0]  ;;  %v8827_v39 = vor.u32 %v10175_v48, %v8826_v63  ;;  %v8891_v0 = vor.u32 %v10191_v17, %v8890_v11  ;;  %v9050_v24 = vld [vmem:[%s14312_s7 + $0x6f0] sm:$0xf]  ;;  %v3952_v63 = vld [vmem:[#allocation3 + $0x9] sm:$0x1]  ;;  %v8987_v48 = vor.u32 %v10215_v3, %v8986_v40 }
 0x3c8   : > { %6470 = vmatmul.bf16.vlgmr.msra.gmra.mxu2 %v12361_v5  ;;  %v9615_v42 = vor.u32 %v10370_v61, %v9612_v33  ;;  %v3956_v11 = vld [vmem:[#allocation3 + $0xb] sm:$0x1]  ;;  %v10362_v17 = vld [vmem:[%s14312_s7 + $0xb14] sm:$0xf]  ;;  %v9580_v61 = vld [vmem:[%s14312_s7 + $0xb18] sm:$0xf0] }
 0x3c9   : > { %6501 = vmatpush.bf16.msrb.mxu2 %v8795_v36  ;;  %6483 = vmatmul.bf16.vlgmr.msra.gmra.mxu3 %v12363_v55  ;;  %v8763_v36 = vor.u32 %v10159_v60, %v8762_v25  ;;  %v8867_v60 = vor.u32 %v10185_v38, %v8866_v19  ;;  %v9583_v32 = vor.u32 %v10362_v17, %v9580_v61  ;;  %v10243_v47 = vld [vmem:[%s14312_s7 + $0x754] sm:$0xf0]  ;;  %v9018_v3 = vld [vmem:[%s14312_s7 + $0x6b0] sm:$0xf]  ;;  %v10237_v17 = vld [vmem:[%s14312_s7 + $0x724] sm:$0xf0] }
 0x3ca   : > { %6514 = vmatpush.bf16.msrb.mxu3 %v8859_v8  ;;  %6527 = vmatpush.bf16.msra.mxu1 %v8923_v54  ;;  %v10157_v8 = vld [vmem:[%s14312_s7 + $0x4a4] sm:$0xf0]  ;;  %v8818_v54 = vld [vmem:[%s14312_s7 + $0x520] sm:$0xf]  ;;  %v10207_v40 = vld [vmem:[%s14312_s7 + $0x634] sm:$0xf0] }
 0x3cb   : > { %6496 = vmatmul.bf16.vlgmr.msrb.gmra.mxu1 %v12371_v18  ;;  %6949 = vmatpush.bf16.msrb.mxu0 %v9327_v22  ;;  %v8755_v22 = vor.u32 %v10157_v8, %v8754_v14  ;;  %v9042_v14 = vld [vmem:[%s14312_s7 + $0x6e0] sm:$0xf]  ;;  %v10229_v8 = vld [vmem:[%s14312_s7 + $0x6e4] sm:$0xf0] }
 0x3cd   : > { %6502 = vmatpush.bf16.msrb.mxu2 %v8787_v59  ;;  %v8819_v59 = vor.u32 %v10173_v51, %v8818_v54  ;;  %v9106_v54 = vld [vmem:[%s14312_s7 + $0x760] sm:$0xf]  ;;  %v12565_v51 = vpack.c.bf16 %v3952_v63, %v3952_v63  ;;  %v10205_v63 = vld [vmem:[%s14312_s7 + $0x624] sm:$0xf0] }
 0x3ce   : > { %6515 = vmatpush.bf16.msrb.mxu3 %v8851_v41  ;;  %6528 = vmatpush.bf16.msra.mxu1 %v8915_v58  ;;  %v10155_v41 = vld [vmem:[%s14312_s7 + $0x494] sm:$0xf0]  ;;  %v8810_v58 = vld [vmem:[%s14312_s7 + $0x510] sm:$0xf] }
 0x3cf   : > { %6950 = vmatpush.bf16.msrb.mxu0 %v9319_v44  ;;  %v8747_v27 = vor.u32 %v10155_v41, %v8746_v23  ;;  %v10153_v44 = vld [vmem:[%s14312_s7 + $0x484] sm:$0xf0]  ;;  %v8970_v23 = vld [vmem:[%s14312_s7 + $0x650] sm:$0xf]  ;;  %v10211_v41 = vld [vmem:[%s14312_s7 + $0x654] sm:$0xf0] }
 0x3d0   : > { %v8739_v35 = vor.u32 %v10153_v44, %v8738_v56  ;;  %v8971_v62 = vor.u32 %v10211_v41, %v8970_v23  ;;  %v8962_v56 = vld [vmem:[%s14312_s7 + $0x640] sm:$0xf]  ;;  %v10209_v44 = vld [vmem:[%s14312_s7 + $0x644] sm:$0xf0] }
 0x3d1   : > { %6503 = vmatpush.bf16.msrb.mxu2 %v8779_v21  ;;  %v8811_v21 = vor.u32 %v10171_v7, %v8810_v58  ;;  %v9034_v58 = vld [vmem:[%s14312_s7 + $0x6d0] sm:$0xf]  ;;  %v8963_v19 = vor.u32 %v10209_v44, %v8962_v56  ;;  %v10217_v23 = vld [vmem:[%s14312_s7 + $0x684] sm:$0xf0]  ;;  %v9058_v41 = vld [vmem:[%s14312_s7 + $0x700] sm:$0xf] }
 0x3d2   : > { %6516 = vmatpush.bf16.msrb.mxu3 %v8843_v31  ;;  %6529 = vmatpush.bf16.msra.mxu1 %v8907_v30  ;;  %v8802_v31 = vld [vmem:[%s14312_s7 + $0x500] sm:$0xf]  ;;  %v10169_v30 = vld [vmem:[%s14312_s7 + $0x504] sm:$0xf0]  ;;  %v9098_v7 = vld [vmem:[%s14312_s7 + $0x750] sm:$0xf] }
 0x3d3   : > { %6995 = vmatpush.bf16.msra.mxu0 %v9631_v15  ;;  %v10364_v15 = vld [vmem:[%s14312_s7 + $0xb24] sm:$0xf]  ;;  %v8803_v25 = vor.u32 %v10169_v30, %v8802_v31  ;;  %v9090_v31 = vld [vmem:[%s14312_s7 + $0x740] sm:$0xf]  ;;  %v10241_v30 = vld [vmem:[%s14312_s7 + $0x744] sm:$0xf0] }
 0x3d4   : > { %6951 = vmatmul.bf16.vlgmr.msrb.gmra.mxu0 %v12424_v13 }
 0x3d5   : > { %6504 = vmatpush.bf16.msrb.mxu2 %v8771_v12  ;;  %v10231_v12 = vld [vmem:[%s14312_s7 + $0x6f4] sm:$0xf0] }
 0x3d6   : > { %6517 = vmatpush.bf16.msrb.mxu3 %v8835_v52  ;;  %6530 = vmatpush.bf16.msra.mxu1 %v8899_v43  ;;  %v9114_v52 = vld [vmem:[%s14312_s7 + $0x770] sm:$0xf]  ;;  %v10247_v43 = vld [vmem:[%s14312_s7 + $0x774] sm:$0xf0]  ;;  %v9051_v33 = vor.u32 %v10231_v12, %v9050_v24 }
 0x3d7   : > { %6996 = vmatpush.bf16.msra.mxu0 %v9623_v10  ;;  %v9591_v10 = vor.u32 %v10364_v15, %v9588_v6  ;;  %v9091_v15 = vor.u32 %v10241_v30, %v9090_v31  ;;  %v8954_v6 = vld [vmem:[%s14312_s7 + $0x630] sm:$0xf]  ;;  %v10223_v24 = vld [vmem:[%s14312_s7 + $0x6b4] sm:$0xf0]  ;;  %v3960_v31 = vld [vmem:[#allocation3 + $0xd] sm:$0x1] }
 0x3d8   : > { %v10239_v12 = vld [vmem:[%s14312_s7 + $0x734] sm:$0xf0]  ;;  %v9170_v30 = vld [vmem:[%s14312_s7 + $0x7e0] sm:$0xf] }
 0x3d9   : > { %6505 = vmatpush.bf16.msrb.mxu2 %v8763_v36  ;;  %v9115_v36 = vor.u32 %v10247_v43, %v9114_v52  ;;  %v8955_v52 = vor.u32 %v10207_v40, %v8954_v6  ;;  %v9019_v43 = vor.u32 %v10223_v24, %v9018_v3  ;;  %v10277_v6 = vld [vmem:[%s14312_s7 + $0x864] sm:$0xf0]  ;;  %v9298_v40 = vld [vmem:[%s14312_s7 + $0x8e0] sm:$0xf] }
 0x3da   : > { %6518 = vmatpush.bf16.msrb.mxu3 %v8827_v39  ;;  %6531 = vmatpush.bf16.msra.mxu1 %v8891_v0  ;;  %v8978_v39 = vld [vmem:[%s14312_s7 + $0x660] sm:$0xf]  ;;  %v10213_v0 = vld [vmem:[%s14312_s7 + $0x664] sm:$0xf0] }
 0x3db   : > { %6997 = vmatpush.bf16.msra.mxu0 %v9615_v42  ;;  %v10245_v42 = vld [vmem:[%s14312_s7 + $0x764] sm:$0xf0]  ;;  %v8979_v49 = vor.u32 %v10213_v0, %v8978_v39  ;;  %v8938_v39 = vld [vmem:[%s14312_s7 + $0x610] sm:$0xf]  ;;  %v10203_v0 = vld [vmem:[%s14312_s7 + $0x614] sm:$0xf0] }
 0x3dc   : > { %v10293_v3 = vld [vmem:[%s14312_s7 + $0x8e4] sm:$0xf0] }
 0x3dd   : > { %6506 = vmatpush.bf16.msrb.mxu2 %v8755_v22  ;;  %v12573_v22 = vpack.c.bf16 %v3956_v11, %v3956_v11  ;;  %v9074_v11 = vld [vmem:[%s14312_s7 + $0x720] sm:$0xf] }
 0x3de   : > { %6519 = vmatpush.bf16.msrb.mxu3 %v8819_v59  ;;  %6532 = vmatpush.bf16.msra.mxu1 %v8883_v1  ;;  %v9043_v59 = vor.u32 %v10229_v8, %v9042_v14  ;;  %v9107_v1 = vor.u32 %v10245_v42, %v9106_v54  ;;  %v9002_v14 = vld [vmem:[%s14312_s7 + $0x690] sm:$0xf]  ;;  %v10219_v8 = vld [vmem:[%s14312_s7 + $0x694] sm:$0xf0] }
 0x3df   : > { %6998 = vmatpush.bf16.msra.mxu0 %v9607_v37  ;;  %v10227_v37 = vld [vmem:[%s14312_s7 + $0x6d4] sm:$0xf0]  ;;  %v9066_v54 = vld [vmem:[%s14312_s7 + $0x710] sm:$0xf]  ;;  %v9003_v34 = vor.u32 %v10219_v8, %v9002_v14  ;;  %v9282_v14 = vld [vmem:[%s14312_s7 + $0x8c0] sm:$0xf] }
 0x3e0   : > { %v10235_v42 = vld [vmem:[%s14312_s7 + $0x714] sm:$0xf0]  ;;  %v10289_v8 = vld [vmem:[%s14312_s7 + $0x8c4] sm:$0xf0] }
 0x3e1   : > { %6507 = vmatpush.bf16.msrb.mxu2 %v8747_v27  ;;  %v9099_v27 = vor.u32 %v10243_v47, %v9098_v7  ;;  %v9067_v26 = vor.u32 %v10235_v42, %v9066_v54  ;;  %v10263_v7 = vld [vmem:[%s14312_s7 + $0x7f4] sm:$0xf0]  ;;  %v9242_v47 = vld [vmem:[%s14312_s7 + $0x870] sm:$0xf] }
 0x3e2   : > { %6520 = vmatpush.bf16.msrb.mxu3 %v8811_v21  ;;  %6533 = vmatpush.bf16.msra.mxu1 %v8875_v16  ;;  %v9026_v21 = vld [vmem:[%s14312_s7 + $0x6c0] sm:$0xf]  ;;  %v10225_v16 = vld [vmem:[%s14312_s7 + $0x6c4] sm:$0xf0] }
 0x3e3   : > { %6999 = vmatpush.bf16.msra.mxu0 %v9599_v45  ;;  %v12614_v45 = vpack.c.bf16 %v3978_v57, %v3978_v57  ;;  %v9027_v38 = vor.u32 %v10225_v16, %v9026_v21  ;;  %v9306_v57 = vld [vmem:[%s14312_s7 + $0x8f0] sm:$0xf]  ;;  %v3958_v16 = vld [vmem:[#allocation3 + $0xc] sm:$0x1] }
 0x3e4   : > { %v12725_v24 = vpack.c.bf16 %v3958_v16, %v3958_v16  ;;  %v10251_v16 = vld [vmem:[%s14312_s7 + $0x794] sm:$0xf0] }
 0x3e5   : > { %6508 = vmatpush.bf16.msrb.mxu2 %v8739_v35  ;;  %v9082_v35 = vld [vmem:[%s14312_s7 + $0x730] sm:$0xf] }
 0x3e6   : > { %6521 = vmatpush.bf16.msrb.mxu3 %v8803_v25  ;;  %6534 = vmatpush.bf16.msra.mxu1 %v8867_v60  ;;  %v9083_v25 = vor.u32 %v10239_v12, %v9082_v35  ;;  %v8946_v60 = vld [vmem:[%s14312_s7 + $0x620] sm:$0xf]  ;;  %v12727_v35 = vpack.c.bf16 %v3960_v31, %v3960_v31  ;;  %v9194_v31 = vld [vmem:[%s14312_s7 + $0x810] sm:$0xf] }
 0x3e7   : > { %7000 = vmatpush.bf16.msra.mxu0 %v9591_v10  ;;  %v9010_v10 = vld [vmem:[%s14312_s7 + $0x6a0] sm:$0xf]  ;;  %v8947_v61 = vor.u32 %v10205_v63, %v8946_v60  ;;  %v10259_v60 = vld [vmem:[%s14312_s7 + $0x7d4] sm:$0xf0]  ;;  %v9226_v63 = vld [vmem:[%s14312_s7 + $0x850] sm:$0xf] }
 0x3e8   : > { %6509 = vmatmul.bf16.vlgmr.msrb.gmra.mxu2 %v12565_v51 }
 0x3e9   : > { %6540 = vmatpush.bf16.msra.mxu2 %v8987_v48  ;;  %6522 = vmatmul.bf16.vlgmr.msrb.gmra.mxu3 %v12185_v29  ;;  %v9035_v29 = vor.u32 %v10227_v37, %v9034_v58  ;;  %v10221_v48 = vld [vmem:[%s14312_s7 + $0x6a4] sm:$0xf0]  ;;  %v9178_v37 = vld [vmem:[%s14312_s7 + $0x7f0] sm:$0xf] }
 0x3ea   : > { %6553 = vmatpush.bf16.msra.mxu3 %v9051_v33  ;;  %6566 = vmatpush.bf16.msrb.mxu1 %v9115_v36  ;;  %v9011_v33 = vor.u32 %v10221_v48, %v9010_v10  ;;  %v9075_v36 = vor.u32 %v10237_v17, %v9074_v11  ;;  %v10233_v58 = vld [vmem:[%s14312_s7 + $0x704] sm:$0xf0]  ;;  %v9179_v44 = vor.u32 %v10263_v7, %v9178_v37  ;;  %v10275_v10 = vld [vmem:[%s14312_s7 + $0x854] sm:$0xf0]  ;;  %v9290_v48 = vld [vmem:[%s14312_s7 + $0x8d0] sm:$0xf] }
 0x3eb   : > { %6535 = vmatmul.bf16.vlgmr.msra.gmra.mxu1 %v12573_v22  ;;  %7001 = vmatpush.bf16.msra.mxu0 %v9583_v32  ;;  %v8939_v32 = vor.u32 %v10203_v0, %v8938_v39  ;;  %v9059_v56 = vor.u32 %v10233_v58, %v9058_v41  ;;  %v10291_v11 = vld [vmem:[%s14312_s7 + $0x8d4] sm:$0xf0]  ;;  %v9218_v39 = vld [vmem:[%s14312_s7 + $0x840] sm:$0xf]  ;;  %v10273_v0 = vld [vmem:[%s14312_s7 + $0x844] sm:$0xf0] }
 0x3ec   : > { %v9219_v42 = vor.u32 %v10273_v0, %v9218_v39  ;;  %v9138_v37 = vld [vmem:[%s14312_s7 + $0x7a0] sm:$0xf]  ;;  %v3964_v0 = vld [vmem:[#allocation3 + $0xf] sm:$0x1] }
 0x3ed   : > { %6541 = vmatpush.bf16.msra.mxu2 %v8979_v49  ;;  %v8930_v49 = vld [vmem:[%s14312_s7 + $0x600] sm:$0xf] }
 0x3ee   : > { %6554 = vmatpush.bf16.msra.mxu3 %v9043_v59  ;;  %6567 = vmatpush.bf16.msrb.mxu1 %v9107_v1  ;;  %v10201_v59 = vld [vmem:[%s14312_s7 + $0x604] sm:$0xf0]  ;;  %v8994_v1 = vld [vmem:[%s14312_s7 + $0x680] sm:$0xf] }
 0x3ef   : > { %7002 = vmatpush.bf16.msra.mxu0 %v9575_v2  ;;  %v10279_v2 = vld [vmem:[%s14312_s7 + $0x874] sm:$0xf0] }
 0x3f0   : > { %v9243_v21 = vor.u32 %v10279_v2, %v9242_v47  ;;  %v10253_v47 = vld [vmem:[%s14312_s7 + $0x7a4] sm:$0xf0]  ;;  %v9202_v2 = vld [vmem:[%s14312_s7 + $0x820] sm:$0xf] }
 0x3f1   : > { %6542 = vmatpush.bf16.msra.mxu2 %v8971_v62  ;;  %v8931_v62 = vor.u32 %v10201_v59, %v8930_v49  ;;  %v9283_v49 = vor.u32 %v10289_v8, %v9282_v14  ;;  %v10271_v59 = vld [vmem:[%s14312_s7 + $0x834] sm:$0xf0]  ;;  %v3966_v14 = vld [vmem:[#allocation3 + $0x10] sm:$0x1]  ;;  %v3968_v8 = vld [vmem:[#allocation3 + $0x11] sm:$0x1] }
 0x3f2   : > { %6555 = vmatpush.bf16.msra.mxu3 %v9035_v29  ;;  %6568 = vmatpush.bf16.msrb.mxu1 %v9099_v27  ;;  %v10295_v29 = vld [vmem:[%s14312_s7 + $0x8f4] sm:$0xf0]  ;;  %v8995_v27 = vor.u32 %v10217_v23, %v8994_v1  ;;  %v9274_v1 = vld [vmem:[%s14312_s7 + $0x8b0] sm:$0xf] }
 0x3f3   : > { %7003 = vmatmul.bf16.vlgmr.msra.gmra.mxu0 %v12614_v45  ;;  %v10287_v23 = vld [vmem:[%s14312_s7 + $0x8b4] sm:$0xf0] }
 0x3f4   : > { %v9275_v7 = vor.u32 %v10287_v23, %v9274_v1  ;;  %v10341_v1 = vld [vmem:[%s14312_s7 + $0xa64] sm:$0xf0]  ;;  %v12876_v23 = vpack.c.bf16 %v3964_v0, %v3964_v0  ;;  %v9330_v0 = vld [vmem:[%s14312_s7 + $0x920] sm:$0xf] }
 0x3f5   : > { %6543 = vmatpush.bf16.msra.mxu2 %v8963_v19  ;;  %v9307_v19 = vor.u32 %v10295_v29, %v9306_v57  ;;  %v9266_v57 = vld [vmem:[%s14312_s7 + $0x8a0] sm:$0xf]  ;;  %v10285_v29 = vld [vmem:[%s14312_s7 + $0x8a4] sm:$0xf0] }
 0x3f6   : > { %6556 = vmatpush.bf16.msra.mxu3 %v9027_v38  ;;  %6569 = vmatpush.bf16.msrb.mxu1 %v9091_v15  ;;  %v10261_v38 = vld [vmem:[%s14312_s7 + $0x7e4] sm:$0xf0]  ;;  %v9234_v15 = vld [vmem:[%s14312_s7 + $0x860] sm:$0xf] }
 0x3f7   : > { %v9171_v12 = vor.u32 %v10261_v38, %v9170_v30  ;;  %v10267_v30 = vld [vmem:[%s14312_s7 + $0x814] sm:$0xf0] }
 0x3f8   : > { %v10283_v38 = vld [vmem:[%s14312_s7 + $0x894] sm:$0xf0] }
 0x3f9   : > { %6544 = vmatpush.bf16.msra.mxu2 %v8955_v52  ;;  %v9235_v52 = vor.u32 %v10277_v6, %v9234_v15  ;;  %v9195_v6 = vor.u32 %v10267_v30, %v9194_v31  ;;  %v9346_v31 = vld [vmem:[%s14312_s7 + $0x940] sm:$0xf]  ;;  %v10305_v30 = vld [vmem:[%s14312_s7 + $0x944] sm:$0xf0] }
 0x3fa   : > { %6557 = vmatpush.bf16.msra.mxu3 %v9019_v43  ;;  %6570 = vmatpush.bf16.msrb.mxu1 %v9083_v25  ;;  %v9162_v43 = vld [vmem:[%s14312_s7 + $0x7d0] sm:$0xf]  ;;  %v9299_v25 = vor.u32 %v10293_v3, %v9298_v40  ;;  %v9122_v40 = vld [vmem:[%s14312_s7 + $0x780] sm:$0xf]  ;;  %v10249_v3 = vld [vmem:[%s14312_s7 + $0x784] sm:$0xf0] }
 0x3fb   : > { %v9163_v17 = vor.u32 %v10259_v60, %v9162_v43  ;;  %v10265_v43 = vld [vmem:[%s14312_s7 + $0x804] sm:$0xf0] }
 0x3fc   : > { %v10281_v60 = vld [vmem:[%s14312_s7 + $0x884] sm:$0xf0] }
 0x3fd   : > { %6545 = vmatpush.bf16.msra.mxu2 %v8947_v61  ;;  %v9227_v61 = vor.u32 %v10275_v10, %v9226_v63  ;;  %v9370_v63 = vld [vmem:[%s14312_s7 + $0x970] sm:$0xf]  ;;  %v10311_v10 = vld [vmem:[%s14312_s7 + $0x974] sm:$0xf0] }
 0x3fe   : > { %6558 = vmatpush.bf16.msra.mxu3 %v9011_v33  ;;  %6571 = vmatpush.bf16.msrb.mxu1 %v9075_v36  ;;  %v9154_v33 = vld [vmem:[%s14312_s7 + $0x7c0] sm:$0xf]  ;;  %v9291_v36 = vor.u32 %v10291_v11, %v9290_v48  ;;  %v9434_v48 = vld [vmem:[%s14312_s7 + $0x9f0] sm:$0xf]  ;;  %v10327_v11 = vld [vmem:[%s14312_s7 + $0x9f4] sm:$0xf0]  ;;  %v9371_v39 = vor.u32 %v10311_v10, %v9370_v63 }
 0x3ff   : > { %v10319_v63 = vld [vmem:[%s14312_s7 + $0x9b4] sm:$0xf0]  ;;  %v9466_v10 = vld [vmem:[%s14312_s7 + $0xa30] sm:$0xf] }
 0x401   : > { %6546 = vmatpush.bf16.msra.mxu2 %v8939_v32  ;;  %v9146_v32 = vld [vmem:[%s14312_s7 + $0x7b0] sm:$0xf] }
 0x402   : > { %6559 = vmatpush.bf16.msra.mxu3 %v9003_v34  ;;  %6572 = vmatpush.bf16.msrb.mxu1 %v9067_v26  ;;  %v10255_v34 = vld [vmem:[%s14312_s7 + $0x7b4] sm:$0xf0]  ;;  %v9210_v26 = vld [vmem:[%s14312_s7 + $0x830] sm:$0xf] }
 0x403   : > { %v9147_v41 = vor.u32 %v10255_v34, %v9146_v32  ;;  %v9211_v58 = vor.u32 %v10271_v59, %v9210_v26  ;;  %v9362_v32 = vld [vmem:[%s14312_s7 + $0x960] sm:$0xf]  ;;  %v10325_v26 = vld [vmem:[%s14312_s7 + $0x9e4] sm:$0xf0] }
 0x404   : > { %v9426_v34 = vld [vmem:[%s14312_s7 + $0x9e0] sm:$0xf] }
 0x405   : > { %6547 = vmatpush.bf16.msra.mxu2 %v8931_v62  ;;  %v10269_v62 = vld [vmem:[%s14312_s7 + $0x824] sm:$0xf0]  ;;  %v9490_v59 = vld [vmem:[%s14312_s7 + $0xa60] sm:$0xf] }
 0x406   : > { %6560 = vmatpush.bf16.msra.mxu3 %v8995_v27  ;;  %6573 = vmatpush.bf16.msrb.mxu1 %v9059_v56  ;;  %v9139_v27 = vor.u32 %v10253_v47, %v9138_v37  ;;  %v9203_v56 = vor.u32 %v10269_v62, %v9202_v2  ;;  %v12880_v37 = vpack.c.bf16 %v3968_v8, %v3968_v8  ;;  %v9354_v2 = vld [vmem:[%s14312_s7 + $0x950] sm:$0xf]  ;;  %v10307_v62 = vld [vmem:[%s14312_s7 + $0x954] sm:$0xf0]  ;;  %v9394_v8 = vld [vmem:[%s14312_s7 + $0x9a0] sm:$0xf] }
 0x407   : > { %v9491_v47 = vor.u32 %v10341_v1, %v9490_v59 }
 0x408   : > { %6548 = vmatmul.bf16.vlgmr.msra.gmra.mxu2 %v12725_v24 }
 0x409   : > { %6579 = vmatpush.bf16.msrb.mxu2 %v9179_v44  ;;  %6561 = vmatmul.bf16.vlgmr.msra.gmra.mxu3 %v12727_v35  ;;  %v9130_v44 = vld [vmem:[%s14312_s7 + $0x790] sm:$0xf] }
 0x40a   : > { %6592 = vmatpush.bf16.msrb.mxu3 %v9243_v21  ;;  %6605 = vmatpush.bf16.msra.mxu1 %v9307_v19  ;;  %v9267_v21 = vor.u32 %v10285_v29, %v9266_v57  ;;  %v9258_v19 = vld [vmem:[%s14312_s7 + $0x890] sm:$0xf]  ;;  %v9131_v15 = vor.u32 %v10251_v16, %v9130_v44  ;;  %v10323_v29 = vld [vmem:[%s14312_s7 + $0x9d4] sm:$0xf0]  ;;  %v9355_v44 = vor.u32 %v10307_v62, %v9354_v2 }
 0x40b   : > { %6574 = vmatmul.bf16.vlgmr.msrb.gmra.mxu1 %v12301_v20  ;;  %v10257_v20 = vld [vmem:[%s14312_s7 + $0x7c4] sm:$0xf0]  ;;  %v9418_v57 = vld [vmem:[%s14312_s7 + $0x9d0] sm:$0xf]  ;;  %v10315_v2 = vld [vmem:[%s14312_s7 + $0x994] sm:$0xf0] }
 0x40c   : > { %v9155_v54 = vor.u32 %v10257_v20, %v9154_v33  ;;  %v9123_v33 = vor.u32 %v10249_v3, %v9122_v40  ;;  %v10337_v40 = vld [vmem:[%s14312_s7 + $0xa44] sm:$0xf0]  ;;  %v9347_v3 = vor.u32 %v10305_v30, %v9346_v31  ;;  %v9450_v62 = vld [vmem:[%s14312_s7 + $0xa10] sm:$0xf] }
 0x40d   : > { %6580 = vmatpush.bf16.msrb.mxu2 %v9171_v12  ;;  %v9186_v12 = vld [vmem:[%s14312_s7 + $0x800] sm:$0xf]  ;;  %v10297_v30 = vld [vmem:[%s14312_s7 + $0x904] sm:$0xf0] }
 0x40e   : > { %6593 = vmatpush.bf16.msrb.mxu3 %v9235_v52  ;;  %6606 = vmatpush.bf16.msra.mxu1 %v9299_v25  ;;  %v9259_v52 = vor.u32 %v10283_v38, %v9258_v19  ;;  %v9250_v25 = vld [vmem:[%s14312_s7 + $0x880] sm:$0xf] }
 0x40f   : > { %v9251_v20 = vor.u32 %v10281_v60, %v9250_v25  ;;  %v9410_v19 = vld [vmem:[%s14312_s7 + $0x9c0] sm:$0xf]  ;;  %v10303_v25 = vld [vmem:[%s14312_s7 + $0x934] sm:$0xf0]  ;;  %v9402_v60 = vld [vmem:[%s14312_s7 + $0x9b0] sm:$0xf] }
 0x411   : > { %6581 = vmatpush.bf16.msrb.mxu2 %v9163_v17  ;;  %v9498_v17 = vld [vmem:[%s14312_s7 + $0xa70] sm:$0xf] }
 0x412   : > { %6594 = vmatpush.bf16.msrb.mxu3 %v9227_v61  ;;  %6607 = vmatpush.bf16.msra.mxu1 %v9291_v36  ;;  %v10343_v61 = vld [vmem:[%s14312_s7 + $0xa74] sm:$0xf0]  ;;  %v9187_v36 = vor.u32 %v10265_v43, %v9186_v12  ;;  %v9338_v43 = vld [vmem:[%s14312_s7 + $0x930] sm:$0xf] }
 0x415   : > { %6582 = vmatpush.bf16.msrb.mxu2 %v9155_v54  ;;  %v9435_v54 = vor.u32 %v10327_v11, %v9434_v48  ;;  %v10335_v48 = vld [vmem:[%s14312_s7 + $0xa34] sm:$0xf0] }
 0x416   : > { %6595 = vmatpush.bf16.msrb.mxu3 %v9219_v42  ;;  %6608 = vmatpush.bf16.msra.mxu1 %v9283_v49  ;;  %v9499_v42 = vor.u32 %v10343_v61, %v9498_v17  ;;  %v10309_v49 = vld [vmem:[%s14312_s7 + $0x964] sm:$0xf0] }
 0x419   : > { %6583 = vmatpush.bf16.msrb.mxu2 %v9147_v41  ;;  %v12878_v41 = vpack.c.bf16 %v3966_v14, %v3966_v14  ;;  %v10301_v14 = vld [vmem:[%s14312_s7 + $0x924] sm:$0xf0] }
 0x41a   : > { %6596 = vmatpush.bf16.msrb.mxu3 %v9211_v58  ;;  %6609 = vmatpush.bf16.msra.mxu1 %v9275_v7  ;;  %v9363_v58 = vor.u32 %v10309_v49, %v9362_v32  ;;  %v9427_v7 = vor.u32 %v10325_v26, %v9426_v34  ;;  %v9458_v32 = vld [vmem:[%s14312_s7 + $0xa20] sm:$0xf]  ;;  %v10333_v49 = vld [vmem:[%s14312_s7 + $0xa24] sm:$0xf0]  ;;  %v9331_v26 = vor.u32 %v10301_v14, %v9330_v0 }
 0x41b   : > { %v9459_v1 = vor.u32 %v10333_v49, %v9458_v32  ;;  %v9682_v49 = vld [vmem:[%s14312_s7 + $0xbe0] sm:$0xf] }
 0x41d   : > { %6584 = vmatpush.bf16.msrb.mxu2 %v9139_v27  ;;  %v9482_v27 = vld [vmem:[%s14312_s7 + $0xa50] sm:$0xf] }
 0x41e   : > { %6597 = vmatpush.bf16.msrb.mxu3 %v9203_v56  ;;  %6610 = vmatpush.bf16.msra.mxu1 %v9267_v21  ;;  %v10339_v56 = vld [vmem:[%s14312_s7 + $0xa54] sm:$0xf0]  ;;  %v9419_v21 = vor.u32 %v10323_v29, %v9418_v57 }
 0x41f   : > { %v9483_v16 = vor.u32 %v10339_v56, %v9482_v27  ;;  %v10331_v57 = vld [vmem:[%s14312_s7 + $0xa14] sm:$0xf0] }
 0x421   : > { %6585 = vmatpush.bf16.msrb.mxu2 %v9131_v15  ;;  %v10321_v15 = vld [vmem:[%s14312_s7 + $0x9c4] sm:$0xf0] }
 0x422   : > { %6598 = vmatpush.bf16.msrb.mxu3 %v9195_v6  ;;  %6611 = vmatpush.bf16.msra.mxu1 %v9259_v52  ;;  %v9474_v6 = vld [vmem:[%s14312_s7 + $0xa40] sm:$0xf]  ;;  %v9411_v12 = vor.u32 %v10321_v15, %v9410_v19 }
 0x423   : > { %v9475_v52 = vor.u32 %v10337_v40, %v9474_v6  ;;  %v9378_v19 = vld [vmem:[%s14312_s7 + $0x980] sm:$0xf]  ;;  %v10329_v40 = vld [vmem:[%s14312_s7 + $0xa04] sm:$0xf0] }
 0x424   : > { %v9442_v6 = vld [vmem:[%s14312_s7 + $0xa00] sm:$0xf] }
 0x425   : > { %6586 = vmatpush.bf16.msrb.mxu2 %v9123_v33  ;;  %v9339_v33 = vor.u32 %v10303_v25, %v9338_v43  ;;  %v10375_v43 = vld [vmem:[%s14312_s7 + $0xb74] sm:$0xf0] }
 0x426   : > { %6599 = vmatpush.bf16.msrb.mxu3 %v9187_v36  ;;  %6612 = vmatpush.bf16.msra.mxu1 %v9251_v20  ;;  %v6419_v38 = vpop.f32.mrf.mxu1  ;;  %v9403_v36 = vor.u32 %v10319_v63, %v9402_v60  ;;  %v9467_v20 = vor.u32 %v10335_v48, %v9466_v10  ;;  %v9690_v60 = vld [vmem:[%s14312_s7 + $0xbf0] sm:$0xf]  ;;  %v10391_v63 = vld [vmem:[%s14312_s7 + $0xbf4] sm:$0xf0]  ;;  %v9443_v48 = vor.u32 %v10329_v40, %v9442_v6  ;;  %v10353_v40 = vld [vmem:[%s14312_s7 + $0xac4] sm:$0xf0] }
 0x428   : > { %6587 = vmatmul.bf16.vlgmr.msrb.gmra.mxu2 %v12876_v23 }
 0x429   : > { %6618 = vmatpush.bf16.msra.mxu2 %v9371_v39  ;;  %6600 = vmatmul.bf16.vlgmr.msrb.gmra.mxu3 %v12878_v41 }
 0x42a   : > { %6631 = vmatpush.bf16.msra.mxu3 %v9435_v54  ;;  %6644 = vmatpush.bf16.msrb.mxu1 %v9499_v42  ;;  %v10317_v42 = vld [vmem:[%s14312_s7 + $0x9a4] sm:$0xf0] }
 0x42b   : > { %6613 = vmatmul.bf16.vlgmr.msra.gmra.mxu1 %v12880_v37  ;;  %v6393_v11 = vpop.f32.mrf.mxu2  ;;  %v6406_v17 = vpop.f32.mrf.mxu3  ;;  %v9395_v59 = vor.u32 %v10317_v42, %v9394_v8  ;;  %v10357_v8 = vld [vmem:[%s14312_s7 + $0xae4] sm:$0xf0] }
 0x42c   : > { %v6407_v61 = vadd.f32 %v6406_v17, %v6393_v11  ;;  %v10373_v42 = vld [vmem:[%s14312_s7 + $0xb64] sm:$0xf0] }
 0x42d   : > { %6619 = vmatpush.bf16.msra.mxu2 %v9363_v58  ;;  %v12939_v39 = vpop.f32.mrf.mxu0  ;;  %v9322_v58 = vld [vmem:[%s14312_s7 + $0x910] sm:$0xf] }
 0x42e   : > { %6632 = vmatpush.bf16.msra.mxu3 %v9427_v7  ;;  %6645 = vmatpush.bf16.msrb.mxu1 %v9491_v47  ;;  %v6421_v54 = vpop.f32.mrf.mxu1  ;;  %v6420_v34 = vadd.f32 %v6419_v38, %v6407_v61  ;;  %v10299_v7 = vld [vmem:[%s14312_s7 + $0x914] sm:$0xf0]  ;;  %v9386_v47 = vld [vmem:[%s14312_s7 + $0x990] sm:$0xf]  ;;  %v10313_v38 = vld [vmem:[%s14312_s7 + $0x984] sm:$0xf0] }
 0x42f   : > { %v9323_v56 = vor.u32 %v10299_v7, %v9322_v58  ;;  %v9379_v10 = vor.u32 %v10313_v38, %v9378_v19  ;;  %v3972_v61 = vld [vmem:[#allocation3 + $0x13] sm:$0x1]  ;;  %v9618_v54 = vld [vmem:[%s14312_s7 + $0xb60] sm:$0xf] }
 0x431   : > { %6620 = vmatpush.bf16.msra.mxu2 %v9355_v44  ;;  %v9314_v44 = vld [vmem:[%s14312_s7 + $0x900] sm:$0xf] }
 0x432   : > { %6633 = vmatpush.bf16.msra.mxu3 %v9419_v21  ;;  %6646 = vmatpush.bf16.msrb.mxu1 %v9483_v16  ;;  %v9387_v21 = vor.u32 %v10315_v2, %v9386_v47  ;;  %v9451_v16 = vor.u32 %v10331_v57, %v9450_v62  ;;  %v9315_v25 = vor.u32 %v10297_v30, %v9314_v44  ;;  %v9546_v62 = vld [vmem:[%s14312_s7 + $0xad0] sm:$0xf]  ;;  %v10387_v44 = vld [vmem:[%s14312_s7 + $0xbd4] sm:$0xf0]  ;;  %v9538_v30 = vld [vmem:[%s14312_s7 + $0xac0] sm:$0xf] }
 0x433   : > { %v6395_v29 = vpop.f32.mrf.mxu2  ;;  %v6408_v27 = vpop.f32.mrf.mxu3  ;;  %v9619_v2 = vor.u32 %v10373_v42, %v9618_v54  ;;  %v10349_v54 = vld [vmem:[%s14312_s7 + $0xaa4] sm:$0xf0]  ;;  %v9586_v42 = vld [vmem:[%s14312_s7 + $0xb20] sm:$0xf] }
 0x434   : > { %v10355_v29 = vld [vmem:[%s14312_s7 + $0xad4] sm:$0xf0]  ;;  %v9610_v27 = vld [vmem:[%s14312_s7 + $0xb50] sm:$0xf] }
 0x435   : > { %6621 = vmatpush.bf16.msra.mxu2 %v9347_v3  ;;  %v6850_v31 = vpop.f32.mrf.mxu0  ;;  %v9562_v3 = vld [vmem:[%s14312_s7 + $0xaf0] sm:$0xf] }
 0x436   : > { %6634 = vmatpush.bf16.msra.mxu3 %v9411_v12  ;;  %6647 = vmatpush.bf16.msrb.mxu1 %v9475_v52  ;;  %v6458_v15 = vpop.f32.mrf.mxu1  ;;  %v10359_v12 = vld [vmem:[%s14312_s7 + $0xaf4] sm:$0xf0]  ;;  %v9626_v52 = vld [vmem:[%s14312_s7 + $0xb70] sm:$0xf] }
 0x437   : > { %v9563_v11 = vor.u32 %v10359_v12, %v9562_v3  ;;  %v9627_v17 = vor.u32 %v10375_v43, %v9626_v52  ;;  %v10369_v3 = vld [vmem:[%s14312_s7 + $0xb44] sm:$0xf0]  ;;  %v9666_v12 = vld [vmem:[%s14312_s7 + $0xbc0] sm:$0xf] }
 0x438   : > { %v10385_v52 = vld [vmem:[%s14312_s7 + $0xbc4] sm:$0xf0] }
 0x439   : > { %6622 = vmatpush.bf16.msra.mxu2 %v9339_v33  ;;  %v3974_v33 = vld [vmem:[#allocation3 + $0x14] sm:$0x1] }
 0x43a   : > { %6635 = vmatpush.bf16.msra.mxu3 %v9403_v36  ;;  %6648 = vmatpush.bf16.msrb.mxu1 %v9467_v20  ;;  %v9554_v36 = vld [vmem:[%s14312_s7 + $0xae0] sm:$0xf]  ;;  %v9691_v20 = vor.u32 %v10391_v63, %v9690_v60  ;;  %v9530_v63 = vld [vmem:[%s14312_s7 + $0xab0] sm:$0xf] }
 0x43b   : > { %v6432_v0 = vpop.f32.mrf.mxu2  ;;  %v6445_v14 = vpop.f32.mrf.mxu3  ;;  %v9555_v47 = vor.u32 %v10357_v8, %v9554_v36  ;;  %v10383_v36 = vld [vmem:[%s14312_s7 + $0xbb4] sm:$0xf0] }
 0x43c   : > { %v6433_v32 = vadd.f32 %v6432_v0, %v6420_v34 }
 0x43d   : > { %6623 = vmatpush.bf16.msra.mxu2 %v9331_v26  ;;  %v10389_v26 = vld [vmem:[%s14312_s7 + $0xbe4] sm:$0xf0]  ;;  %v13035_v58 = vpop.f32.mrf.mxu0 }
 0x43e   : > { %6636 = vmatpush.bf16.msra.mxu3 %v9395_v59  ;;  %6649 = vmatpush.bf16.msrb.mxu1 %v9459_v1  ;;  %v13031_v59 = vpack.c.bf16 %v3972_v61, %v3972_v61  ;;  %v13033_v1 = vpack.c.bf16 %v3974_v33, %v3974_v33  ;;  %v6446_v7 = vadd.f32 %v6445_v14, %v6433_v32  ;;  %v6460_v34 = vpop.f32.mrf.mxu1  ;;  %v10367_v61 = vld [vmem:[%s14312_s7 + $0xb34] sm:$0xf0]  ;;  %v9658_v33 = vld [vmem:[%s14312_s7 + $0xbb0] sm:$0xf]  ;;  %v9522_v14 = vld [vmem:[%s14312_s7 + $0xaa0] sm:$0xf] }
 0x43f   : > { %v9683_v57 = vor.u32 %v10389_v26, %v9682_v49  ;;  %v9659_v8 = vor.u32 %v10383_v36, %v9658_v33  ;;  %v10365_v32 = vld [vmem:[%s14312_s7 + $0xb24] sm:$0xf0]  ;;  %v8284_v33 = vld [vmem:[%s14312_s7 + $0xf8] sm:$0xf0] }
 0x440   : > { %v10381_v34 = vld [vmem:[%s14312_s7 + $0xba4] sm:$0xf0] }
 0x441   : > { %6624 = vmatpush.bf16.msra.mxu2 %v9323_v56  ;;  %v10371_v56 = vld [vmem:[%s14312_s7 + $0xb54] sm:$0xf0] }
 0x442   : > { %6637 = vmatpush.bf16.msra.mxu3 %v9387_v21  ;;  %6650 = vmatpush.bf16.msrb.mxu1 %v9451_v16  ;;  %v6459_v21 = vadd.f32 %v6458_v15, %v6446_v7  ;;  %v9547_v16 = vor.u32 %v10355_v29, %v9546_v62  ;;  %v9611_v31 = vor.u32 %v10371_v56, %v9610_v27  ;;  %v9602_v15 = vld [vmem:[%s14312_s7 + $0xb40] sm:$0xf] }
 0x443   : > { %v6434_v38 = vpop.f32.mrf.mxu2  ;;  %v6447_v6 = vpop.f32.mrf.mxu3  ;;  %v9603_v60 = vor.u32 %v10369_v3, %v9602_v15  ;;  %v9650_v7 = vld [vmem:[%s14312_s7 + $0xba0] sm:$0xf]  ;;  %v9587_v62 = vor.u32 %v10365_v32, %v9586_v42  ;;  %v10345_v15 = vld [vmem:[%s14312_s7 + $0xa84] sm:$0xf0]  ;;  %v3980_v42 = vld [vmem:[#allocation3 + $0x17] sm:$0x1] }
 0x444   : > { %v9651_v56 = vor.u32 %v10381_v34, %v9650_v7  ;;  %v9570_v3 = vld [vmem:[%s14312_s7 + $0xb00] sm:$0xf]  ;;  %v10405_v7 = vld [vmem:[%s14312_s7 + $0xc64] sm:$0xf0]  ;;  %v10020_v34 = vld [vmem:[%s14312_s7 + $0x64] sm:$0xf] }
 0x445   : > { %6625 = vmatpush.bf16.msra.mxu2 %v9315_v25  ;;  %v6902_v43 = vpop.f32.mrf.mxu0  ;;  %v9539_v25 = vor.u32 %v10353_v40, %v9538_v30  ;;  %v10379_v30 = vld [vmem:[%s14312_s7 + $0xb94] sm:$0xf0]  ;;  %v9506_v40 = vld [vmem:[%s14312_s7 + $0xa80] sm:$0xf] }
 0x446   : > { %6638 = vmatpush.bf16.msra.mxu3 %v9379_v10  ;;  %6651 = vmatpush.bf16.msrb.mxu1 %v9443_v48  ;;  %v9667_v48 = vor.u32 %v10385_v52, %v9666_v12  ;;  %v10361_v52 = vld [vmem:[%s14312_s7 + $0xb04] sm:$0xf0]  ;;  %v9634_v43 = vld [vmem:[%s14312_s7 + $0xb80] sm:$0xf]  ;;  %v9507_v36 = vor.u32 %v10345_v15, %v9506_v40 }
 0x448   : > { %6626 = vmatmul.bf16.vlgmr.msra.gmra.mxu2 %v12424_v13  ;;  %v9674_v13 = vld [vmem:[%s14312_s7 + $0xbd0] sm:$0xf]  ;;  %v6497_v10 = vpop.f32.mrf.mxu1 }
 0x449   : > { %6657 = vmatpush.bf16.msrb.mxu2 %v9563_v11  ;;  %6639 = vmatmul.bf16.vlgmr.msra.gmra.mxu3 %v13031_v59  ;;  %v9675_v19 = vor.u32 %v10387_v44, %v9674_v13  ;;  %v10351_v11 = vld [vmem:[%s14312_s7 + $0xab4] sm:$0xf0] }
 0x44a   : > { %6670 = vmatpush.bf16.msrb.mxu3 %v9627_v17  ;;  %6683 = vmatpush.bf16.msra.mxu1 %v9691_v20  ;;  %v9594_v17 = vld [vmem:[%s14312_s7 + $0xb30] sm:$0xf]  ;;  %v9531_v20 = vor.u32 %v10351_v11, %v9530_v63  ;;  %v10347_v44 = vld [vmem:[%s14312_s7 + $0xa94] sm:$0xf0]  ;;  %v10022_v11 = vld [vmem:[%s14312_s7 + $0x74] sm:$0xf] }
 0x44b   : > { %6652 = vmatmul.bf16.vlgmr.msrb.gmra.mxu1 %v13033_v1  ;;  %v9595_v0 = vor.u32 %v10367_v61, %v9594_v17  ;;  %v6471_v49 = vpop.f32.mrf.mxu2  ;;  %v8220_v17 = vld [vmem:[%s14312_s7 + $0x78] sm:$0xf0]  ;;  %v10038_v61 = vld [vmem:[%s14312_s7 + $0xf4] sm:$0xf] }
 0x44c   : > { %v6484_v26 = vpop.f32.mrf.mxu3  ;;  %v8223_v32 = vor.u32 %v10022_v11, %v8220_v17  ;;  %v9722_v11 = vld [vmem:[%s14312_s7 + $0xc30] sm:$0xf]  ;;  %v10399_v17 = vld [vmem:[%s14312_s7 + $0xc34] sm:$0xf0] }
 0x44d   : > { %6658 = vmatpush.bf16.msrb.mxu2 %v9555_v47  ;;  %v6472_v47 = vadd.f32 %v6471_v49, %v6459_v21  ;;  %v9578_v21 = vld [vmem:[%s14312_s7 + $0xb10] sm:$0xf]  ;;  %v8287_v49 = vor.u32 %v10038_v61, %v8284_v33  ;;  %v10014_v61 = vld [vmem:[%s14312_s7 + $0x34] sm:$0xf] }
 0x44e   : > { %6671 = vmatpush.bf16.msrb.mxu3 %v9619_v2  ;;  %6684 = vmatpush.bf16.msra.mxu1 %v9683_v57  ;;  %v9523_v2 = vor.u32 %v10349_v54, %v9522_v14  ;;  %v9514_v57 = vld [vmem:[%s14312_s7 + $0xa90] sm:$0xf]  ;;  %v3976_v54 = vld [vmem:[#allocation3 + $0x15] sm:$0x1] }
 0x44f   : > { %v6485_v29 = vadd.f32 %v6484_v26, %v6472_v47  ;;  %v9515_v38 = vor.u32 %v10347_v44, %v9514_v57  ;;  %v9746_v26 = vld [vmem:[%s14312_s7 + $0xc60] sm:$0xf]  ;;  %v8212_v47 = vld [vmem:[%s14312_s7 + $0x68] sm:$0xf0]  ;;  %v13188_v57 = vpack.c.bf16 %v3976_v54, %v3976_v54 }
 0x450   : > { %v6499_v27 = vpop.f32.mrf.mxu1 }
 0x451   : > { %6659 = vmatpush.bf16.msrb.mxu2 %v9547_v16  ;;  %v13115_v13 = vpop.f32.mrf.mxu0  ;;  %v10363_v16 = vld [vmem:[%s14312_s7 + $0xb14] sm:$0xf0]  ;;  %v13190_v27 = vpack.c.bf16 %v3980_v42, %v3980_v42  ;;  %v9714_v42 = vld [vmem:[%s14312_s7 + $0xc20] sm:$0xf] }
 0x452   : > { %6672 = vmatpush.bf16.msrb.mxu3 %v9611_v31  ;;  %6685 = vmatpush.bf16.msra.mxu1 %v9675_v19  ;;  %v9642_v31 = vld [vmem:[%s14312_s7 + $0xb90] sm:$0xf]  ;;  %v13132_v19 = vadd.f32 %v6497_v10, %v6485_v29  ;;  %v9579_v6 = vor.u32 %v10363_v16, %v9578_v21  ;;  %v9747_v29 = vor.u32 %v10405_v7, %v9746_v26  ;;  %v10403_v16 = vld [vmem:[%s14312_s7 + $0xc54] sm:$0xf0]  ;;  %v8180_v26 = vld [vmem:[%s14312_s7 + $0x28] sm:$0xf0] }
 0x453   : > { %v9643_v12 = vor.u32 %v10379_v30, %v9642_v31  ;;  %v9754_v10 = vld [vmem:[%s14312_s7 + $0xc70] sm:$0xf]  ;;  %v10018_v31 = vld [vmem:[%s14312_s7 + $0x54] sm:$0xf]  ;;  %v8204_v30 = vld [vmem:[%s14312_s7 + $0x58] sm:$0xf0] }
 0x454   : > { %v6486_v63 = vpop.f32.mrf.mxu3  ;;  %v9738_v21 = vld [vmem:[%s14312_s7 + $0xc50] sm:$0xf]  ;;  %v8207_v15 = vor.u32 %v10018_v31, %v8204_v30  ;;  %v10028_v7 = vld [vmem:[%s14312_s7 + $0xa4] sm:$0xf]  ;;  %v10010_v31 = vld [vmem:[%s14312_s7 + $0x14] sm:$0xf] }
 0x455   : > { %6660 = vmatpush.bf16.msrb.mxu2 %v9539_v25  ;;  %v10377_v25 = vld [vmem:[%s14312_s7 + $0xb84] sm:$0xf0]  ;;  %v9739_v40 = vor.u32 %v10403_v16, %v9738_v21  ;;  %v9706_v21 = vld [vmem:[%s14312_s7 + $0xc10] sm:$0xf]  ;;  %v10395_v16 = vld [vmem:[%s14312_s7 + $0xc14] sm:$0xf0] }
 0x456   : > { %6673 = vmatpush.bf16.msrb.mxu3 %v9603_v60  ;;  %6686 = vmatpush.bf16.msra.mxu1 %v9667_v48  ;;  %v6473_v60 = vpop.f32.mrf.mxu2  ;;  %v10407_v48 = vld [vmem:[%s14312_s7 + $0xc74] sm:$0xf0] }
 0x457   : > { %v8260_v60 = vld [vmem:[%s14312_s7 + $0xc8] sm:$0xf0] }
 0x459   : > { %6661 = vmatpush.bf16.msrb.mxu2 %v9531_v20  ;;  %v9571_v20 = vor.u32 %v10361_v52, %v9570_v3  ;;  %v6954_v14 = vpop.f32.mrf.mxu0  ;;  %v9730_v3 = vld [vmem:[%s14312_s7 + $0xc40] sm:$0xf]  ;;  %v10016_v52 = vld [vmem:[%s14312_s7 + $0x44] sm:$0xf] }
 0x45a   : > { %6674 = vmatpush.bf16.msrb.mxu3 %v9595_v0  ;;  %6687 = vmatpush.bf16.msra.mxu1 %v9659_v8  ;;  %v9635_v0 = vor.u32 %v10377_v25, %v9634_v43  ;;  %v9755_v8 = vor.u32 %v10407_v48, %v9754_v10  ;;  %v8196_v43 = vld [vmem:[%s14312_s7 + $0x48] sm:$0xf0]  ;;  %v10032_v25 = vld [vmem:[%s14312_s7 + $0xc4] sm:$0xf]  ;;  %v9723_v14 = vor.u32 %v10399_v17, %v9722_v11  ;;  %v10054_v11 = vld [vmem:[%s14312_s7 + $0x174] sm:$0xf] }
 0x45b   : > { %v8199_v10 = vor.u32 %v10016_v52, %v8196_v43  ;;  %v8263_v48 = vor.u32 %v10032_v25, %v8260_v60  ;;  %v10393_v25 = vld [vmem:[%s14312_s7 + $0xc04] sm:$0xf0]  ;;  %v10008_v60 = vld [vmem:[%s14312_s7 + $0x4] sm:$0xf] }
 0x45d   : > { %6662 = vmatpush.bf16.msrb.mxu2 %v9523_v2  ;;  %v10036_v2 = vld [vmem:[%s14312_s7 + $0xe4] sm:$0xf] }
 0x45e   : > { %6675 = vmatpush.bf16.msrb.mxu3 %v9587_v62  ;;  %6688 = vmatpush.bf16.msra.mxu1 %v9651_v56  ;;  %v8276_v62 = vld [vmem:[%s14312_s7 + $0xe8] sm:$0xf0]  ;;  %v8215_v56 = vor.u32 %v10020_v34, %v8212_v47 }
 0x45f   : > { %v8279_v44 = vor.u32 %v10036_v2, %v8276_v62  ;;  %v8244_v34 = vld [vmem:[%s14312_s7 + $0xa8] sm:$0xf0] }
 0x461   : > { %6663 = vmatpush.bf16.msrb.mxu2 %v9515_v38  ;;  %v10034_v38 = vld [vmem:[%s14312_s7 + $0xd4] sm:$0xf] }
 0x462   : > { %6676 = vmatpush.bf16.msrb.mxu3 %v9579_v6  ;;  %6689 = vmatpush.bf16.msra.mxu1 %v9643_v12  ;;  %v8268_v6 = vld [vmem:[%s14312_s7 + $0xd8] sm:$0xf0]  ;;  %v10401_v12 = vld [vmem:[%s14312_s7 + $0xc44] sm:$0xf0] }
 0x463   : > { %v9731_v63 = vor.u32 %v10401_v12, %v9730_v3  ;;  %v9698_v3 = vld [vmem:[%s14312_s7 + $0xc00] sm:$0xf] }
 0x465   : > { %6664 = vmatpush.bf16.msrb.mxu2 %v9507_v36  ;;  %v8188_v36 = vld [vmem:[%s14312_s7 + $0x38] sm:$0xf0] }
 0x466   : > { %6677 = vmatpush.bf16.msrb.mxu3 %v9571_v20  ;;  %6690 = vmatpush.bf16.msra.mxu1 %v9635_v0  ;;  %v10030_v20 = vld [vmem:[%s14312_s7 + $0xb4] sm:$0xf]  ;;  %v8252_v0 = vld [vmem:[%s14312_s7 + $0xb8] sm:$0xf0] }
 0x467   : > { %v8255_v54 = vor.u32 %v10030_v20, %v8252_v0  ;;  %v8412_v20 = vld [vmem:[%s14312_s7 + $0x1f8] sm:$0xf0]  ;;  %v9699_v0 = vor.u32 %v10393_v25, %v9698_v3  ;;  %v10048_v25 = vld [vmem:[%s14312_s7 + $0x144] sm:$0xf] }
 0x468   : > { %6665 = vmatmul.bf16.vlgmr.msrb.gmra.mxu2 %v13188_v57  ;;  %v6536_v33 = vpop.f32.mrf.mxu1  ;;  %v8460_v3 = vld [vmem:[%s14312_s7 + $0x258] sm:$0xf0] }
 0x469   : > { %6696 = vmatpush.bf16.msra.mxu2 %v9755_v8  ;;  %6678 = vmatmul.bf16.vlgmr.msrb.gmra.mxu3 %v12614_v45  ;;  %v8271_v45 = vor.u32 %v10034_v38, %v8268_v6  ;;  %v8191_v8 = vor.u32 %v10014_v61, %v8188_v36  ;;  %v8172_v6 = vld [vmem:[%s14312_s7 + $0x18] sm:$0xf0]  ;;  %v10070_v36 = vld [vmem:[%s14312_s7 + $0x1f4] sm:$0xf] }
 0x46a   : > { %6709 = vmatpush.bf16.msra.mxu3 %v8223_v32  ;;  %6722 = vmatpush.bf16.msrb.mxu1 %v8287_v49  ;;  %v10397_v32 = vld [vmem:[%s14312_s7 + $0xc24] sm:$0xf0]  ;;  %v10012_v49 = vld [vmem:[%s14312_s7 + $0x24] sm:$0xf]  ;;  %v8175_v52 = vor.u32 %v10010_v31, %v8172_v6  ;;  %v8332_v6 = vld [vmem:[%s14312_s7 + $0x158] sm:$0xf0] }
 0x46b   : > { %6691 = vmatmul.bf16.vlgmr.msra.gmra.mxu1 %v13190_v27  ;;  %v6510_v47 = vpop.f32.mrf.mxu2 }
 0x46c   : > { %v6523_v2 = vpop.f32.mrf.mxu3  ;;  %v6511_v62 = vadd.f32 %v6510_v47, %v13132_v19 }
 0x46d   : > { %6697 = vmatpush.bf16.msra.mxu2 %v9747_v29  ;;  %v9715_v29 = vor.u32 %v10397_v32, %v9714_v42 }
 0x46e   : > { %6710 = vmatpush.bf16.msra.mxu3 %v8215_v56  ;;  %6723 = vmatpush.bf16.msrb.mxu1 %v8279_v44  ;;  %v8183_v56 = vor.u32 %v10012_v49, %v8180_v26  ;;  %v8247_v44 = vor.u32 %v10028_v7, %v8244_v34  ;;  %v6524_v30 = vadd.f32 %v6523_v2, %v6511_v62  ;;  %v3982_v7 = vld [vmem:[#allocation3 + $0x18] sm:$0x1]  ;;  %v10052_v34 = vld [vmem:[%s14312_s7 + $0x164] sm:$0xf]  ;;  %v8340_v2 = vld [vmem:[%s14312_s7 + $0x168] sm:$0xf0] }
 0x46f   : > { %v8415_v26 = vor.u32 %v10070_v36, %v8412_v20  ;;  %v10068_v62 = vld [vmem:[%s14312_s7 + $0x1e4] sm:$0xf]  ;;  %v8316_v20 = vld [vmem:[%s14312_s7 + $0x138] sm:$0xf0] }
 0x470   : > { %v6538_v38 = vpop.f32.mrf.mxu1  ;;  %v13277_v19 = vpop.f32.mrf.mxu0  ;;  %v13291_v12 = vadd.f32 %v6536_v33, %v6524_v30  ;;  %v8348_v33 = vld [vmem:[%s14312_s7 + $0x178] sm:$0xf0]  ;;  %v10050_v30 = vld [vmem:[%s14312_s7 + $0x154] sm:$0xf] }
 0x471   : > { %6698 = vmatpush.bf16.msra.mxu2 %v9739_v40  ;;  %v10026_v40 = vld [vmem:[%s14312_s7 + $0x94] sm:$0xf]  ;;  %v8351_v49 = vor.u32 %v10054_v11, %v8348_v33 }
 0x472   : > { %6711 = vmatpush.bf16.msra.mxu3 %v8207_v15  ;;  %6724 = vmatpush.bf16.msrb.mxu1 %v8271_v45  ;;  %v8236_v15 = vld [vmem:[%s14312_s7 + $0x98] sm:$0xf0]  ;;  %v9707_v45 = vor.u32 %v10395_v16, %v9706_v21  ;;  %v13344_v21 = vpack.c.bf16 %v3982_v7, %v3982_v7  ;;  %v8343_v16 = vor.u32 %v10052_v34, %v8340_v2  ;;  %v8308_v7 = vld [vmem:[%s14312_s7 + $0x128] sm:$0xf0]  ;;  %v10060_v34 = vld [vmem:[%s14312_s7 + $0x1a4] sm:$0xf] }
 0x473   : > { %v8239_v43 = vor.u32 %v10026_v40, %v8236_v15  ;;  %v6512_v17 = vpop.f32.mrf.mxu2  ;;  %v10066_v40 = vld [vmem:[%s14312_s7 + $0x1d4] sm:$0xf]  ;;  %v8396_v15 = vld [vmem:[%s14312_s7 + $0x1d8] sm:$0xf0] }
 0x474   : > { %v6525_v61 = vpop.f32.mrf.mxu3 }
 0x475   : > { %6699 = vmatpush.bf16.msra.mxu2 %v9731_v63  ;;  %v8164_v63 = vld [vmem:[%s14312_s7 + $0x8] sm:$0xf0]  ;;  %v10046_v61 = vld [vmem:[%s14312_s7 + $0x134] sm:$0xf] }
 0x476   : > { %6712 = vmatpush.bf16.msra.mxu3 %v8199_v10  ;;  %6725 = vmatpush.bf16.msrb.mxu1 %v8263_v48  ;;  %v10024_v10 = vld [vmem:[%s14312_s7 + $0x84] sm:$0xf]  ;;  %v8228_v48 = vld [vmem:[%s14312_s7 + $0x88] sm:$0xf0] }
 0x477   : > { %v8231_v42 = vor.u32 %v10024_v10, %v8228_v48  ;;  %v10080_v10 = vld [vmem:[%s14312_s7 + $0x244] sm:$0xf]  ;;  %v8452_v48 = vld [vmem:[%s14312_s7 + $0x248] sm:$0xf0] }
 0x478   : > { %v7006_v32 = vpop.f32.mrf.mxu0  ;;  %v8455_v36 = vor.u32 %v10080_v10, %v8452_v48  ;;  %v8356_v48 = vld [vmem:[%s14312_s7 + $0x188] sm:$0xf0] }
 0x479   : > { %6700 = vmatpush.bf16.msra.mxu2 %v9723_v14  ;;  %v10086_v14 = vld [vmem:[%s14312_s7 + $0x274] sm:$0xf] }
 0x47a   : > { %6713 = vmatpush.bf16.msra.mxu3 %v8191_v8  ;;  %6726 = vmatpush.bf16.msrb.mxu1 %v8255_v54  ;;  %v8476_v8 = vld [vmem:[%s14312_s7 + $0x278] sm:$0xf0]  ;;  %v8167_v54 = vor.u32 %v10008_v60, %v8164_v63  ;;  %v10064_v60 = vld [vmem:[%s14312_s7 + $0x1c4] sm:$0xf]  ;;  %v8388_v63 = vld [vmem:[%s14312_s7 + $0x1c8] sm:$0xf0] }
 0x47b   : > { %v8479_v47 = vor.u32 %v10086_v14, %v8476_v8  ;;  %v8391_v17 = vor.u32 %v10064_v60, %v8388_v63  ;;  %v8380_v14 = vld [vmem:[%s14312_s7 + $0x1b8] sm:$0xf0]  ;;  %v10078_v8 = vld [vmem:[%s14312_s7 + $0x234] sm:$0xf]  ;;  %v8292_v60 = vld [vmem:[%s14312_s7 + $0x108] sm:$0xf0] }
 0x47c   : > { %v10056_v63 = vld [vmem:[%s14312_s7 + $0x184] sm:$0xf] }
 0x47d   : > { %6701 = vmatpush.bf16.msra.mxu2 %v9715_v29  ;;  %v8404_v29 = vld [vmem:[%s14312_s7 + $0x1e8] sm:$0xf0] }
 0x47e   : > { %6714 = vmatpush.bf16.msra.mxu3 %v8183_v56  ;;  %6727 = vmatpush.bf16.msrb.mxu1 %v8247_v44  ;;  %v10084_v56 = vld [vmem:[%s14312_s7 + $0x264] sm:$0xf]  ;;  %v8468_v44 = vld [vmem:[%s14312_s7 + $0x268] sm:$0xf0]  ;;  %v8407_v31 = vor.u32 %v10068_v62, %v8404_v29 }
 0x47f   : > { %v8471_v38 = vor.u32 %v10084_v56, %v8468_v44  ;;  %v10076_v62 = vld [vmem:[%s14312_s7 + $0x224] sm:$0xf]  ;;  %v8436_v29 = vld [vmem:[%s14312_s7 + $0x228] sm:$0xf0] }
 0x481   : > { %6702 = vmatpush.bf16.msra.mxu2 %v9707_v45  ;;  %v10082_v45 = vld [vmem:[%s14312_s7 + $0x254] sm:$0xf] }
 0x482   : > { %6715 = vmatpush.bf16.msra.mxu3 %v8175_v52  ;;  %6728 = vmatpush.bf16.msrb.mxu1 %v8239_v43  ;;  %v8335_v52 = vor.u32 %v10050_v30, %v8332_v6  ;;  %v8399_v43 = vor.u32 %v10066_v40, %v8396_v15  ;;  %v10042_v30 = vld [vmem:[%s14312_s7 + $0x114] sm:$0xf]  ;;  %v8439_v40 = vor.u32 %v10076_v62, %v8436_v29  ;;  %v8300_v15 = vld [vmem:[%s14312_s7 + $0x118] sm:$0xf0]  ;;  %v10116_v62 = vld [vmem:[%s14312_s7 + $0x364] sm:$0xf] }
 0x483   : > { %v8596_v29 = vld [vmem:[%s14312_s7 + $0x368] sm:$0xf0] }
 0x485   : > { %6703 = vmatpush.bf16.msra.mxu2 %v9699_v0  ;;  %v10062_v0 = vld [vmem:[%s14312_s7 + $0x1b4] sm:$0xf] }
 0x486   : > { %6716 = vmatpush.bf16.msra.mxu3 %v8167_v54  ;;  %6729 = vmatpush.bf16.msrb.mxu1 %v8231_v42  ;;  %v8444_v54 = vld [vmem:[%s14312_s7 + $0x238] sm:$0xf0]  ;;  %v8319_v42 = vor.u32 %v10046_v61, %v8316_v20  ;;  %v8383_v32 = vor.u32 %v10062_v0, %v8380_v14  ;;  %v10118_v20 = vld [vmem:[%s14312_s7 + $0x374] sm:$0xf] }
 0x487   : > { %v8604_v14 = vld [vmem:[%s14312_s7 + $0x378] sm:$0xf0] }
 0x488   : > { %6704 = vmatmul.bf16.vlgmr.msra.gmra.mxu2 %v13344_v21  ;;  %v6575_v33 = vpop.f32.mrf.mxu1 }
 0x489   : > { %6735 = vmatpush.bf16.msrb.mxu2 %v8351_v49  ;;  %6717 = vmatmul.bf16.vlgmr.msra.gmra.mxu3 %v12126_v4  ;;  %v8463_v4 = vor.u32 %v10082_v45, %v8460_v3  ;;  %v10044_v49 = vld [vmem:[%s14312_s7 + $0x124] sm:$0xf]  ;;  %v8364_v45 = vld [vmem:[%s14312_s7 + $0x198] sm:$0xf0]  ;;  %v10074_v3 = vld [vmem:[%s14312_s7 + $0x214] sm:$0xf] }
 0x48a   : > { %6748 = vmatpush.bf16.msrb.mxu3 %v8415_v26  ;;  %6761 = vmatpush.bf16.msra.mxu1 %v8479_v47  ;;  %v8447_v26 = vor.u32 %v10078_v8, %v8444_v54  ;;  %v8372_v47 = vld [vmem:[%s14312_s7 + $0x1a8] sm:$0xf0]  ;;  %v10134_v8 = vld [vmem:[%s14312_s7 + $0x3f4] sm:$0xf]  ;;  %v8668_v54 = vld [vmem:[%s14312_s7 + $0x3f8] sm:$0xf0] }
 0x48b   : > { %6730 = vmatmul.bf16.vlgmr.msrb.gmra.mxu1 %v12128_v9  ;;  %v8324_v9 = vld [vmem:[%s14312_s7 + $0x148] sm:$0xf0]  ;;  %v6549_v2 = vpop.f32.mrf.mxu2 }
 0x48c   : > { %v8327_v11 = vor.u32 %v10048_v25, %v8324_v9  ;;  %v6550_v56 = vadd.f32 %v6549_v2, %v13291_v12  ;;  %v6562_v44 = vpop.f32.mrf.mxu3  ;;  %v10058_v12 = vld [vmem:[%s14312_s7 + $0x194] sm:$0xf]  ;;  %v8303_v25 = vor.u32 %v10042_v30, %v8300_v15  ;;  %v10040_v9 = vld [vmem:[%s14312_s7 + $0x104] sm:$0xf]  ;;  %v8532_v2 = vld [vmem:[%s14312_s7 + $0x2e8] sm:$0xf0] }
 0x48d   : > { %6736 = vmatpush.bf16.msrb.mxu2 %v8343_v16  ;;  %v8311_v16 = vor.u32 %v10044_v49, %v8308_v7  ;;  %v8607_v7 = vor.u32 %v10118_v20, %v8604_v14  ;;  %v8588_v15 = vld [vmem:[%s14312_s7 + $0x358] sm:$0xf0]  ;;  %v10126_v20 = vld [vmem:[%s14312_s7 + $0x3b4] sm:$0xf] }
 0x48e   : > { %6749 = vmatpush.bf16.msrb.mxu3 %v8407_v31  ;;  %6762 = vmatpush.bf16.msra.mxu1 %v8471_v38  ;;  %v8375_v31 = vor.u32 %v10060_v34, %v8372_v47  ;;  %v6563_v38 = vadd.f32 %v6562_v44, %v6550_v56  ;;  %v8671_v34 = vor.u32 %v10134_v8, %v8668_v54  ;;  %v10100_v47 = vld [vmem:[%s14312_s7 + $0x2e4] sm:$0xf]  ;;  %v8660_v44 = vld [vmem:[%s14312_s7 + $0x3e8] sm:$0xf0] }
 0x48f   : > { %v10132_v56 = vld [vmem:[%s14312_s7 + $0x3e4] sm:$0xf] }
 0x490   : > { %v6577_v6 = vpop.f32.mrf.mxu1  ;;  %v8663_v30 = vor.u32 %v10132_v56, %v8660_v44 }
 0x491   : > { %6737 = vmatpush.bf16.msrb.mxu2 %v8335_v52  ;;  %v8428_v52 = vld [vmem:[%s14312_s7 + $0x218] sm:$0xf0] }
 0x492   : > { %6750 = vmatpush.bf16.msrb.mxu3 %v8399_v43  ;;  %6763 = vmatpush.bf16.msra.mxu1 %v8463_v4  ;;  %v13440_v43 = vadd.f32 %v6575_v33, %v6563_v38  ;;  %v8367_v4 = vor.u32 %v10058_v12, %v8364_v45  ;;  %v8431_v10 = vor.u32 %v10074_v3, %v8428_v52  ;;  %v10102_v33 = vld [vmem:[%s14312_s7 + $0x2f4] sm:$0xf]  ;;  %v8524_v6 = vld [vmem:[%s14312_s7 + $0x2d8] sm:$0xf0]  ;;  %v10096_v52 = vld [vmem:[%s14312_s7 + $0x2c4] sm:$0xf] }
 0x493   : > { %v6551_v61 = vpop.f32.mrf.mxu2  ;;  %v10098_v38 = vld [vmem:[%s14312_s7 + $0x2d4] sm:$0xf]  ;;  %v8652_v45 = vld [vmem:[%s14312_s7 + $0x3d8] sm:$0xf0] }
 0x494   : > { %v6564_v0 = vpop.f32.mrf.mxu3  ;;  %v10130_v12 = vld [vmem:[%s14312_s7 + $0x3d4] sm:$0xf]  ;;  %v8527_v3 = vor.u32 %v10098_v38, %v8524_v6 }
 0x495   : > { %6738 = vmatpush.bf16.msrb.mxu2 %v8327_v11  ;;  %v10072_v11 = vld [vmem:[%s14312_s7 + $0x204] sm:$0xf]  ;;  %v10110_v61 = vld [vmem:[%s14312_s7 + $0x334] sm:$0xf]  ;;  %v8636_v0 = vld [vmem:[%s14312_s7 + $0x3b8] sm:$0xf0] }
 0x496   : > { %6751 = vmatpush.bf16.msrb.mxu3 %v8391_v17  ;;  %6764 = vmatpush.bf16.msra.mxu1 %v8455_v36  ;;  %v8420_v17 = vld [vmem:[%s14312_s7 + $0x208] sm:$0xf0]  ;;  %v8540_v36 = vld [vmem:[%s14312_s7 + $0x2f8] sm:$0xf0]  ;;  %v8639_v54 = vor.u32 %v10126_v20, %v8636_v0 }
 0x497   : > { %v8423_v49 = vor.u32 %v10072_v11, %v8420_v17  ;;  %v10094_v11 = vld [vmem:[%s14312_s7 + $0x2b4] sm:$0xf]  ;;  %v8508_v17 = vld [vmem:[%s14312_s7 + $0x2b8] sm:$0xf0] }
 0x498   : > { %v8511_v14 = vor.u32 %v10094_v11, %v8508_v17  ;;  %v10166_v11 = vld [vmem:[%s14312_s7 + $0x4f4] sm:$0xf]  ;;  %v8796_v17 = vld [vmem:[%s14312_s7 + $0x4f8] sm:$0xf0] }
 0x499   : > { %6739 = vmatpush.bf16.msrb.mxu2 %v8319_v42  ;;  %v8295_v42 = vor.u32 %v10040_v9, %v8292_v60  ;;  %v10128_v9 = vld [vmem:[%s14312_s7 + $0x3c4] sm:$0xf]  ;;  %v8644_v60 = vld [vmem:[%s14312_s7 + $0x3c8] sm:$0xf0] }
 0x49a   : > { %6752 = vmatpush.bf16.msrb.mxu3 %v8383_v32  ;;  %6765 = vmatpush.bf16.msra.mxu1 %v8447_v26  ;;  %v8359_v32 = vor.u32 %v10056_v63, %v8356_v48  ;;  %v8543_v26 = vor.u32 %v10102_v33, %v8540_v36  ;;  %v8647_v48 = vor.u32 %v10128_v9, %v8644_v60  ;;  %v8572_v36 = vld [vmem:[%s14312_s7 + $0x338] sm:$0xf0]  ;;  %v8612_v9 = vld [vmem:[%s14312_s7 + $0x388] sm:$0xf0]  ;;  %v10150_v60 = vld [vmem:[%s14312_s7 + $0x474] sm:$0xf] }
 0x49b   : > { %v8575_v8 = vor.u32 %v10110_v61, %v8572_v36  ;;  %v8924_v36 = vld [vmem:[%s14312_s7 + $0x5f8] sm:$0xf0] }
 0x49d   : > { %6740 = vmatpush.bf16.msrb.mxu2 %v8311_v16  ;;  %v8535_v16 = vor.u32 %v10100_v47, %v8532_v2 }
 0x49e   : > { %6753 = vmatpush.bf16.msrb.mxu3 %v8375_v31  ;;  %6766 = vmatpush.bf16.msra.mxu1 %v8439_v40  ;;  %v8599_v31 = vor.u32 %v10116_v62, %v8596_v29  ;;  %v10114_v40 = vld [vmem:[%s14312_s7 + $0x354] sm:$0xf] }
 0x4a1   : > { %6741 = vmatpush.bf16.msrb.mxu2 %v8303_v25  ;;  %v8516_v25 = vld [vmem:[%s14312_s7 + $0x2c8] sm:$0xf0] }
 0x4a2   : > { %6754 = vmatpush.bf16.msrb.mxu3 %v8367_v4  ;;  %6767 = vmatpush.bf16.msra.mxu1 %v8431_v10  ;;  %v10112_v4 = vld [vmem:[%s14312_s7 + $0x344] sm:$0xf]  ;;  %v8519_v63 = vor.u32 %v10096_v52, %v8516_v25  ;;  %v8484_v52 = vld [vmem:[%s14312_s7 + $0x288] sm:$0xf0] }
 0x4a3   : > { %v10104_v25 = vld [vmem:[%s14312_s7 + $0x304] sm:$0xf] }
 0x4a5   : > { %6742 = vmatpush.bf16.msrb.mxu2 %v8295_v42  ;;  %v10092_v42 = vld [vmem:[%s14312_s7 + $0x2a4] sm:$0xf] }
 0x4a6   : > { %6755 = vmatpush.bf16.msrb.mxu3 %v8359_v32  ;;  %6768 = vmatpush.bf16.msra.mxu1 %v8423_v49  ;;  %v8500_v32 = vld [vmem:[%s14312_s7 + $0x2a8] sm:$0xf0]  ;;  %v10108_v49 = vld [vmem:[%s14312_s7 + $0x324] sm:$0xf] }
 0x4a7   : > { %v8503_v29 = vor.u32 %v10092_v42, %v8500_v32  ;;  %v8724_v32 = vld [vmem:[%s14312_s7 + $0x468] sm:$0xf0] }
 0x4a8   : > { %6743 = vmatmul.bf16.vlgmr.msrb.gmra.mxu2 %v12130_v46  ;;  %v8591_v46 = vor.u32 %v10114_v40, %v8588_v15  ;;  %v6614_v33 = vpop.f32.mrf.mxu1  ;;  %v10122_v40 = vld [vmem:[%s14312_s7 + $0x394] sm:$0xf]  ;;  %v8620_v15 = vld [vmem:[%s14312_s7 + $0x398] sm:$0xf0] }
 0x4a9   : > { %6774 = vmatpush.bf16.msra.mxu2 %v8543_v26  ;;  %6756 = vmatmul.bf16.vlgmr.msrb.gmra.mxu3 %v12236_v28  ;;  %v8655_v28 = vor.u32 %v10130_v12, %v8652_v45  ;;  %v8564_v26 = vld [vmem:[%s14312_s7 + $0x328] sm:$0xf0]  ;;  %v10088_v45 = vld [vmem:[%s14312_s7 + $0x284] sm:$0xf] }
 0x4aa   : > { %6787 = vmatpush.bf16.msra.mxu3 %v8607_v7  ;;  %6800 = vmatpush.bf16.msrb.mxu1 %v8671_v34  ;;  %v10124_v7 = vld [vmem:[%s14312_s7 + $0x3a4] sm:$0xf]  ;;  %v8628_v34 = vld [vmem:[%s14312_s7 + $0x3a8] sm:$0xf0]  ;;  %v8567_v56 = vor.u32 %v10108_v49, %v8564_v26  ;;  %v8487_v61 = vor.u32 %v10088_v45, %v8484_v52 }
 0x4ab   : > { %6769 = vmatmul.bf16.vlgmr.msra.gmra.mxu1 %v12238_v50  ;;  %v8580_v50 = vld [vmem:[%s14312_s7 + $0x348] sm:$0xf0]  ;;  %v6588_v47 = vpop.f32.mrf.mxu2  ;;  %v8631_v44 = vor.u32 %v10124_v7, %v8628_v34  ;;  %v10164_v49 = vld [vmem:[%s14312_s7 + $0x4e4] sm:$0xf] }
 0x4ac   : > { %v8583_v10 = vor.u32 %v10112_v4, %v8580_v50  ;;  %v6601_v2 = vpop.f32.mrf.mxu3  ;;  %v6589_v62 = vadd.f32 %v6588_v47, %v13440_v43  ;;  %v8556_v43 = vld [vmem:[%s14312_s7 + $0x318] sm:$0xf0]  ;;  %v8548_v4 = vld [vmem:[%s14312_s7 + $0x308] sm:$0xf0]  ;;  %v10120_v50 = vld [vmem:[%s14312_s7 + $0x384] sm:$0xf] }
 0x4ad   : > { %6775 = vmatpush.bf16.msra.mxu2 %v8535_v16  ;;  %v10090_v16 = vld [vmem:[%s14312_s7 + $0x294] sm:$0xf]  ;;  %v8551_v20 = vor.u32 %v10104_v25, %v8548_v4  ;;  %v8615_v0 = vor.u32 %v10120_v50, %v8612_v9  ;;  %v8788_v26 = vld [vmem:[%s14312_s7 + $0x4e8] sm:$0xf0]  ;;  %v10196_v7 = vld [vmem:[%s14312_s7 + $0x5e4] sm:$0xf] }
 0x4ae   : > { %6788 = vmatpush.bf16.msra.mxu3 %v8599_v31  ;;  %6801 = vmatpush.bf16.msrb.mxu1 %v8663_v30  ;;  %v8492_v31 = vld [vmem:[%s14312_s7 + $0x298] sm:$0xf0]  ;;  %v10106_v30 = vld [vmem:[%s14312_s7 + $0x314] sm:$0xf]  ;;  %v6602_v38 = vadd.f32 %v6601_v2, %v6589_v62  ;;  %v8916_v34 = vld [vmem:[%s14312_s7 + $0x5e8] sm:$0xf0]  ;;  %v8791_v2 = vor.u32 %v10164_v49, %v8788_v26 }
 0x4af   : > { %v8495_v12 = vor.u32 %v10090_v16, %v8492_v31  ;;  %v10146_v62 = vld [vmem:[%s14312_s7 + $0x454] sm:$0xf]  ;;  %v8780_v16 = vld [vmem:[%s14312_s7 + $0x4d8] sm:$0xf0] }
 0x4b0   : > { %v6616_v6 = vpop.f32.mrf.mxu1  ;;  %v8908_v31 = vld [vmem:[%s14312_s7 + $0x5d8] sm:$0xf0]  ;;  %v10158_v50 = vld [vmem:[%s14312_s7 + $0x4b4] sm:$0xf] }
 0x4b1   : > { %6776 = vmatpush.bf16.msra.mxu2 %v8527_v3  ;;  %v13593_v3 = vadd.f32 %v6614_v33, %v6602_v38  ;;  %v10198_v33 = vld [vmem:[%s14312_s7 + $0x5f4] sm:$0xf]  ;;  %v10144_v6 = vld [vmem:[%s14312_s7 + $0x444] sm:$0xf]  ;;  %v8700_v4 = vld [vmem:[%s14312_s7 + $0x438] sm:$0xf0] }
 0x4b2   : > { %6789 = vmatpush.bf16.msra.mxu3 %v8591_v46  ;;  %6802 = vmatpush.bf16.msrb.mxu1 %v8655_v28  ;;  %v8559_v46 = vor.u32 %v10106_v30, %v8556_v43  ;;  %v8623_v28 = vor.u32 %v10122_v40, %v8620_v15  ;;  %v8927_v42 = vor.u32 %v10198_v33, %v8924_v36  ;;  %v10160_v43 = vld [vmem:[%s14312_s7 + $0x4c4] sm:$0xf]  ;;  %v8772_v40 = vld [vmem:[%s14312_s7 + $0x4c8] sm:$0xf0]  ;;  %v8764_v9 = vld [vmem:[%s14312_s7 + $0x4b8] sm:$0xf0] }
 0x4b3   : > { %v10192_v15 = vld [vmem:[%s14312_s7 + $0x5c4] sm:$0xf]  ;;  %v8756_v36 = vld [vmem:[%s14312_s7 + $0x4a8] sm:$0xf0]  ;;  %v10138_v49 = vld [vmem:[%s14312_s7 + $0x414] sm:$0xf] }
 0x4b4   : > { %v10156_v33 = vld [vmem:[%s14312_s7 + $0x4a4] sm:$0xf] }
 0x4b5   : > { %6777 = vmatpush.bf16.msra.mxu2 %v8519_v63  ;;  %v6590_v63 = vpop.f32.mrf.mxu2 }
 0x4b6   : > { %6790 = vmatpush.bf16.msra.mxu3 %v8583_v10  ;;  %6803 = vmatpush.bf16.msrb.mxu1 %v8647_v48  ;;  %v6603_v10 = vpop.f32.mrf.mxu3  ;;  %v8732_v48 = vld [vmem:[%s14312_s7 + $0x478] sm:$0xf0] }
 0x4b7   : > { %v8892_v63 = vld [vmem:[%s14312_s7 + $0x5b8] sm:$0xf0] }
 0x4b9   : > { %6778 = vmatpush.bf16.msra.mxu2 %v8511_v14  ;;  %v8735_v14 = vor.u32 %v10150_v60, %v8732_v48  ;;  %v10190_v60 = vld [vmem:[%s14312_s7 + $0x5b4] sm:$0xf]  ;;  %v8767_v48 = vor.u32 %v10158_v50, %v8764_v9 }
 0x4ba   : > { %6791 = vmatpush.bf16.msra.mxu3 %v8575_v8  ;;  %6804 = vmatpush.bf16.msrb.mxu1 %v8639_v54  ;;  %v8799_v8 = vor.u32 %v10166_v11, %v8796_v17  ;;  %v10148_v54 = vld [vmem:[%s14312_s7 + $0x464] sm:$0xf]  ;;  %v8895_v17 = vor.u32 %v10190_v60, %v8892_v63 }
 0x4bb   : > { %v8727_v47 = vor.u32 %v10148_v54, %v8724_v32  ;;  %v10140_v11 = vld [vmem:[%s14312_s7 + $0x424] sm:$0xf]  ;;  %v8759_v32 = vor.u32 %v10156_v33, %v8756_v36  ;;  %v9172_v33 = vld [vmem:[%s14312_s7 + $0x7e8] sm:$0xf0] }
 0x4bd   : > { %6779 = vmatpush.bf16.msra.mxu2 %v8503_v29  ;;  %v8919_v29 = vor.u32 %v10196_v7, %v8916_v34 }
 0x4be   : > { %6792 = vmatpush.bf16.msra.mxu3 %v8567_v56  ;;  %6805 = vmatpush.bf16.msrb.mxu1 %v8631_v44  ;;  %v8716_v56 = vld [vmem:[%s14312_s7 + $0x458] sm:$0xf0]  ;;  %v10162_v44 = vld [vmem:[%s14312_s7 + $0x4d4] sm:$0xf] }
 0x4bf   : > { %v8719_v30 = vor.u32 %v10146_v62, %v8716_v56  ;;  %v8783_v38 = vor.u32 %v10162_v44, %v8780_v16  ;;  %v10186_v62 = vld [vmem:[%s14312_s7 + $0x594] sm:$0xf] }
 0x4c1   : > { %6780 = vmatpush.bf16.msra.mxu2 %v8495_v12  ;;  %v8900_v12 = vld [vmem:[%s14312_s7 + $0x5c8] sm:$0xf0] }
 0x4c2   : > { %6793 = vmatpush.bf16.msra.mxu3 %v8559_v46  ;;  %6806 = vmatpush.bf16.msrb.mxu1 %v8623_v28  ;;  %v8775_v46 = vor.u32 %v10160_v43, %v8772_v40  ;;  %v10142_v28 = vld [vmem:[%s14312_s7 + $0x434] sm:$0xf]  ;;  %v8903_v25 = vor.u32 %v10192_v15, %v8900_v12  ;;  %v8988_v15 = vld [vmem:[%s14312_s7 + $0x678] sm:$0xf0] }
 0x4c3   : > { %v8703_v10 = vor.u32 %v10142_v28, %v8700_v4  ;;  %v10214_v40 = vld [vmem:[%s14312_s7 + $0x674] sm:$0xf] }
 0x4c4   : > { %v10230_v12 = vld [vmem:[%s14312_s7 + $0x6f4] sm:$0xf]  ;;  %v8991_v9 = vor.u32 %v10214_v40, %v8988_v15  ;;  %v10204_v15 = vld [vmem:[%s14312_s7 + $0x624] sm:$0xf] }
 0x4c5   : > { %6781 = vmatpush.bf16.msra.mxu2 %v8487_v61  ;;  %v8692_v61 = vld [vmem:[%s14312_s7 + $0x428] sm:$0xf0]  ;;  %v10262_v28 = vld [vmem:[%s14312_s7 + $0x7f4] sm:$0xf] }
 0x4c6   : > { %6794 = vmatpush.bf16.msra.mxu3 %v8551_v20  ;;  %6807 = vmatpush.bf16.msrb.mxu1 %v8615_v0  ;;  %v10188_v0 = vld [vmem:[%s14312_s7 + $0x5a4] sm:$0xf] }
 0x4c8   : > { %6782 = vmatmul.bf16.vlgmr.msra.gmra.mxu2 %v12246_v53  ;;  %v10194_v53 = vld [vmem:[%s14312_s7 + $0x5d4] sm:$0xf]  ;;  %v6653_v52 = vpop.f32.mrf.mxu1 }
 0x4c9   : > { %6813 = vmatpush.bf16.msrb.mxu2 %v8735_v14  ;;  %6795 = vmatmul.bf16.vlgmr.msra.gmra.mxu3 %v12361_v5  ;;  %v8911_v5 = vor.u32 %v10194_v53, %v8908_v31  ;;  %v8884_v14 = vld [vmem:[%s14312_s7 + $0x5a8] sm:$0xf0]  ;;  %v10136_v53 = vld [vmem:[%s14312_s7 + $0x404] sm:$0xf] }
 0x4ca   : > { %6826 = vmatpush.bf16.msrb.mxu3 %v8799_v8  ;;  %6852 = vmatpush.bf16.msra.mxu1 %v8927_v42  ;;  %v8695_v42 = vor.u32 %v10140_v11, %v8692_v61  ;;  %v8887_v34 = vor.u32 %v10188_v0, %v8884_v14  ;;  %v8676_v31 = vld [vmem:[%s14312_s7 + $0x408] sm:$0xf0]  ;;  %v10228_v11 = vld [vmem:[%s14312_s7 + $0x6e4] sm:$0xf]  ;;  %v10210_v14 = vld [vmem:[%s14312_s7 + $0x654] sm:$0xf] }
 0x4cb   : > { %6808 = vmatmul.bf16.vlgmr.msrb.gmra.mxu1 %v12363_v55  ;;  %v8708_v55 = vld [vmem:[%s14312_s7 + $0x448] sm:$0xf0]  ;;  %v6627_v20 = vpop.f32.mrf.mxu2  ;;  %v10260_v61 = vld [vmem:[%s14312_s7 + $0x7e4] sm:$0xf] }
 0x4cc   : > { %v8711_v45 = vor.u32 %v10144_v6, %v8708_v55  ;;  %v6628_v8 = vadd.f32 %v6627_v20, %v13593_v3  ;;  %v6640_v54 = vpop.f32.mrf.mxu3  ;;  %v10154_v3 = vld [vmem:[%s14312_s7 + $0x494] sm:$0xf]  ;;  %v8740_v6 = vld [vmem:[%s14312_s7 + $0x488] sm:$0xf0]  ;;  %v9175_v0 = vor.u32 %v10260_v61, %v9172_v33 }
 0x4cd   : > { %6814 = vmatpush.bf16.msrb.mxu2 %v8727_v47  ;;  %v8684_v47 = vld [vmem:[%s14312_s7 + $0x418] sm:$0xf0]  ;;  %v8868_v55 = vld [vmem:[%s14312_s7 + $0x588] sm:$0xf0]  ;;  %v10250_v33 = vld [vmem:[%s14312_s7 + $0x794] sm:$0xf] }
 0x4ce   : > { %6827 = vmatpush.bf16.msrb.mxu3 %v8791_v2  ;;  %6853 = vmatpush.bf16.msra.mxu1 %v8919_v29  ;;  %v6641_v26 = vadd.f32 %v6640_v54, %v6628_v8  ;;  %v8748_v2 = vld [vmem:[%s14312_s7 + $0x498] sm:$0xf0]  ;;  %v8687_v44 = vor.u32 %v10138_v49, %v8684_v47  ;;  %v10226_v54 = vld [vmem:[%s14312_s7 + $0x6d4] sm:$0xf]  ;;  %v10224_v47 = vld [vmem:[%s14312_s7 + $0x6c4] sm:$0xf] }
 0x4cf   : > { %v8876_v29 = vld [vmem:[%s14312_s7 + $0x598] sm:$0xf0]  ;;  %v8751_v16 = vor.u32 %v10154_v3, %v8748_v2  ;;  %v10256_v3 = vld [vmem:[%s14312_s7 + $0x7c4] sm:$0xf]  ;;  %v9156_v2 = vld [vmem:[%s14312_s7 + $0x7c8] sm:$0xf0] }
 0x4d0   : > { %v6655_v7 = vpop.f32.mrf.mxu1  ;;  %v13740_v56 = vadd.f32 %v6653_v52, %v6641_v26  ;;  %v9180_v52 = vld [vmem:[%s14312_s7 + $0x7f8] sm:$0xf0] }
 0x4d1   : > { %6815 = vmatpush.bf16.msrb.mxu2 %v8719_v30  ;;  %v10152_v30 = vld [vmem:[%s14312_s7 + $0x484] sm:$0xf]  ;;  %v9183_v63 = vor.u32 %v10262_v28, %v9180_v52  ;;  %v8972_v8 = vld [vmem:[%s14312_s7 + $0x658] sm:$0xf0]  ;;  %v9140_v52 = vld [vmem:[%s14312_s7 + $0x7a8] sm:$0xf0] }
 0x4d2   : > { %6828 = vmatpush.bf16.msrb.mxu3 %v8783_v38  ;;  %6854 = vmatpush.bf16.msra.mxu1 %v8911_v5  ;;  %v8879_v38 = vor.u32 %v10186_v62, %v8876_v29  ;;  %v10184_v5 = vld [vmem:[%s14312_s7 + $0x584] sm:$0xf]  ;;  %v8743_v4 = vor.u32 %v10152_v30, %v8740_v6  ;;  %v9164_v49 = vld [vmem:[%s14312_s7 + $0x7d8] sm:$0xf0]  ;;  %v8975_v26 = vor.u32 %v10210_v14, %v8972_v8  ;;  %v10254_v6 = vld [vmem:[%s14312_s7 + $0x7b4] sm:$0xf] }
 0x4d3   : > { %v6629_v43 = vpop.f32.mrf.mxu2  ;;  %v8871_v50 = vor.u32 %v10184_v5, %v8868_v55  ;;  %v10208_v7 = vld [vmem:[%s14312_s7 + $0x644] sm:$0xf]  ;;  %v9148_v5 = vld [vmem:[%s14312_s7 + $0x7b8] sm:$0xf0] }
 0x4d4   : > { %v9151_v40 = vor.u32 %v10254_v6, %v9148_v5  ;;  %v10252_v28 = vld [vmem:[%s14312_s7 + $0x7a4] sm:$0xf]  ;;  %v9236_v6 = vld [vmem:[%s14312_s7 + $0x868] sm:$0xf0] }
 0x4d5   : > { %6816 = vmatpush.bf16.msrb.mxu2 %v8711_v45  ;;  %v6642_v45 = vpop.f32.mrf.mxu3  ;;  %v10292_v5 = vld [vmem:[%s14312_s7 + $0x8e4] sm:$0xf] }
 0x4d6   : > { %6829 = vmatpush.bf16.msrb.mxu3 %v8775_v46  ;;  %6855 = vmatpush.bf16.msra.mxu1 %v8903_v25  ;;  %v9052_v46 = vld [vmem:[%s14312_s7 + $0x6f8] sm:$0xf0]  ;;  %v8679_v25 = vor.u32 %v10136_v53, %v8676_v31  ;;  %v10222_v31 = vld [vmem:[%s14312_s7 + $0x6b4] sm:$0xf]  ;;  %v10220_v45 = vld [vmem:[%s14312_s7 + $0x6a4] sm:$0xf] }
 0x4d7   : > { %v9055_v60 = vor.u32 %v10230_v12, %v9052_v46  ;;  %v8956_v53 = vld [vmem:[%s14312_s7 + $0x638] sm:$0xf0]  ;;  %v8948_v12 = vld [vmem:[%s14312_s7 + $0x628] sm:$0xf0] }
 0x4d8   : > { %v9012_v46 = vld [vmem:[%s14312_s7 + $0x6a8] sm:$0xf0] }
 0x4d9   : > { %6817 = vmatpush.bf16.msrb.mxu2 %v8703_v10  ;;  %v10212_v10 = vld [vmem:[%s14312_s7 + $0x664] sm:$0xf] }
 0x4da   : > { %6830 = vmatpush.bf16.msrb.mxu3 %v8767_v48  ;;  %6856 = vmatpush.bf16.msra.mxu1 %v8895_v17  ;;  %v8980_v48 = vld [vmem:[%s14312_s7 + $0x668] sm:$0xf0] }
 0x4db   : > { %v9044_v17 = vld [vmem:[%s14312_s7 + $0x6e8] sm:$0xf0]  ;;  %v8983_v36 = vor.u32 %v10212_v10, %v8980_v48  ;;  %v10202_v10 = vld [vmem:[%s14312_s7 + $0x614] sm:$0xf]  ;;  %v8940_v48 = vld [vmem:[%s14312_s7 + $0x618] sm:$0xf0] }
 0x4dc   : > { %v9047_v20 = vor.u32 %v10228_v11, %v9044_v17  ;;  %v10218_v11 = vld [vmem:[%s14312_s7 + $0x694] sm:$0xf] }
 0x4dd   : > { %6818 = vmatpush.bf16.msrb.mxu2 %v8695_v42  ;;  %v9036_v42 = vld [vmem:[%s14312_s7 + $0x6d8] sm:$0xf0] }
 0x4de   : > { %6831 = vmatpush.bf16.msrb.mxu3 %v8759_v32  ;;  %6857 = vmatpush.bf16.msra.mxu1 %v8887_v34  ;;  %v10258_v32 = vld [vmem:[%s14312_s7 + $0x7d4] sm:$0xf]  ;;  %v8964_v34 = vld [vmem:[%s14312_s7 + $0x648] sm:$0xf0] }
 0x4df   : > { %v8967_v62 = vor.u32 %v10208_v7, %v8964_v34 }
 0x4e1   : > { %6819 = vmatpush.bf16.msrb.mxu2 %v8687_v44  ;;  %v9159_v44 = vor.u32 %v10256_v3, %v9156_v2  ;;  %v9308_v3 = vld [vmem:[%s14312_s7 + $0x8f8] sm:$0xf0] }
 0x4e2   : > { %6832 = vmatpush.bf16.msrb.mxu3 %v8751_v16  ;;  %6858 = vmatpush.bf16.msra.mxu1 %v8879_v38  ;;  %v10206_v16 = vld [vmem:[%s14312_s7 + $0x634] sm:$0xf]  ;;  %v9020_v38 = vld [vmem:[%s14312_s7 + $0x6b8] sm:$0xf0] }
 0x4e3   : > { %v8959_v55 = vor.u32 %v10206_v16, %v8956_v53  ;;  %v9023_v43 = vor.u32 %v10222_v31, %v9020_v38 }
 0x4e5   : > { %6820 = vmatpush.bf16.msrb.mxu2 %v8679_v25 }
 0x4e6   : > { %6833 = vmatpush.bf16.msrb.mxu3 %v8743_v4  ;;  %6859 = vmatpush.bf16.msra.mxu1 %v8871_v50 }
 0x4e8   : > { %6821 = vmatmul.bf16.vlgmr.msrb.gmra.mxu2 %v12371_v18  ;;  %v9039_v18 = vor.u32 %v10226_v54, %v9036_v42  ;;  %v6692_v30 = vpop.f32.mrf.mxu1  ;;  %v8932_v42 = vld [vmem:[%s14312_s7 + $0x608] sm:$0xf0] }
 0x4e9   : > { %6865 = vmatpush.bf16.msra.mxu2 %v8991_v9  ;;  %6834 = vmatmul.bf16.vlgmr.msrb.gmra.mxu3 %v12565_v51  ;;  %v9167_v51 = vor.u32 %v10258_v32, %v9164_v49  ;;  %v8951_v9 = vor.u32 %v10204_v15, %v8948_v12  ;;  %v10216_v32 = vld [vmem:[%s14312_s7 + $0x684] sm:$0xf]  ;;  %v8996_v49 = vld [vmem:[%s14312_s7 + $0x688] sm:$0xf0] }
 0x4ea   : > { %6878 = vmatpush.bf16.msra.mxu3 %v9055_v60  ;;  %6904 = vmatpush.bf16.msrb.mxu1 %v9183_v63  ;;  %v9015_v60 = vor.u32 %v10220_v45, %v9012_v46  ;;  %v9143_v63 = vor.u32 %v10252_v28, %v9140_v52  ;;  %v10274_v45 = vld [vmem:[%s14312_s7 + $0x854] sm:$0xf]  ;;  %v9228_v28 = vld [vmem:[%s14312_s7 + $0x858] sm:$0xf0] }
 0x4eb   : > { %6860 = vmatmul.bf16.vlgmr.msra.gmra.mxu1 %v12573_v22  ;;  %v9028_v22 = vld [vmem:[%s14312_s7 + $0x6c8] sm:$0xf0]  ;;  %v6666_v25 = vpop.f32.mrf.mxu2  ;;  %v10290_v52 = vld [vmem:[%s14312_s7 + $0x8d4] sm:$0xf] }
 0x4ec   : > { %v9031_v29 = vor.u32 %v10224_v47, %v9028_v22  ;;  %v6679_v4 = vpop.f32.mrf.mxu3  ;;  %v6667_v50 = vadd.f32 %v6666_v25, %v13740_v56  ;;  %v9004_v56 = vld [vmem:[%s14312_s7 + $0x698] sm:$0xf0]  ;;  %v10294_v22 = vld [vmem:[%s14312_s7 + $0x8f4] sm:$0xf] }
 0x4ed   : > { %6866 = vmatpush.bf16.msra.mxu2 %v8983_v36  ;;  %v9132_v36 = vld [vmem:[%s14312_s7 + $0x798] sm:$0xf0]  ;;  %v9007_v8 = vor.u32 %v10218_v11, %v9004_v56  ;;  %v9311_v31 = vor.u32 %v10294_v22, %v9308_v3  ;;  %v9412_v11 = vld [vmem:[%s14312_s7 + $0x9c8] sm:$0xf0]  ;;  %v10270_v56 = vld [vmem:[%s14312_s7 + $0x834] sm:$0xf] }
 0x4ee   : > { %6879 = vmatpush.bf16.msra.mxu3 %v9047_v20  ;;  %6905 = vmatpush.bf16.msrb.mxu1 %v9175_v0  ;;  %v6680_v17 = vadd.f32 %v6679_v4, %v6667_v50  ;;  %v8943_v20 = vor.u32 %v10202_v10, %v8940_v48  ;;  %v10200_v0 = vld [vmem:[%s14312_s7 + $0x604] sm:$0xf]  ;;  %v9135_v54 = vor.u32 %v10250_v33, %v9132_v36  ;;  %v9244_v47 = vld [vmem:[%s14312_s7 + $0x878] sm:$0xf0]  ;;  %v9284_v10 = vld [vmem:[%s14312_s7 + $0x8c8] sm:$0xf0] }
 0x4ef   : > { %v8935_v2 = vor.u32 %v10200_v0, %v8932_v42  ;;  %v9292_v25 = vld [vmem:[%s14312_s7 + $0x8d8] sm:$0xf0]  ;;  %v9231_v50 = vor.u32 %v10274_v45, %v9228_v28  ;;  %v10320_v48 = vld [vmem:[%s14312_s7 + $0x9c4] sm:$0xf]  ;;  %v10286_v0 = vld [vmem:[%s14312_s7 + $0x8b4] sm:$0xf] }
 0x4f0   : > { %v6694_v61 = vpop.f32.mrf.mxu1  ;;  %v13893_v14 = vadd.f32 %v6692_v30, %v6680_v17  ;;  %v10276_v30 = vld [vmem:[%s14312_s7 + $0x864] sm:$0xf]  ;;  %v9420_v4 = vld [vmem:[%s14312_s7 + $0x9d8] sm:$0xf0]  ;;  %v9415_v36 = vor.u32 %v10320_v48, %v9412_v11  ;;  %v9396_v3 = vld [vmem:[%s14312_s7 + $0x9a8] sm:$0xf0] }
 0x4f1   : > { %6867 = vmatpush.bf16.msra.mxu2 %v8975_v26  ;;  %v10248_v26 = vld [vmem:[%s14312_s7 + $0x784] sm:$0xf]  ;;  %v9239_v15 = vor.u32 %v10276_v30, %v9236_v6  ;;  %v9404_v42 = vld [vmem:[%s14312_s7 + $0x9b8] sm:$0xf0]  ;;  %v9252_v28 = vld [vmem:[%s14312_s7 + $0x888] sm:$0xf0] }
 0x4f2   : > { %6880 = vmatpush.bf16.msra.mxu3 %v9039_v18  ;;  %6906 = vmatpush.bf16.msrb.mxu1 %v9167_v51  ;;  %v9124_v18 = vld [vmem:[%s14312_s7 + $0x788] sm:$0xf0]  ;;  %v10278_v51 = vld [vmem:[%s14312_s7 + $0x874] sm:$0xf]  ;;  %v10316_v22 = vld [vmem:[%s14312_s7 + $0x9a4] sm:$0xf] }
 0x4f3   : > { %v6668_v7 = vpop.f32.mrf.mxu2  ;;  %v9127_v16 = vor.u32 %v10248_v26, %v9124_v18  ;;  %v9247_v53 = vor.u32 %v10278_v51, %v9244_v47  ;;  %v10268_v26 = vld [vmem:[%s14312_s7 + $0x824] sm:$0xf]  ;;  %v9204_v51 = vld [vmem:[%s14312_s7 + $0x828] sm:$0xf0]  ;;  %v9399_v30 = vor.u32 %v10316_v22, %v9396_v3  ;;  %v9260_v6 = vld [vmem:[%s14312_s7 + $0x898] sm:$0xf0] }
 0x4f4   : > { %v6681_v34 = vpop.f32.mrf.mxu3  ;;  %v10284_v7 = vld [vmem:[%s14312_s7 + $0x8a4] sm:$0xf] }
 0x4f5   : > { %6868 = vmatpush.bf16.msra.mxu2 %v8967_v62  ;;  %v10326_v62 = vld [vmem:[%s14312_s7 + $0x9f4] sm:$0xf]  ;;  %v9268_v34 = vld [vmem:[%s14312_s7 + $0x8a8] sm:$0xf0]  ;;  %v10280_v45 = vld [vmem:[%s14312_s7 + $0x884] sm:$0xf] }
 0x4f6   : > { %6881 = vmatpush.bf16.msra.mxu3 %v9031_v29  ;;  %6907 = vmatpush.bf16.msrb.mxu1 %v9159_v44  ;;  %v9436_v29 = vld [vmem:[%s14312_s7 + $0x9f8] sm:$0xf0]  ;;  %v8999_v44 = vor.u32 %v10216_v32, %v8996_v49  ;;  %v9255_v48 = vor.u32 %v10280_v45, %v9252_v28  ;;  %v10336_v3 = vld [vmem:[%s14312_s7 + $0xa44] sm:$0xf] }
 0x4f7   : > { %v9439_v38 = vor.u32 %v10326_v62, %v9436_v29  ;;  %v10332_v28 = vld [vmem:[%s14312_s7 + $0xa24] sm:$0xf] }
 0x4f9   : > { %6869 = vmatpush.bf16.msra.mxu2 %v8959_v55  ;;  %v9300_v55 = vld [vmem:[%s14312_s7 + $0x8e8] sm:$0xf0] }
 0x4fa   : > { %6882 = vmatpush.bf16.msra.mxu3 %v9023_v43  ;;  %6908 = vmatpush.bf16.msrb.mxu1 %v9151_v40  ;;  %v10324_v43 = vld [vmem:[%s14312_s7 + $0x9e4] sm:$0xf]  ;;  %v9428_v40 = vld [vmem:[%s14312_s7 + $0x9e8] sm:$0xf0]  ;;  %v9303_v12 = vor.u32 %v10292_v5, %v9300_v55  ;;  %v10314_v5 = vld [vmem:[%s14312_s7 + $0x994] sm:$0xf] }
 0x4fb   : > { %v9431_v46 = vor.u32 %v10324_v43, %v9428_v40  ;;  %v9388_v55 = vld [vmem:[%s14312_s7 + $0x998] sm:$0xf0] }
 0x4fd   : > { %6870 = vmatpush.bf16.msra.mxu2 %v8951_v9  ;;  %v9295_v9 = vor.u32 %v10290_v52, %v9292_v25  ;;  %v10312_v52 = vld [vmem:[%s14312_s7 + $0x984] sm:$0xf]  ;;  %v9380_v25 = vld [vmem:[%s14312_s7 + $0x988] sm:$0xf0] }
 0x4fe   : > { %6883 = vmatpush.bf16.msra.mxu3 %v9015_v60  ;;  %6909 = vmatpush.bf16.msrb.mxu1 %v9143_v63  ;;  %v10272_v60 = vld [vmem:[%s14312_s7 + $0x844] sm:$0xf]  ;;  %v9383_v11 = vor.u32 %v10312_v52, %v9380_v25  ;;  %v9460_v52 = vld [vmem:[%s14312_s7 + $0xa28] sm:$0xf0] }
 0x4ff   : > { %v10288_v63 = vld [vmem:[%s14312_s7 + $0x8c4] sm:$0xf] }
 0x500   : > { %v9287_v61 = vor.u32 %v10288_v63, %v9284_v10  ;;  %v9692_v63 = vld [vmem:[%s14312_s7 + $0xbf8] sm:$0xf0]  ;;  %v10348_v25 = vld [vmem:[%s14312_s7 + $0xaa4] sm:$0xf] }
 0x501   : > { %6871 = vmatpush.bf16.msra.mxu2 %v8943_v20  ;;  %v9212_v20 = vld [vmem:[%s14312_s7 + $0x838] sm:$0xf0] }
 0x502   : > { %6884 = vmatpush.bf16.msra.mxu3 %v9007_v8  ;;  %6910 = vmatpush.bf16.msrb.mxu1 %v9135_v54  ;;  %v9276_v8 = vld [vmem:[%s14312_s7 + $0x8b8] sm:$0xf0]  ;;  %v10318_v54 = vld [vmem:[%s14312_s7 + $0x9b4] sm:$0xf]  ;;  %v9215_v32 = vor.u32 %v10270_v56, %v9212_v20  ;;  %v10356_v20 = vld [vmem:[%s14312_s7 + $0xae4] sm:$0xf] }
 0x503   : > { %v9279_v49 = vor.u32 %v10286_v0, %v9276_v8  ;;  %v9407_v18 = vor.u32 %v10318_v54, %v9404_v42  ;;  %v9556_v0 = vld [vmem:[%s14312_s7 + $0xae8] sm:$0xf0]  ;;  %v10388_v8 = vld [vmem:[%s14312_s7 + $0xbe4] sm:$0xf] }
 0x504   : > { %v9684_v54 = vld [vmem:[%s14312_s7 + $0xbe8] sm:$0xf0] }
 0x505   : > { %6872 = vmatpush.bf16.msra.mxu2 %v8935_v2 }
 0x506   : > { %6885 = vmatpush.bf16.msra.mxu3 %v8999_v44  ;;  %6911 = vmatpush.bf16.msrb.mxu1 %v9127_v16  ;;  %v9207_v44 = vor.u32 %v10268_v26, %v9204_v51  ;;  %v9271_v16 = vor.u32 %v10284_v7, %v9268_v34  ;;  %v10338_v26 = vld [vmem:[%s14312_s7 + $0xa54] sm:$0xf]  ;;  %v9548_v7 = vld [vmem:[%s14312_s7 + $0xad8] sm:$0xf0] }
 0x507   : > { %v10354_v51 = vld [vmem:[%s14312_s7 + $0xad4] sm:$0xf] }
 0x508   : > { %6873 = vmatmul.bf16.vlgmr.msra.gmra.mxu2 %v12725_v24  ;;  %v10322_v24 = vld [vmem:[%s14312_s7 + $0x9d4] sm:$0xf]  ;;  %v6731_v33 = vpop.f32.mrf.mxu1 }
 0x509   : > { %6917 = vmatpush.bf16.msrb.mxu2 %v9247_v53  ;;  %6886 = vmatmul.bf16.vlgmr.msra.gmra.mxu3 %v12727_v35  ;;  %v9423_v35 = vor.u32 %v10322_v24, %v9420_v4  ;;  %v10266_v53 = vld [vmem:[%s14312_s7 + $0x814] sm:$0xf] }
 0x50a   : > { %6930 = vmatpush.bf16.msrb.mxu3 %v9311_v31  ;;  %6956 = vmatpush.bf16.msra.mxu1 %v9439_v38  ;;  %v9196_v38 = vld [vmem:[%s14312_s7 + $0x818] sm:$0xf0]  ;;  %v10342_v4 = vld [vmem:[%s14312_s7 + $0xa74] sm:$0xf] }
 0x50b   : > { %6912 = vmatmul.bf16.vlgmr.msrb.gmra.mxu1 %v12876_v23  ;;  %v9220_v23 = vld [vmem:[%s14312_s7 + $0x848] sm:$0xf0]  ;;  %v6705_v47 = vpop.f32.mrf.mxu2  ;;  %v9199_v43 = vor.u32 %v10266_v53, %v9196_v38  ;;  %v10386_v34 = vld [vmem:[%s14312_s7 + $0xbd4] sm:$0xf] }
 0x50c   : > { %v9223_v17 = vor.u32 %v10272_v60, %v9220_v23  ;;  %v14022_v2 = vadd.f32 %v6705_v47, %v13893_v14  ;;  %v6718_v62 = vpop.f32.mrf.mxu3  ;;  %v10282_v14 = vld [vmem:[%s14312_s7 + $0x894] sm:$0xf]  ;;  %v9676_v47 = vld [vmem:[%s14312_s7 + $0xbd8] sm:$0xf0]  ;;  %v9668_v53 = vld [vmem:[%s14312_s7 + $0xbc8] sm:$0xf0] }
 0x50d   : > { %6918 = vmatpush.bf16.msrb.mxu2 %v9239_v15  ;;  %v14024_v29 = vadd.f32 %v6731_v33, %v6718_v62  ;;  %v9263_v40 = vor.u32 %v10282_v14, %v9260_v6  ;;  %v10264_v15 = vld [vmem:[%s14312_s7 + $0x804] sm:$0xf]  ;;  %v10390_v23 = vld [vmem:[%s14312_s7 + $0xbf4] sm:$0xf]  ;;  %v9476_v62 = vld [vmem:[%s14312_s7 + $0xa48] sm:$0xf0] }
 0x50e   : > { %6931 = vmatpush.bf16.msrb.mxu3 %v9303_v12  ;;  %6957 = vmatpush.bf16.msra.mxu1 %v9431_v46  ;;  %v9188_v12 = vld [vmem:[%s14312_s7 + $0x808] sm:$0xf0]  ;;  %v9391_v46 = vor.u32 %v10314_v5, %v9388_v55  ;;  %v9695_v56 = vor.u32 %v10390_v23, %v9692_v63  ;;  %v10340_v33 = vld [vmem:[%s14312_s7 + $0xa64] sm:$0xf]  ;;  %v10334_v14 = vld [vmem:[%s14312_s7 + $0xa34] sm:$0xf]  ;;  %v9463_v23 = vor.u32 %v10332_v28, %v9460_v52 }
 0x50f   : > { %v9191_v10 = vor.u32 %v10264_v15, %v9188_v12  ;;  %v9468_v6 = vld [vmem:[%s14312_s7 + $0xa38] sm:$0xf0]  ;;  %v10350_v5 = vld [vmem:[%s14312_s7 + $0xab4] sm:$0xf] }
 0x510   : > { %v6733_v31 = vpop.f32.mrf.mxu1  ;;  %v9660_v15 = vld [vmem:[%s14312_s7 + $0xbb8] sm:$0xf0]  ;;  %v9471_v12 = vor.u32 %v10334_v14, %v9468_v6  ;;  %v10394_v52 = vld [vmem:[%s14312_s7 + $0xc14] sm:$0xf] }
 0x511   : > { %6919 = vmatpush.bf16.msrb.mxu2 %v9231_v50  ;;  %v9500_v50 = vld [vmem:[%s14312_s7 + $0xa78] sm:$0xf0]  ;;  %v9479_v31 = vor.u32 %v10336_v3, %v9476_v62 }
 0x512   : > { %6932 = vmatpush.bf16.msrb.mxu3 %v9295_v9  ;;  %6958 = vmatpush.bf16.msra.mxu1 %v9423_v35  ;;  %v10358_v9 = vld [vmem:[%s14312_s7 + $0xaf4] sm:$0xf]  ;;  %v9564_v35 = vld [vmem:[%s14312_s7 + $0xaf8] sm:$0xf0] }
 0x513   : > { %v6707_v24 = vpop.f32.mrf.mxu2 }
 0x514   : > { %v6720_v60 = vpop.f32.mrf.mxu3  ;;  %v9524_v24 = vld [vmem:[%s14312_s7 + $0xaa8] sm:$0xf0] }
 0x515   : > { %6920 = vmatpush.bf16.msrb.mxu2 %v9223_v17  ;;  %v9503_v17 = vor.u32 %v10342_v4, %v9500_v50  ;;  %v10380_v4 = vld [vmem:[%s14312_s7 + $0xba4] sm:$0xf]  ;;  %v9652_v50 = vld [vmem:[%s14312_s7 + $0xba8] sm:$0xf0]  ;;  %v9527_v63 = vor.u32 %v10348_v25, %v9524_v24  ;;  %v9708_v25 = vld [vmem:[%s14312_s7 + $0xc18] sm:$0xf0] }
 0x516   : > { %6933 = vmatpush.bf16.msrb.mxu3 %v9287_v61  ;;  %6959 = vmatpush.bf16.msra.mxu1 %v9415_v36  ;;  %v9567_v61 = vor.u32 %v10358_v9, %v9564_v35  ;;  %v9492_v36 = vld [vmem:[%s14312_s7 + $0xa68] sm:$0xf0] }
 0x517   : > { %v9495_v42 = vor.u32 %v10340_v33, %v9492_v36  ;;  %v10378_v33 = vld [vmem:[%s14312_s7 + $0xb94] sm:$0xf]  ;;  %v9644_v36 = vld [vmem:[%s14312_s7 + $0xb98] sm:$0xf0] }
 0x519   : > { %6921 = vmatpush.bf16.msrb.mxu2 %v9215_v32  ;;  %v9559_v32 = vor.u32 %v10356_v20, %v9556_v0 }
 0x51a   : > { %6934 = vmatpush.bf16.msrb.mxu3 %v9279_v49  ;;  %6960 = vmatpush.bf16.msra.mxu1 %v9407_v18  ;;  %v9687_v49 = vor.u32 %v10388_v8, %v9684_v54  ;;  %v9484_v18 = vld [vmem:[%s14312_s7 + $0xa58] sm:$0xf0]  ;;  %v9647_v54 = vor.u32 %v10378_v33, %v9644_v36 }
 0x51b   : > { %v9487_v22 = vor.u32 %v10338_v26, %v9484_v18  ;;  %v9508_v26 = vld [vmem:[%s14312_s7 + $0xa88] sm:$0xf0]  ;;  %v10376_v18 = vld [vmem:[%s14312_s7 + $0xb84] sm:$0xf] }
 0x51d   : > { %6922 = vmatpush.bf16.msrb.mxu2 %v9207_v44  ;;  %v10352_v44 = vld [vmem:[%s14312_s7 + $0xac4] sm:$0xf] }
 0x51e   : > { %6935 = vmatpush.bf16.msrb.mxu3 %v9271_v16  ;;  %6961 = vmatpush.bf16.msra.mxu1 %v9399_v30  ;;  %v10384_v16 = vld [vmem:[%s14312_s7 + $0xbc4] sm:$0xf] }
 0x51f   : > { %v9671_v38 = vor.u32 %v10384_v16, %v9668_v53  ;;  %v10402_v53 = vld [vmem:[%s14312_s7 + $0xc54] sm:$0xf] }
 0x521   : > { %6923 = vmatpush.bf16.msrb.mxu2 %v9199_v43  ;;  %v9532_v43 = vld [vmem:[%s14312_s7 + $0xab8] sm:$0xf0] }
 0x522   : > { %6936 = vmatpush.bf16.msrb.mxu3 %v9263_v40  ;;  %6962 = vmatpush.bf16.msra.mxu1 %v9391_v46  ;;  %v10382_v40 = vld [vmem:[%s14312_s7 + $0xbb4] sm:$0xf]  ;;  %v9535_v45 = vor.u32 %v10350_v5, %v9532_v43  ;;  %v9716_v43 = vld [vmem:[%s14312_s7 + $0xc28] sm:$0xf0] }
 0x523   : > { %v9663_v46 = vor.u32 %v10382_v40, %v9660_v15  ;;  %v10398_v5 = vld [vmem:[%s14312_s7 + $0xc34] sm:$0xf] }
 0x525   : > { %6924 = vmatpush.bf16.msrb.mxu2 %v9191_v10  ;;  %v9655_v10 = vor.u32 %v10380_v4, %v9652_v50  ;;  %v9711_v4 = vor.u32 %v10394_v52, %v9708_v25  ;;  %v10392_v50 = vld [vmem:[%s14312_s7 + $0xc04] sm:$0xf] }
 0x526   : > { %6937 = vmatpush.bf16.msrb.mxu3 %v9255_v48  ;;  %6963 = vmatpush.bf16.msra.mxu1 %v9383_v11  ;;  %v10330_v48 = vld [vmem:[%s14312_s7 + $0xa14] sm:$0xf]  ;;  %v9452_v11 = vld [vmem:[%s14312_s7 + $0xa18] sm:$0xf0] }
 0x527   : > { %v9455_v20 = vor.u32 %v10330_v48, %v9452_v11 }
 0x528   : > { %6925 = vmatmul.bf16.vlgmr.msrb.gmra.mxu2 %v12878_v41  ;;  %v9551_v41 = vor.u32 %v10354_v51, %v9548_v7  ;;  %v6770_v55 = vpop.f32.mrf.mxu1  ;;  %v9636_v51 = vld [vmem:[%s14312_s7 + $0xb88] sm:$0xf0] }
 0x529   : > { %6969 = vmatpush.bf16.msra.mxu2 %v9503_v17  ;;  %6938 = vmatmul.bf16.vlgmr.msrb.gmra.mxu3 %v12880_v37  ;;  %v9679_v37 = vor.u32 %v10386_v34, %v9676_v47  ;;  %v10346_v17 = vld [vmem:[%s14312_s7 + $0xa94] sm:$0xf]  ;;  %v9639_v3 = vor.u32 %v10376_v18, %v9636_v51 }
 0x52a   : > { %6982 = vmatpush.bf16.msra.mxu3 %v9567_v61  ;;  %7008 = vmatpush.bf16.msrb.mxu1 %v9695_v56  ;;  %v10406_v47 = vld [vmem:[%s14312_s7 + $0xc74] sm:$0xf] }
 0x52b   : > { %6964 = vmatmul.bf16.vlgmr.msra.gmra.mxu1 %v13031_v59  ;;  %v9540_v59 = vld [vmem:[%s14312_s7 + $0xac8] sm:$0xf0]  ;;  %v6744_v9 = vpop.f32.mrf.mxu2 }
 0x52c   : > { %v9543_v30 = vor.u32 %v10352_v44, %v9540_v59  ;;  %v6757_v60 = vpop.f32.mrf.mxu3  ;;  %v6745_v35 = vadd.f32 %v6744_v9, %v14024_v29  ;;  %v9516_v29 = vld [vmem:[%s14312_s7 + $0xa98] sm:$0xf0]  ;;  %v10404_v44 = vld [vmem:[%s14312_s7 + $0xc64] sm:$0xf]  ;;  %v9748_v59 = vld [vmem:[%s14312_s7 + $0xc68] sm:$0xf0] }
 0x52d   : > { %6970 = vmatpush.bf16.msra.mxu2 %v9495_v42  ;;  %v9519_v8 = vor.u32 %v10346_v17, %v9516_v29  ;;  %v10328_v42 = vld [vmem:[%s14312_s7 + $0xa04] sm:$0xf]  ;;  %v9751_v16 = vor.u32 %v10404_v44, %v9748_v59  ;;  %v9700_v9 = vld [vmem:[%s14312_s7 + $0xc08] sm:$0xf0] }
 0x52e   : > { %6983 = vmatpush.bf16.msra.mxu3 %v9559_v32  ;;  %7009 = vmatpush.bf16.msrb.mxu1 %v9687_v49  ;;  %v6758_v61 = vadd.f32 %v6757_v60, %v6745_v35  ;;  %v9444_v32 = vld [vmem:[%s14312_s7 + $0xa08] sm:$0xf0]  ;;  %v10344_v49 = vld [vmem:[%s14312_s7 + $0xa84] sm:$0xf] }
 0x530   : > { %v6772_v56 = vpop.f32.mrf.mxu1  ;;  %v6771_v0 = vadd.f32 %v6770_v55, %v6758_v61  ;;  %v10396_v55 = vld [vmem:[%s14312_s7 + $0xc24] sm:$0xf] }
 0x531   : > { %6971 = vmatpush.bf16.msra.mxu2 %v9487_v22  ;;  %v9756_v22 = vld [vmem:[%s14312_s7 + $0xc78] sm:$0xf0] }
 0x532   : > { %6984 = vmatpush.bf16.msra.mxu3 %v9551_v41  ;;  %7010 = vmatpush.bf16.msrb.mxu1 %v9679_v37  ;;  %v9447_v41 = vor.u32 %v10328_v42, %v9444_v32  ;;  %v9511_v37 = vor.u32 %v10344_v49, %v9508_v26  ;;  %v9759_v62 = vor.u32 %v10406_v47, %v9756_v22 }
 0x533   : > { %v6746_v7 = vpop.f32.mrf.mxu2 }
 0x534   : > { %v6759_v34 = vpop.f32.mrf.mxu3 }
 0x535   : > { %6972 = vmatpush.bf16.msra.mxu2 %v9479_v31  ;;  %v9740_v31 = vld [vmem:[%s14312_s7 + $0xc58] sm:$0xf0] }
 0x536   : > { %6985 = vmatpush.bf16.msra.mxu3 %v9543_v30  ;;  %7011 = vmatpush.bf16.msrb.mxu1 %v9671_v38  ;;  %v9743_v30 = vor.u32 %v10402_v53, %v9740_v31  ;;  %v10400_v38 = vld [vmem:[%s14312_s7 + $0xc44] sm:$0xf] }
 0x539   : > { %6973 = vmatpush.bf16.msra.mxu2 %v9471_v12 }
 0x53a   : > { %6986 = vmatpush.bf16.msra.mxu3 %v9535_v45  ;;  %7012 = vmatpush.bf16.msrb.mxu1 %v9663_v46  ;;  %v9719_v45 = vor.u32 %v10396_v55, %v9716_v43 }
 0x53d   : > { %6974 = vmatpush.bf16.msra.mxu2 %v9463_v23  ;;  %v9703_v23 = vor.u32 %v10392_v50, %v9700_v9 }
 0x53e   : > { %6987 = vmatpush.bf16.msra.mxu3 %v9527_v63  ;;  %7013 = vmatpush.bf16.msrb.mxu1 %v9655_v10 }
 0x541   : > { %6975 = vmatpush.bf16.msra.mxu2 %v9455_v20 }
 0x542   : > { %6988 = vmatpush.bf16.msra.mxu3 %v9519_v8  ;;  %7014 = vmatpush.bf16.msrb.mxu1 %v9647_v54 }
 0x545   : > { %6976 = vmatpush.bf16.msra.mxu2 %v9447_v41 }
 0x546   : > { %6989 = vmatpush.bf16.msra.mxu3 %v9511_v37  ;;  %7015 = vmatpush.bf16.msrb.mxu1 %v9639_v3 }
 0x548   : > { %6977 = vmatmul.bf16.vlgmr.msra.gmra.mxu2 %v13033_v1  ;;  %v9732_v1 = vld [vmem:[%s14312_s7 + $0xc48] sm:$0xf0]  ;;  %v6809_v6 = vpop.f32.mrf.mxu1 }
 0x549   : > { %7021 = vmatpush.bf16.msrb.mxu2 %v9759_v62  ;;  %6990 = vmatmul.bf16.vlgmr.msra.gmra.mxu3 %v13188_v57  ;;  %v9735_v14 = vor.u32 %v10400_v38, %v9732_v1  ;;  %v9724_v57 = vld [vmem:[%s14312_s7 + $0xc38] sm:$0xf0]  ;;  %v7034_v1 = vld [vmem:[%s14313_s8] sm:$0x3] }
 0x54a   : > { %7016 = vmatmul.bf16.vlgmr.msrb.gmra.mxu1 %v13190_v27  ;;  %v9727_v27 = vor.u32 %v10398_v5, %v9724_v57  ;;  %v7042_v5 = vld [vmem:[%s14314_s9] sm:$0x3] }
 0x54b   : > { %v6783_v40 = vpop.f32.mrf.mxu2  ;;  %v7044_v43 = vperm.slane %v7042_v5, 0 }
 0x54c   : > { %v6784_v15 = vadd.f32 %v6783_v40, %v6771_v0  ;;  %v6796_v12 = vpop.f32.mrf.mxu3 }
 0x54d   : > { %7022 = vmatpush.bf16.msrb.mxu2 %v9751_v16 }
 0x54e   : > { %v6797_v46 = vadd.f32 %v6796_v12, %v6784_v15  ;;  %v7045_v15 = vperm.slane %v7042_v5, 1 }
 0x550   : > { %v6811_v28 = vpop.f32.mrf.mxu1  ;;  %v6810_v24 = vadd.f32 %v6809_v6, %v6797_v46  ;;  %v7036_v6 = vperm.slane %v7034_v1, 0  ;;  %v7058_v46 = vlaneseq }
 0x551   : > { %7023 = vmatpush.bf16.msrb.mxu2 %v9743_v30 }
 0x552   : > { %vm7060_vm4 = vcmp.lt.s32.totalorder %v7058_v46, 256 }
 0x553   : > { %v6785_v60 = vpop.f32.mrf.mxu2 }
 0x554   : > { %v6798_v35 = vpop.f32.mrf.mxu3 }
 0x555   : > { %7024 = vmatpush.bf16.msrb.mxu2 %v9735_v14 }
 0x559   : > { %7025 = vmatpush.bf16.msrb.mxu2 %v9727_v27  ;;  %v7037_v27 = vperm.slane %v7034_v1, 1 }
 0x55d   : > { %7026 = vmatpush.bf16.msrb.mxu2 %v9719_v45 }
 0x561   : > { %7027 = vmatpush.bf16.msrb.mxu2 %v9711_v4 }
 0x565   : > { %7028 = vmatpush.bf16.msrb.mxu2 %v9703_v23 }
 0x568   : > { %7029 = vmatmul.bf16.vlgmr.msrb.gmra.mxu2 %v13344_v21  ;;  %v6861_v63 = vpop.f32.mrf.mxu1 }
 0x56b   : > { %v6822_v10 = vpop.f32.mrf.mxu2 }
 0x56c   : > { %v6835_v48 = vpop.f32.mrf.mxu3  ;;  %v6823_v11 = vadd.f32 %v6822_v10, %v6810_v24 }
 0x56e   : > { %v6836_v17 = vadd.f32 %v6835_v48, %v6823_v11 }
 0x570   : > { %v6863_v61 = vpop.f32.mrf.mxu1  ;;  %v6849_v56 = vadd.f32 %v12939_v39, %v6836_v17 }
 0x572   : > { %v6862_v29 = vadd.f32 %v6861_v63, %v6849_v56 }
 0x573   : > { %v6824_v33 = vpop.f32.mrf.mxu2 }
 0x574   : > { %v6837_v36 = vpop.f32.mrf.mxu3 }
 0x588   : > { %v6913_v20 = vpop.f32.mrf.mxu1 }
 0x58b   : > { %v6874_v0 = vpop.f32.mrf.mxu2 }
 0x58c   : > { %v6875_v8 = vadd.f32 %v6874_v0, %v6862_v29  ;;  %v6887_v54 = vpop.f32.mrf.mxu3 }
 0x58e   : > { %v6888_v42 = vadd.f32 %v6887_v54, %v6875_v8 }
 0x590   : > { %v6915_v32 = vpop.f32.mrf.mxu1  ;;  %v6901_v49 = vadd.f32 %v13035_v58, %v6888_v42 }
 0x592   : > { %v6914_v21 = vadd.f32 %v6913_v20, %v6901_v49 }
 0x593   : > { %v6876_v26 = vpop.f32.mrf.mxu2 }
 0x594   : > { %v6889_v18 = vpop.f32.mrf.mxu3 }
 0x5a8   : > { %v6965_v51 = vpop.f32.mrf.mxu1 }
 0x5ab   : > { %v6926_v7 = vpop.f32.mrf.mxu2 }
 0x5ac   : > { %v6939_v34 = vpop.f32.mrf.mxu3  ;;  %v6927_v62 = vadd.f32 %v6926_v7, %v6914_v21 }
 0x5ae   : > { %v6940_v59 = vadd.f32 %v6939_v34, %v6927_v62 }
 0x5b0   : > { %v6967_v47 = vpop.f32.mrf.mxu1  ;;  %v6953_v58 = vadd.f32 %v13115_v13, %v6940_v59  ;;  %v7040_v13 = vmul.f32 %v7036_v6, %v14022_v2 }
 0x5b2   : > { %v6966_v31 = vadd.f32 %v6965_v51, %v6953_v58 }
 0x5b3   : > { %v6928_v22 = vpop.f32.mrf.mxu2 }
 0x5b4   : > { %v6941_v39 = vpop.f32.mrf.mxu3 }
 0x5c7   : > { %v7017_v41 = vpop.f32.mrf.mxu1 }
 0x5cb   : > { %v6978_v37 = vpop.f32.mrf.mxu2 }
 0x5cc   : > { %v6991_v3 = vpop.f32.mrf.mxu3  ;;  %v6979_v30 = vadd.f32 %v6978_v37, %v6966_v31 }
 0x5ce   : > { %v6992_v38 = vadd.f32 %v6991_v3, %v6979_v30 }
 0x5cf   : > { %v7019_v44 = vpop.f32.mrf.mxu1 }
 0x5d0   : > { %v7005_v14 = vadd.f32 %v13277_v19, %v6992_v38  ;;  %v7048_v19 = vadd.f32 %v7044_v43, %v7040_v13 }
 0x5d2   : > { %v7018_v57 = vadd.f32 %v7017_v41, %v7005_v14  ;;  %v7050_v2 = vmax.f32 %v7048_v19, 0.0 }
 0x5d3   : > { %v6980_v16 = vpop.f32.mrf.mxu2 }
 0x5d4   : > { %v6993_v53 = vpop.f32.mrf.mxu3 }
 0x5eb   : > { %v7030_v55 = vpop.f32.mrf.mxu2 }
 0x5ec   : > { %v7031_v40 = vadd.f32 %v7030_v55, %v7018_v57 }
 0x5ee   : > { %v7041_v12 = vmul.f32 %v7037_v27, %v7031_v40 }
 0x5f0   : > { %v7049_v45 = vadd.f32 %v7045_v15, %v7041_v12 }
 0x5f2   : > { %v7051_v28 = vmax.f32 %v7049_v45, 0.0 }
 0x5f3   : > { %v7032_v52 = vpop.f32.mrf.mxu2 }
 0x5f4   : > { %v7054_v25 = vrot.slane %v7051_v28, 7 }
 0x5f6   : > { %v7056_v24 = vsel %vm7055_vm3, %v7050_v2, %v7054_v25 }
 0x5f7   : > { %7062 = vst.msk [vmem:[%s352_s28] sm:$0x3] %vm7060_vm4, %v7056_v24 }
 0x5f8   : > { %10484 = shalt.err (!%p10481_p3)
}
 0x5f9   : > { %10409 = dma.vmem_to_hbm [thread:$0]  (%p10615_p5), %s7077_s29, 32, %s7079_s11, %s7064_s17  }
 0x5fa PF: > { %p10415_p4 = scmp.ge.s32.totalorder %s10519_s16, 2  ;;  %s7090_s21 = sand.u32 1, %s10507_s13  }
 0x5fb   : > { %s7091_s30 = scalar_lea.sflag [#allocation5], %s7090_s21 }
 0x5fc   : > { %p10412_p7 = pnand %p10415_p4, %p10619_p6 }
 0x5fe   : > { %p10413_p8 = pneg %p10412_p7 }
 0x600   : > { %10502 = dma.done.wait (%p10413_p8), %s7091_s30, 32  }
 0x601   : > { %10504 = vsyncadd (%p10413_p8), %s7091_s30, 4294967264  ;;  %p20_p9 = scmp.ge.s32.totalorder %s10602_s19, 4   ;;  %s14320_s13 = smov %s10511_s14 }
 0x602   : > { %s14321_s14 = smov %s10515_s15  ;;  %s14322_s15 = smov %s10613_s22 }
 0x603   : > { %s14323_s16 = smov %s10602_s19  ;;  %22 = sbr.rel (!%p20_p9) target bundleno = 5 (0x5), region = 95 }
 0x608   :  { %7097 = vsyncpa [#allocation5], 1 }
 0x609   :  { %7099 = vsyncpa [#allocation5 + $0x1], 1 }

</bundles_post_ra>
